<compile_context>
chip_gen: v6e
topology: v6e:2x2x1
jax: 0.10.0
libtpu: 0.0.40
codegen_flags: <defaults>
</compile_context>

<pallas_src>
import jax
import jax.numpy as jnp
from jax import lax
from jax.experimental import pallas as pl
from jax.experimental.pallas import tpu as pltpu

EPS = 1e-5
LANE = 128


# ---------------------------------------------------------------------------
# kernels
# ---------------------------------------------------------------------------
def _conv1x1_stats_kernel(x_ref, w_ref, y_ref, st_ref):
    """y = x @ w (bf16 operands, f32 accumulate) + per-tile sum / sum-of-squares."""
    acc = jnp.dot(x_ref[...].astype(jnp.bfloat16), w_ref[...],
                  preferred_element_type=jnp.float32)
    y_ref[...] = acc.astype(y_ref.dtype)
    # stats rows written directly (rows 2..7 of the block are never read)
    st_ref[0:1, :] = jnp.sum(acc, axis=0, keepdims=True)
    st_ref[1:2, :] = jnp.sum(acc * acc, axis=0, keepdims=True)


def _make_bn_relu_conv1x1_stats_kernel(rows_valid, row_tile):
    """a = relu(y*scale + shift); o = a @ w; per-tile stats of o.

    If the flat row count was padded up to a multiple of row_tile, padded
    (zero) input rows would contribute relu(shift) != 0 to the statistics,
    so they are masked out (static branch: zero cost when no padding)."""
    need_mask = rows_valid % row_tile != 0

    def kernel(y_ref, ss_ref, w_ref, o_ref, st_ref):
        a = jnp.maximum(
            y_ref[...].astype(jnp.float32) * ss_ref[0:1, :] + ss_ref[1:2, :], 0.0)
        acc = jnp.dot(a.astype(jnp.bfloat16), w_ref[...],
                      preferred_element_type=jnp.float32)
        o_ref[...] = acc.astype(o_ref.dtype)
        if need_mask:
            row = (pl.program_id(0) * row_tile
                   + lax.broadcasted_iota(jnp.int32, acc.shape, 0))
            stat = jnp.where(row < rows_valid, acc, 0.0)
        else:
            stat = acc
        st_ref[0:1, :] = jnp.sum(stat, axis=0, keepdims=True)
        st_ref[1:2, :] = jnp.sum(stat * stat, axis=0, keepdims=True)

    return kernel


def _make_bn_relu_conv3x3_stats_kernel(strip_h, width):
    """Per row-strip: BN1+ReLU, 3x3 'SAME' conv as 9 accumulated tap matmuls
    (no materialized im2col patch), and BN2 per-tile statistics."""
    SH, W = strip_h, width

    def kernel(y_ref, ytop_ref, ybot_ref, ss_ref, w_ref, o_ref, st_ref, pad_ref):
        C = y_ref.shape[-1]
        s = pl.program_id(1)
        n_strips = pl.num_programs(1)
        scale = ss_ref[0:1, :]
        shift = ss_ref[1:2, :]

        # strip interior: BN1 + ReLU (f32 math on bf16 activations)
        a = jnp.maximum(y_ref[...].astype(jnp.float32) * scale + shift, 0.0)
        pad_ref[1:SH + 1, 1:W + 1, :] = a.reshape(SH, W, C)

        # 1-row halos above/below the strip, zeroed at the image border
        top = jnp.maximum(ytop_ref[...].astype(jnp.float32) * scale + shift, 0.0)
        bot = jnp.maximum(ybot_ref[...].astype(jnp.float32) * scale + shift, 0.0)
        top = jnp.where(s > 0, top, 0.0)
        bot = jnp.where(s < n_strips - 1, bot, 0.0)
        pad_ref[0:1, 1:W + 1, :] = top.reshape(1, W, C)
        pad_ref[SH + 1:SH + 2, 1:W + 1, :] = bot.reshape(1, W, C)

        # zero ONLY the 1-pixel left/right border columns every step (the rest
        # is fully overwritten above).  Do NOT gate this with
        # pl.when(program_id == 0): under megacore each core has its own
        # persistent scratch and may never execute program 0.
        zcol = jnp.zeros((SH + 2, 1, C), jnp.float32)
        pad_ref[:, 0:1, :] = zcol
        pad_ref[:, W + 1:W + 2, :] = zcol

        # 3x3 conv = 9 accumulated tap matmuls (bf16 operands, f32 accumulate)
        acc = jnp.zeros((SH * W, C), jnp.float32)
        for dh in range(3):
            for dw in range(3):
                tap = pad_ref[dh:dh + SH, dw:dw + W, :].reshape(SH * W, C)
                acc = acc + jnp.dot(tap.astype(jnp.bfloat16),
                                    w_ref[dh * 3 + dw],
                                    preferred_element_type=jnp.float32)
        o_ref[...] = acc.astype(o_ref.dtype)
        st_ref[0:1, :] = jnp.sum(acc, axis=0, keepdims=True)
        st_ref[1:2, :] = jnp.sum(acc * acc, axis=0, keepdims=True)

    return kernel


def _bn_residual_relu_kernel(y_ref, x_ref, ss_ref, o_ref):
    o_ref[...] = jnp.maximum(
        y_ref[...].astype(jnp.float32) * ss_ref[0:1, :] + ss_ref[1:2, :]
        + x_ref[...], 0.0)


# ---------------------------------------------------------------------------
# wrapper helpers
# ---------------------------------------------------------------------------
def _round_up(n, m):
    return ((n + m - 1) // m) * m


def _pad_cols(a, c):
    p = c - a.shape[-1]
    if p == 0:
        return a
    return jnp.pad(a, [(0, 0)] * (a.ndim - 1) + [(0, p)])


def _pick_row_tile(rows, target=512):
    """Row tile for the flat 1x1 / elementwise passes.  Large tiles (~512)
    approach the HBM roofline; awkward row counts are handled by padding plus
    masked statistics, never by shrinking to tiny tiles."""
    rt = min(target, _round_up(rows, 8))
    # give the megacore at least two grid steps when there is enough work
    if rows > 8 and _round_up(rows, rt) // rt < 2:
        rt = max(8, _round_up((rows + 1) // 2, 8))
    return rt


def _pick_strip_rows(h, target=8):
    """Image-row strip height for the 3x3 conv pass (largest divisor <= target)."""
    sh = min(target, h)
    while h % sh:
        sh -= 1
    return sh


def _vmem_limit_bytes():
    """~half of physical VMEM, capped at 64 MiB (v5e/v6e: 128 -> 64 MiB,
    v7x: 64 -> 32 MiB); conservative fallback if the query is unavailable."""
    cap = 64 * 1024 * 1024
    try:
        info_fn = getattr(pltpu, "get_tpu_info", None)
        if info_fn is not None:
            cap = int(info_fn().vmem_capacity_bytes)
    except Exception:
        pass
    return max(32 * 1024 * 1024, min(cap // 2, 64 * 1024 * 1024))


def _bn_scale_shift(stats, count, gamma, beta):
    """Reduce per-tile (sum, sumsq) and fold BN + affine into scale/shift."""
    st = stats.reshape(-1, 8, stats.shape[-1])
    s = jnp.sum(st[:, 0, :], axis=0)
    sq = jnp.sum(st[:, 1, :], axis=0)
    mean = s / count
    # TODO(synk): E[x^2]-mean^2 can cancel for extremely large N*H*W; use a
    # compensated / two-pass reduction if this block is used far beyond
    # ResNet-scale activations.
    var = jnp.maximum(sq / count - mean * mean, 0.0)
    scale = gamma * lax.rsqrt(var + EPS)
    shift = beta - mean * scale
    return jnp.stack([scale, shift], axis=0).astype(jnp.float32)   # (2, C)


# ---------------------------------------------------------------------------
# forward pass
# ---------------------------------------------------------------------------
@jax.jit
def bottleneck_forward(x_nchw, params):
    """x_nchw: (N, C, H, W) float32; identity residual (stride=1, no downsample)."""
    w1, g1, b1, w2, g2, b2, w3, g3, b3 = params
    N, C1, H, W = x_nchw.shape
    P = w1.shape[1]
    C3 = w3.shape[1]
    assert C1 == C3, "identity residual requires inplanes == planes * 4"
    assert W % 8 == 0, "W must be a multiple of 8 (sublane constraint)"

    C1p, Pp, C3p = _round_up(C1, LANE), _round_up(P, LANE), _round_up(C3, LANE)
    R = N * H * W
    RT = _pick_row_tile(R)
    Rpad = _round_up(R, RT)
    G = Rpad // RT
    SH = _pick_strip_rows(H)
    S = H // SH

    vmem = _vmem_limit_bytes()
    cp1 = pltpu.CompilerParams(dimension_semantics=("parallel",),
                               vmem_limit_bytes=vmem)
    cp2 = pltpu.CompilerParams(dimension_semantics=("parallel", "parallel"),
                               vmem_limit_bytes=vmem)

    # layout: NCHW -> flat (rows, channels); channels zero-padded to the lane
    # width, rows zero-padded to a multiple of RT (pad rows are stats-masked).
    # TODO(synk): a production entry point would accept/produce NHWC directly
    # and skip these wrapper transposes (one extra HBM round trip each way).
    xf = _pad_cols(jnp.transpose(x_nchw, (0, 2, 3, 1)).reshape(R, C1), C1p)
    if Rpad != R:
        xf = jnp.pad(xf, ((0, Rpad - R), (0, 0)))

    w1p = _pad_cols(jnp.pad(w1, [(0, C1p - C1), (0, 0)]), Pp).astype(jnp.bfloat16)
    w2p = jnp.zeros((3, 3, Pp, Pp), jnp.float32).at[:, :, :P, :P].set(w2)
    w2p = w2p.reshape(9, Pp, Pp).astype(jnp.bfloat16)
    w3p = _pad_cols(jnp.pad(w3, [(0, Pp - P), (0, 0)]), C3p).astype(jnp.bfloat16)
    g1p, b1p = _pad_cols(g1, Pp), _pad_cols(b1, Pp)
    g2p, b2p = _pad_cols(g2, Pp), _pad_cols(b2, Pp)
    g3p, b3p = _pad_cols(g3, C3p), _pad_cols(b3, C3p)

    # ---- pass 1: conv1 (1x1) + BN1 batch statistics -------------------------
    y1, st1 = pl.pallas_call(
        _conv1x1_stats_kernel,
        grid=(G,),
        in_specs=[pl.BlockSpec((RT, C1p), lambda i: (i, 0)),
                  pl.BlockSpec((C1p, Pp), lambda i: (0, 0))],
        out_specs=[pl.BlockSpec((RT, Pp), lambda i: (i, 0)),
                   pl.BlockSpec((8, Pp), lambda i: (i, 0))],
        out_shape=[jax.ShapeDtypeStruct((Rpad, Pp), jnp.bfloat16),
                   jax.ShapeDtypeStruct((G * 8, Pp), jnp.float32)],
        compiler_params=cp1,
    )(xf, w1p)
    ss1 = _bn_scale_shift(st1, R, g1p, b1p)

    # ---- pass 2: BN1+ReLU, 3x3 conv (pad=1) over row strips, BN2 stats ------
    # y1 stays flat; the strip and its two 1-row halos are addressed as row
    # blocks of the flat array (halo indices clamp at the image border and are
    # zeroed in-kernel).
    y2, st2 = pl.pallas_call(
        _make_bn_relu_conv3x3_stats_kernel(SH, W),
        grid=(N, S),
        in_specs=[
            pl.BlockSpec((SH * W, Pp), lambda n, s: (n * S + s, 0)),
            pl.BlockSpec((W, Pp),
                         lambda n, s: (n * H + jnp.maximum(s * SH - 1, 0), 0)),
            pl.BlockSpec((W, Pp),
                         lambda n, s: (n * H + jnp.minimum((s + 1) * SH, H - 1), 0)),
            pl.BlockSpec((2, Pp), lambda n, s: (0, 0)),
            pl.BlockSpec((9, Pp, Pp), lambda n, s: (0, 0, 0)),
        ],
        out_specs=[pl.BlockSpec((SH * W, Pp), lambda n, s: (n * S + s, 0)),
                   pl.BlockSpec((8, Pp), lambda n, s: (n * S + s, 0))],
        out_shape=[jax.ShapeDtypeStruct((Rpad, Pp), jnp.bfloat16),
                   jax.ShapeDtypeStruct((N * S * 8, Pp), jnp.float32)],
        scratch_shapes=[pltpu.VMEM((SH + 2, W + 2, Pp), jnp.float32)],
        compiler_params=cp2,
    )(y1, y1, y1, ss1, w2p)
    ss2 = _bn_scale_shift(st2, R, g2p, b2p)
    # note: when Rpad > R the tail rows of y2 are unwritten; pass 3 masks them
    # out of its statistics and everything downstream of them is sliced off.

    # ---- pass 3: BN2+ReLU, conv3 (1x1, expansion=4), BN3 stats ---------------
    y3, st3 = pl.pallas_call(
        _make_bn_relu_conv1x1_stats_kernel(R, RT),
        grid=(G,),
        in_specs=[pl.BlockSpec((RT, Pp), lambda i: (i, 0)),
                  pl.BlockSpec((2, Pp), lambda i: (0, 0)),
                  pl.BlockSpec((Pp, C3p), lambda i: (0, 0))],
        out_specs=[pl.BlockSpec((RT, C3p), lambda i: (i, 0)),
                   pl.BlockSpec((8, C3p), lambda i: (i, 0))],
        out_shape=[jax.ShapeDtypeStruct((Rpad, C3p), jnp.bfloat16),
                   jax.ShapeDtypeStruct((G * 8, C3p), jnp.float32)],
        compiler_params=cp1,
    )(y2, ss2, w3p)
    ss3 = _bn_scale_shift(st3, R, g3p, b3p)

    # ---- pass 4: BN3 + identity residual + ReLU ------------------------------
    out = pl.pallas_call(
        _bn_residual_relu_kernel,
        grid=(G,),
        in_specs=[pl.BlockSpec((RT, C3p), lambda i: (i, 0)),
                  pl.BlockSpec((RT, C3p), lambda i: (i, 0)),
                  pl.BlockSpec((2, C3p), lambda i: (0, 0))],
        out_specs=pl.BlockSpec((RT, C3p), lambda i: (i, 0)),
        out_shape=jax.ShapeDtypeStruct((Rpad, C3p), jnp.float32),
        compiler_params=cp1,
    )(y3, xf, ss3)

    out = out[:R].reshape(N, H, W, C3p)[..., :C3]
    return jnp.transpose(out, (0, 3, 1, 2))                  # NHWC -> NCHW


# ---------------------------------------------------------------------------
# pure-JAX reference (f32, training-mode BatchNorm)
# ---------------------------------------------------------------------------
def bottleneck_reference(x_nchw, params):
    w1, g1, b1, w2, g2, b2, w3, g3, b3 = params
    x = jnp.transpose(x_nchw, (0, 2, 3, 1))
    dn = ('NHWC', 'HWIO', 'NHWC')

    def bn(y, g, b, relu=True):
        m = jnp.mean(y, axis=(0, 1, 2), keepdims=True)
        v = jnp.mean((y - m) ** 2, axis=(0, 1, 2), keepdims=True)
        y = (y - m) * lax.rsqrt(v + EPS) * g.reshape(1, 1, 1, -1) \
            + b.reshape(1, 1, 1, -1)
        return jnp.maximum(y, 0.0) if relu else y

    o = lax.conv_general_dilated(x, w1.reshape(1, 1, *w1.shape), (1, 1), 'VALID',
                                 dimension_numbers=dn)
    o = bn(o, g1, b1)
    o = lax.conv_general_dilated(o, w2, (1, 1), 'SAME', dimension_numbers=dn)
    o = bn(o, g2, b2)
    o = lax.conv_general_dilated(o, w3.reshape(1, 1, *w3.shape), (1, 1), 'VALID',
                                 dimension_numbers=dn)
    o = bn(o, g3, b3, relu=False)
    o = jnp.maximum(o + x, 0.0)
    return jnp.transpose(o, (0, 3, 1, 2))


def make_params(key, inplanes, planes):
    expansion = 4
    ks = jax.random.split(key, 9)
    w1 = 0.1 * jax.random.normal(ks[0], (inplanes, planes), jnp.float32)
    w2 = 0.1 * jax.random.normal(ks[1], (3, 3, planes, planes), jnp.float32)
    w3 = 0.1 * jax.random.normal(ks[2], (planes, planes * expansion), jnp.float32)
    g1 = jax.random.uniform(ks[3], (planes,), jnp.float32, 0.5, 1.5)
    b1 = 0.1 * jax.random.normal(ks[4], (planes,), jnp.float32)
    g2 = jax.random.uniform(ks[5], (planes,), jnp.float32, 0.5, 1.5)
    b2 = 0.1 * jax.random.normal(ks[6], (planes,), jnp.float32)
    g3 = jax.random.uniform(ks[7], (planes * expansion,), jnp.float32, 0.5, 1.5)
    b3 = 0.1 * jax.random.normal(ks[8], (planes * expansion,), jnp.float32)
    return (w1, g1, b1, w2, g2, b2, w3, g3, b3)


if __name__ == "__main__":
    # small shapes: planes=4, inplanes=planes*4=16 so the identity residual
    # (downsample=None, stride=1) is well-defined; batch=2, spatial 16x16.
    N, inplanes, planes, H, W = 2, 16, 4, 16, 16

    key = jax.random.PRNGKey(0)
    kx, kp = jax.random.split(key)
    x = jax.random.normal(kx, (N, inplanes, H, W), jnp.float32)   # NCHW input
    params = make_params(kp, inplanes, planes)

    out = jax.block_until_ready(bottleneck_forward(x, params))
    ref = jax.block_until_ready(bottleneck_reference(x, params))

    assert out.shape == (N, planes * 4, H, W)
    err = float(jnp.max(jnp.abs(out - ref)))
    ref_mag = float(jnp.max(jnp.abs(ref)))
    # bf16 MXU operands + bf16 inter-pass activations through three stacked
    # conv + training-mode BatchNorm layers accumulate ~1-2% relative error vs
    # the all-f32 XLA reference (each BN renormalizes the rounding noise), so
    # the bound scales with the output magnitude.
    tol = 4e-2 + 2e-2 * max(ref_mag, 1.0)
    assert err < tol, f"mismatch: max abs err {err} (tol {tol}, ref max {ref_mag})"
    print("KERNEL_OK")
</pallas_src>

<mosaic_0001>
module attributes {stable_mosaic.version = 11 : i64} {
  func.func @_conv1x1_stats_kernel(%arg0: i32, %arg1: memref<256x128xf32, #tpu.memory_space<vmem>>, %arg2: memref<128x128xbf16, #tpu.memory_space<vmem>>, %arg3: memref<256x128xbf16, #tpu.memory_space<vmem>>, %arg4: memref<8x128xf32, #tpu.memory_space<vmem>>) attributes {dimension_semantics = [#tpu.dimension_semantics<parallel>], iteration_bounds = array<i64: 2>, scalar_prefetch = 0 : i64, scratch_operands = 0 : i64, tpu.core_type = #tpu.core_type<tc>, window_params = [{transform_indices = @transform_0, window_bounds = array<i64: 256, 128>}, {pipeline_mode = #tpu.pipeline_mode<synchronous>, transform_indices = @transform_1, window_bounds = array<i64: 128, 128>}, {transform_indices = @transform_2, window_bounds = array<i64: 256, 128>}, {transform_indices = @transform_3, window_bounds = array<i64: 8, 128>}]} {
    %c0 = arith.constant 0 : index
    %c0_0 = arith.constant 0 : index
    %0 = vector.load %arg1[%c0, %c0_0] : memref<256x128xf32, #tpu.memory_space<vmem>>, vector<256x128xf32>
    %1 = arith.truncf %0 : vector<256x128xf32> to vector<256x128xbf16>
    %c0_1 = arith.constant 0 : index
    %c0_2 = arith.constant 0 : index
    %2 = vector.load %arg2[%c0_1, %c0_2] : memref<128x128xbf16, #tpu.memory_space<vmem>>, vector<128x128xbf16>
    %cst = arith.constant dense<0.000000e+00> : vector<256x128xf32>
    %3 = tpu.matmul %1, %2, %cst {dimension_numbers = #tpu.dot_dimension_numbers<[1], [0], [0], [1], [0, 0, 1, 1], [], []>} : vector<256x128xbf16>, vector<128x128xbf16>, vector<256x128xf32> -> vector<256x128xf32>
    %4 = arith.truncf %3 : vector<256x128xf32> to vector<256x128xbf16>
    %c0_3 = arith.constant 0 : index
    %c0_4 = arith.constant 0 : index
    %5 = vector.load %arg3[%c0_3, %c0_4] : memref<256x128xbf16, #tpu.memory_space<vmem>>, vector<256x128xbf16>
    tpu.vector_store %arg3[%c0_3, %c0_4], %4 {strides = array<i32>} : memref<256x128xbf16, #tpu.memory_space<vmem>>, vector<256x128xbf16>,
    %cst_5 = arith.constant dense<0.000000e+00> : vector<128xf32>
    %6 = vector.multi_reduction <add>, %3, %cst_5 [0] : vector<256x128xf32> to vector<128xf32>
    %7 = vector.shape_cast %6 : vector<128xf32> to vector<1x128xf32>
    %c0_6 = arith.constant 0 : index
    %c0_7 = arith.constant 0 : index
    %8 = vector.load %arg4[%c0_6, %c0_7] : memref<8x128xf32, #tpu.memory_space<vmem>>, vector<1x128xf32>
    tpu.vector_store %arg4[%c0_6, %c0_7], %7 {strides = array<i32>} : memref<8x128xf32, #tpu.memory_space<vmem>>, vector<1x128xf32>,
    %9 = arith.mulf %3, %3 : vector<256x128xf32>
    %cst_8 = arith.constant dense<0.000000e+00> : vector<128xf32>
    %10 = vector.multi_reduction <add>, %9, %cst_8 [0] : vector<256x128xf32> to vector<128xf32>
    %11 = vector.shape_cast %10 : vector<128xf32> to vector<1x128xf32>
    %c1 = arith.constant 1 : index
    %c0_9 = arith.constant 0 : index
    %12 = vector.load %arg4[%c1, %c0_9] : memref<8x128xf32, #tpu.memory_space<vmem>>, vector<1x128xf32>
    tpu.vector_store %arg4[%c1, %c0_9], %11 {strides = array<i32>} : memref<8x128xf32, #tpu.memory_space<vmem>>, vector<1x128xf32>,
    return
  }
  func.func @transform_0(%arg0: i32) -> (i32, i32) {
    %c0_i32 = arith.constant 0 : i32
    %c0_i32_0 = arith.constant 0 : i32
    return %arg0, %c0_i32 : i32, i32
  }
  func.func @transform_1(%arg0: i32) -> (i32, i32) {
    %c0_i32 = arith.constant 0 : i32
    %c0_i32_0 = arith.constant 0 : i32
    %c0_i32_1 = arith.constant 0 : i32
    return %c0_i32, %c0_i32_0 : i32, i32
  }
  func.func @transform_2(%arg0: i32) -> (i32, i32) {
    %c0_i32 = arith.constant 0 : i32
    %c0_i32_0 = arith.constant 0 : i32
    return %arg0, %c0_i32 : i32, i32
  }
  func.func @transform_3(%arg0: i32) -> (i32, i32) {
    %c0_i32 = arith.constant 0 : i32
    %c0_i32_0 = arith.constant 0 : i32
    return %arg0, %c0_i32 : i32, i32
  }
}

module attributes {stable_mosaic.version = 11 : i64} {
  func.func @kernel(%arg0: i32, %arg1: i32, %arg2: memref<128x128xbf16, #tpu.memory_space<vmem>>, %arg3: memref<16x128xbf16, #tpu.memory_space<vmem>>, %arg4: memref<16x128xbf16, #tpu.memory_space<vmem>>, %arg5: memref<2x128xf32, #tpu.memory_space<vmem>>, %arg6: memref<9x128x128xbf16, #tpu.memory_space<vmem>>, %arg7: memref<128x128xbf16, #tpu.memory_space<vmem>>, %arg8: memref<8x128xf32, #tpu.memory_space<vmem>>, %arg9: memref<10x18x128xf32, #tpu.memory_space<vmem>>) attributes {dimension_semantics = [#tpu.dimension_semantics<parallel>, #tpu.dimension_semantics<parallel>], iteration_bounds = array<i64: 2, 2>, scalar_prefetch = 0 : i64, scratch_operands = 1 : i64, tpu.core_type = #tpu.core_type<tc>, window_params = [{transform_indices = @transform_0, window_bounds = array<i64: 128, 128>}, {transform_indices = @transform_1, window_bounds = array<i64: 16, 128>}, {transform_indices = @transform_2, window_bounds = array<i64: 16, 128>}, {pipeline_mode = #tpu.pipeline_mode<synchronous>, transform_indices = @transform_3, window_bounds = array<i64: 2, 128>}, {pipeline_mode = #tpu.pipeline_mode<synchronous>, transform_indices = @transform_4, window_bounds = array<i64: 9, 128, 128>}, {transform_indices = @transform_5, window_bounds = array<i64: 128, 128>}, {transform_indices = @transform_6, window_bounds = array<i64: 8, 128>}]} {
    %c0 = arith.constant 0 : index
    %c0_0 = arith.constant 0 : index
    %0 = vector.load %arg5[%c0, %c0_0] : memref<2x128xf32, #tpu.memory_space<vmem>>, vector<1x128xf32>
    %c1 = arith.constant 1 : index
    %c0_1 = arith.constant 0 : index
    %1 = vector.load %arg5[%c1, %c0_1] : memref<2x128xf32, #tpu.memory_space<vmem>>, vector<1x128xf32>
    %c0_2 = arith.constant 0 : index
    %c0_3 = arith.constant 0 : index
    %2 = vector.load %arg2[%c0_2, %c0_3] : memref<128x128xbf16, #tpu.memory_space<vmem>>, vector<128x128xbf16>
    %3 = arith.extf %2 : vector<128x128xbf16> to vector<128x128xf32>
    %4 = vector.broadcast %0 : vector<1x128xf32> to vector<128x128xf32>
    %5 = arith.mulf %3, %4 : vector<128x128xf32>
    %6 = vector.broadcast %1 : vector<1x128xf32> to vector<128x128xf32>
    %7 = arith.addf %5, %6 : vector<128x128xf32>
    %cst = arith.constant 0.000000e+00 : f32
    %8 = vector.broadcast %cst : f32 to vector<128x128xf32>
    %9 = arith.maximumf %7, %8 : vector<128x128xf32>
    %10 = vector.shape_cast %9 : vector<128x128xf32> to vector<8x16x128xf32>
    %c1_4 = arith.constant 1 : index
    %c1_5 = arith.constant 1 : index
    %c0_6 = arith.constant 0 : index
    %11 = vector.load %arg9[%c1_4, %c1_5, %c0_6] : memref<10x18x128xf32, #tpu.memory_space<vmem>>, vector<8x16x128xf32>
    tpu.vector_store %arg9[%c1_4, %c1_5, %c0_6], %10 {strides = array<i32>} : memref<10x18x128xf32, #tpu.memory_space<vmem>>, vector<8x16x128xf32>,
    %c0_7 = arith.constant 0 : index
    %c0_8 = arith.constant 0 : index
    %12 = vector.load %arg3[%c0_7, %c0_8] : memref<16x128xbf16, #tpu.memory_space<vmem>>, vector<16x128xbf16>
    %13 = arith.extf %12 : vector<16x128xbf16> to vector<16x128xf32>
    %14 = vector.broadcast %0 : vector<1x128xf32> to vector<16x128xf32>
    %15 = arith.mulf %13, %14 : vector<16x128xf32>
    %16 = vector.broadcast %1 : vector<1x128xf32> to vector<16x128xf32>
    %17 = arith.addf %15, %16 : vector<16x128xf32>
    %cst_9 = arith.constant 0.000000e+00 : f32
    %18 = vector.broadcast %cst_9 : f32 to vector<16x128xf32>
    %19 = arith.maximumf %17, %18 : vector<16x128xf32>
    %c0_10 = arith.constant 0 : index
    %c0_11 = arith.constant 0 : index
    %20 = vector.load %arg4[%c0_10, %c0_11] : memref<16x128xbf16, #tpu.memory_space<vmem>>, vector<16x128xbf16>
    %21 = arith.extf %20 : vector<16x128xbf16> to vector<16x128xf32>
    %22 = vector.broadcast %0 : vector<1x128xf32> to vector<16x128xf32>
    %23 = arith.mulf %21, %22 : vector<16x128xf32>
    %24 = vector.broadcast %1 : vector<1x128xf32> to vector<16x128xf32>
    %25 = arith.addf %23, %24 : vector<16x128xf32>
    %cst_12 = arith.constant 0.000000e+00 : f32
    %26 = vector.broadcast %cst_12 : f32 to vector<16x128xf32>
    %27 = arith.maximumf %25, %26 : vector<16x128xf32>
    %c0_i32 = arith.constant 0 : i32
    %28 = arith.cmpi sgt, %arg1, %c0_i32 : i32
    %cst_13 = arith.constant 0.000000e+00 : f32
    %29 = vector.broadcast %cst_13 : f32 to vector<16x128xf32>
    %30 = arith.select %28, %19, %29 : vector<16x128xf32>
    %c1_i32 = arith.constant 1 : i32
    %31 = arith.cmpi slt, %arg1, %c1_i32 : i32
    %cst_14 = arith.constant 0.000000e+00 : f32
    %32 = vector.broadcast %cst_14 : f32 to vector<16x128xf32>
    %33 = arith.select %31, %27, %32 : vector<16x128xf32>
    %34 = vector.shape_cast %30 : vector<16x128xf32> to vector<1x16x128xf32>
    %c0_15 = arith.constant 0 : index
    %c1_16 = arith.constant 1 : index
    %c0_17 = arith.constant 0 : index
    %35 = vector.load %arg9[%c0_15, %c1_16, %c0_17] : memref<10x18x128xf32, #tpu.memory_space<vmem>>, vector<1x16x128xf32>
    tpu.vector_store %arg9[%c0_15, %c1_16, %c0_17], %34 {strides = array<i32>} : memref<10x18x128xf32, #tpu.memory_space<vmem>>, vector<1x16x128xf32>,
    %36 = vector.shape_cast %33 : vector<16x128xf32> to vector<1x16x128xf32>
    %c9 = arith.constant 9 : index
    %c1_18 = arith.constant 1 : index
    %c0_19 = arith.constant 0 : index
    %37 = vector.load %arg9[%c9, %c1_18, %c0_19] : memref<10x18x128xf32, #tpu.memory_space<vmem>>, vector<1x16x128xf32>
    tpu.vector_store %arg9[%c9, %c1_18, %c0_19], %36 {strides = array<i32>} : memref<10x18x128xf32, #tpu.memory_space<vmem>>, vector<1x16x128xf32>,
    %cst_20 = arith.constant 0.000000e+00 : f32
    %38 = vector.broadcast %cst_20 : f32 to vector<10x1x128xf32>
    %c0_21 = arith.constant 0 : index
    %c0_22 = arith.constant 0 : index
    %c0_23 = arith.constant 0 : index
    %39 = vector.load %arg9[%c0_21, %c0_22, %c0_23] : memref<10x18x128xf32, #tpu.memory_space<vmem>>, vector<10x1x128xf32>
    tpu.vector_store %arg9[%c0_21, %c0_22, %c0_23], %38 {strides = array<i32>} : memref<10x18x128xf32, #tpu.memory_space<vmem>>, vector<10x1x128xf32>,
    %c0_24 = arith.constant 0 : index
    %c17 = arith.constant 17 : index
    %c0_25 = arith.constant 0 : index
    %40 = vector.load %arg9[%c0_24, %c17, %c0_25] : memref<10x18x128xf32, #tpu.memory_space<vmem>>, vector<10x1x128xf32>
    tpu.vector_store %arg9[%c0_24, %c17, %c0_25], %38 {strides = array<i32>} : memref<10x18x128xf32, #tpu.memory_space<vmem>>, vector<10x1x128xf32>,
    %cst_26 = arith.constant 0.000000e+00 : f32
    %41 = vector.broadcast %cst_26 : f32 to vector<128x128xf32>
    %c0_27 = arith.constant 0 : index
    %c0_28 = arith.constant 0 : index
    %c0_29 = arith.constant 0 : index
    %42 = vector.load %arg9[%c0_27, %c0_28, %c0_29] : memref<10x18x128xf32, #tpu.memory_space<vmem>>, vector<8x16x128xf32>
    %43 = vector.shape_cast %42 : vector<8x16x128xf32> to vector<128x128xf32>
    %44 = arith.truncf %43 : vector<128x128xf32> to vector<128x128xbf16>
    %c0_30 = arith.constant 0 : index
    %c0_31 = arith.constant 0 : index
    %c0_32 = arith.constant 0 : index
    %45 = vector.load %arg6[%c0_30, %c0_31, %c0_32] : memref<9x128x128xbf16, #tpu.memory_space<vmem>>, vector<1x128x128xbf16>
    %46 = vector.shape_cast %45 : vector<1x128x128xbf16> to vector<128x128xbf16>
    %cst_33 = arith.constant dense<0.000000e+00> : vector<128x128xf32>
    %47 = tpu.matmul %44, %46, %cst_33 {dimension_numbers = #tpu.dot_dimension_numbers<[1], [0], [0], [1], [0, 0, 1, 1], [], []>} : vector<128x128xbf16>, vector<128x128xbf16>, vector<128x128xf32> -> vector<128x128xf32>
    %48 = arith.addf %41, %47 : vector<128x128xf32>
    %c0_34 = arith.constant 0 : index
    %c1_35 = arith.constant 1 : index
    %c0_36 = arith.constant 0 : index
    %49 = vector.load %arg9[%c0_34, %c1_35, %c0_36] : memref<10x18x128xf32, #tpu.memory_space<vmem>>, vector<8x16x128xf32>
    %50 = vector.shape_cast %49 : vector<8x16x128xf32> to vector<128x128xf32>
    %51 = arith.truncf %50 : vector<128x128xf32> to vector<128x128xbf16>
    %c1_37 = arith.constant 1 : index
    %c0_38 = arith.constant 0 : index
    %c0_39 = arith.constant 0 : index
    %52 = vector.load %arg6[%c1_37, %c0_38, %c0_39] : memref<9x128x128xbf16, #tpu.memory_space<vmem>>, vector<1x128x128xbf16>
    %53 = vector.shape_cast %52 : vector<1x128x128xbf16> to vector<128x128xbf16>
    %cst_40 = arith.constant dense<0.000000e+00> : vector<128x128xf32>
    %54 = tpu.matmul %51, %53, %cst_40 {dimension_numbers = #tpu.dot_dimension_numbers<[1], [0], [0], [1], [0, 0, 1, 1], [], []>} : vector<128x128xbf16>, vector<128x128xbf16>, vector<128x128xf32> -> vector<128x128xf32>
    %55 = arith.addf %48, %54 : vector<128x128xf32>
    %c0_41 = arith.constant 0 : index
    %c2 = arith.constant 2 : index
    %c0_42 = arith.constant 0 : index
    %56 = vector.load %arg9[%c0_41, %c2, %c0_42] : memref<10x18x128xf32, #tpu.memory_space<vmem>>, vector<8x16x128xf32>
    %57 = vector.shape_cast %56 : vector<8x16x128xf32> to vector<128x128xf32>
    %58 = arith.truncf %57 : vector<128x128xf32> to vector<128x128xbf16>
    %c2_43 = arith.constant 2 : index
    %c0_44 = arith.constant 0 : index
    %c0_45 = arith.constant 0 : index
    %59 = vector.load %arg6[%c2_43, %c0_44, %c0_45] : memref<9x128x128xbf16, #tpu.memory_space<vmem>>, vector<1x128x128xbf16>
    %60 = vector.shape_cast %59 : vector<1x128x128xbf16> to vector<128x128xbf16>
    %cst_46 = arith.constant dense<0.000000e+00> : vector<128x128xf32>
    %61 = tpu.matmul %58, %60, %cst_46 {dimension_numbers = #tpu.dot_dimension_numbers<[1], [0], [0], [1], [0, 0, 1, 1], [], []>} : vector<128x128xbf16>, vector<128x128xbf16>, vector<128x128xf32> -> vector<128x128xf32>
    %62 = arith.addf %55, %61 : vector<128x128xf32>
    %c1_47 = arith.constant 1 : index
    %c0_48 = arith.constant 0 : index
    %c0_49 = arith.constant 0 : index
    %63 = vector.load %arg9[%c1_47, %c0_48, %c0_49] : memref<10x18x128xf32, #tpu.memory_space<vmem>>, vector<8x16x128xf32>
    %64 = vector.shape_cast %63 : vector<8x16x128xf32> to vector<128x128xf32>
    %65 = arith.truncf %64 : vector<128x128xf32> to vector<128x128xbf16>
    %c3 = arith.constant 3 : index
    %c0_50 = arith.constant 0 : index
    %c0_51 = arith.constant 0 : index
    %66 = vector.load %arg6[%c3, %c0_50, %c0_51] : memref<9x128x128xbf16, #tpu.memory_space<vmem>>, vector<1x128x128xbf16>
    %67 = vector.shape_cast %66 : vector<1x128x128xbf16> to vector<128x128xbf16>
    %cst_52 = arith.constant dense<0.000000e+00> : vector<128x128xf32>
    %68 = tpu.matmul %65, %67, %cst_52 {dimension_numbers = #tpu.dot_dimension_numbers<[1], [0], [0], [1], [0, 0, 1, 1], [], []>} : vector<128x128xbf16>, vector<128x128xbf16>, vector<128x128xf32> -> vector<128x128xf32>
    %69 = arith.addf %62, %68 : vector<128x128xf32>
    %c1_53 = arith.constant 1 : index
    %c1_54 = arith.constant 1 : index
    %c0_55 = arith.constant 0 : index
    %70 = vector.load %arg9[%c1_53, %c1_54, %c0_55] : memref<10x18x128xf32, #tpu.memory_space<vmem>>, vector<8x16x128xf32>
    %71 = vector.shape_cast %70 : vector<8x16x128xf32> to vector<128x128xf32>
    %72 = arith.truncf %71 : vector<128x128xf32> to vector<128x128xbf16>
    %c4 = arith.constant 4 : index
    %c0_56 = arith.constant 0 : index
    %c0_57 = arith.constant 0 : index
    %73 = vector.load %arg6[%c4, %c0_56, %c0_57] : memref<9x128x128xbf16, #tpu.memory_space<vmem>>, vector<1x128x128xbf16>
    %74 = vector.shape_cast %73 : vector<1x128x128xbf16> to vector<128x128xbf16>
    %cst_58 = arith.constant dense<0.000000e+00> : vector<128x128xf32>
    %75 = tpu.matmul %72, %74, %cst_58 {dimension_numbers = #tpu.dot_dimension_numbers<[1], [0], [0], [1], [0, 0, 1, 1], [], []>} : vector<128x128xbf16>, vector<128x128xbf16>, vector<128x128xf32> -> vector<128x128xf32>
    %76 = arith.addf %69, %75 : vector<128x128xf32>
    %c1_59 = arith.constant 1 : index
    %c2_60 = arith.constant 2 : index
    %c0_61 = arith.constant 0 : index
    %77 = vector.load %arg9[%c1_59, %c2_60, %c0_61] : memref<10x18x128xf32, #tpu.memory_space<vmem>>, vector<8x16x128xf32>
    %78 = vector.shape_cast %77 : vector<8x16x128xf32> to vector<128x128xf32>
    %79 = arith.truncf %78 : vector<128x128xf32> to vector<128x128xbf16>
    %c5 = arith.constant 5 : index
    %c0_62 = arith.constant 0 : index
    %c0_63 = arith.constant 0 : index
    %80 = vector.load %arg6[%c5, %c0_62, %c0_63] : memref<9x128x128xbf16, #tpu.memory_space<vmem>>, vector<1x128x128xbf16>
    %81 = vector.shape_cast %80 : vector<1x128x128xbf16> to vector<128x128xbf16>
    %cst_64 = arith.constant dense<0.000000e+00> : vector<128x128xf32>
    %82 = tpu.matmul %79, %81, %cst_64 {dimension_numbers = #tpu.dot_dimension_numbers<[1], [0], [0], [1], [0, 0, 1, 1], [], []>} : vector<128x128xbf16>, vector<128x128xbf16>, vector<128x128xf32> -> vector<128x128xf32>
    %83 = arith.addf %76, %82 : vector<128x128xf32>
    %c2_65 = arith.constant 2 : index
    %c0_66 = arith.constant 0 : index
    %c0_67 = arith.constant 0 : index
    %84 = vector.load %arg9[%c2_65, %c0_66, %c0_67] : memref<10x18x128xf32, #tpu.memory_space<vmem>>, vector<8x16x128xf32>
    %85 = vector.shape_cast %84 : vector<8x16x128xf32> to vector<128x128xf32>
    %86 = arith.truncf %85 : vector<128x128xf32> to vector<128x128xbf16>
    %c6 = arith.constant 6 : index
    %c0_68 = arith.constant 0 : index
    %c0_69 = arith.constant 0 : index
    %87 = vector.load %arg6[%c6, %c0_68, %c0_69] : memref<9x128x128xbf16, #tpu.memory_space<vmem>>, vector<1x128x128xbf16>
    %88 = vector.shape_cast %87 : vector<1x128x128xbf16> to vector<128x128xbf16>
    %cst_70 = arith.constant dense<0.000000e+00> : vector<128x128xf32>
    %89 = tpu.matmul %86, %88, %cst_70 {dimension_numbers = #tpu.dot_dimension_numbers<[1], [0], [0], [1], [0, 0, 1, 1], [], []>} : vector<128x128xbf16>, vector<128x128xbf16>, vector<128x128xf32> -> vector<128x128xf32>
    %90 = arith.addf %83, %89 : vector<128x128xf32>
    %c2_71 = arith.constant 2 : index
    %c1_72 = arith.constant 1 : index
    %c0_73 = arith.constant 0 : index
    %91 = vector.load %arg9[%c2_71, %c1_72, %c0_73] : memref<10x18x128xf32, #tpu.memory_space<vmem>>, vector<8x16x128xf32>
    %92 = vector.shape_cast %91 : vector<8x16x128xf32> to vector<128x128xf32>
    %93 = arith.truncf %92 : vector<128x128xf32> to vector<128x128xbf16>
    %c7 = arith.constant 7 : index
    %c0_74 = arith.constant 0 : index
    %c0_75 = arith.constant 0 : index
    %94 = vector.load %arg6[%c7, %c0_74, %c0_75] : memref<9x128x128xbf16, #tpu.memory_space<vmem>>, vector<1x128x128xbf16>
    %95 = vector.shape_cast %94 : vector<1x128x128xbf16> to vector<128x128xbf16>
    %cst_76 = arith.constant dense<0.000000e+00> : vector<128x128xf32>
    %96 = tpu.matmul %93, %95, %cst_76 {dimension_numbers = #tpu.dot_dimension_numbers<[1], [0], [0], [1], [0, 0, 1, 1], [], []>} : vector<128x128xbf16>, vector<128x128xbf16>, vector<128x128xf32> -> vector<128x128xf32>
    %97 = arith.addf %90, %96 : vector<128x128xf32>
    %c2_77 = arith.constant 2 : index
    %c2_78 = arith.constant 2 : index
    %c0_79 = arith.constant 0 : index
    %98 = vector.load %arg9[%c2_77, %c2_78, %c0_79] : memref<10x18x128xf32, #tpu.memory_space<vmem>>, vector<8x16x128xf32>
    %99 = vector.shape_cast %98 : vector<8x16x128xf32> to vector<128x128xf32>
    %100 = arith.truncf %99 : vector<128x128xf32> to vector<128x128xbf16>
    %c8 = arith.constant 8 : index
    %c0_80 = arith.constant 0 : index
    %c0_81 = arith.constant 0 : index
    %101 = vector.load %arg6[%c8, %c0_80, %c0_81] : memref<9x128x128xbf16, #tpu.memory_space<vmem>>, vector<1x128x128xbf16>
    %102 = vector.shape_cast %101 : vector<1x128x128xbf16> to vector<128x128xbf16>
    %cst_82 = arith.constant dense<0.000000e+00> : vector<128x128xf32>
    %103 = tpu.matmul %100, %102, %cst_82 {dimension_numbers = #tpu.dot_dimension_numbers<[1], [0], [0], [1], [0, 0, 1, 1], [], []>} : vector<128x128xbf16>, vector<128x128xbf16>, vector<128x128xf32> -> vector<128x128xf32>
    %104 = arith.addf %97, %103 : vector<128x128xf32>
    %105 = arith.truncf %104 : vector<128x128xf32> to vector<128x128xbf16>
    %c0_83 = arith.constant 0 : index
    %c0_84 = arith.constant 0 : index
    %106 = vector.load %arg7[%c0_83, %c0_84] : memref<128x128xbf16, #tpu.memory_space<vmem>>, vector<128x128xbf16>
    tpu.vector_store %arg7[%c0_83, %c0_84], %105 {strides = array<i32>} : memref<128x128xbf16, #tpu.memory_space<vmem>>, vector<128x128xbf16>,
    %cst_85 = arith.constant dense<0.000000e+00> : vector<128xf32>
    %107 = vector.multi_reduction <add>, %104, %cst_85 [0] : vector<128x128xf32> to vector<128xf32>
    %108 = vector.shape_cast %107 : vector<128xf32> to vector<1x128xf32>
    %c0_86 = arith.constant 0 : index
    %c0_87 = arith.constant 0 : index
    %109 = vector.load %arg8[%c0_86, %c0_87] : memref<8x128xf32, #tpu.memory_space<vmem>>, vector<1x128xf32>
    tpu.vector_store %arg8[%c0_86, %c0_87], %108 {strides = array<i32>} : memref<8x128xf32, #tpu.memory_space<vmem>>, vector<1x128xf32>,
    %110 = arith.mulf %104, %104 : vector<128x128xf32>
    %cst_88 = arith.constant dense<0.000000e+00> : vector<128xf32>
    %111 = vector.multi_reduction <add>, %110, %cst_88 [0] : vector<128x128xf32> to vector<128xf32>
    %112 = vector.shape_cast %111 : vector<128xf32> to vector<1x128xf32>
    %c1_89 = arith.constant 1 : index
    %c0_90 = arith.constant 0 : index
    %113 = vector.load %arg8[%c1_89, %c0_90] : memref<8x128xf32, #tpu.memory_space<vmem>>, vector<1x128xf32>
    tpu.vector_store %arg8[%c1_89, %c0_90], %112 {strides = array<i32>} : memref<8x128xf32, #tpu.memory_space<vmem>>, vector<1x128xf32>,
    return
  }
  func.func @transform_0(%arg0: i32, %arg1: i32) -> (i32, i32) {
    %c2_i32 = arith.constant 2 : i32
    %0 = arith.muli %arg0, %c2_i32 : i32
    %1 = arith.addi %0, %arg1 : i32
    %c0_i32 = arith.constant 0 : i32
    %c0_i32_0 = arith.constant 0 : i32
    return %1, %c0_i32 : i32, i32
  }
  func.func @transform_1(%arg0: i32, %arg1: i32) -> (i32, i32) {
    %c16_i32 = arith.constant 16 : i32
    %0 = arith.muli %arg0, %c16_i32 : i32
    %c8_i32 = arith.constant 8 : i32
    %1 = arith.muli %arg1, %c8_i32 : i32
    %c1_i32 = arith.constant 1 : i32
    %2 = arith.subi %1, %c1_i32 : i32
    %c0_i32 = arith.constant 0 : i32
    %3 = arith.maxsi %2, %c0_i32 : i32
    %4 = arith.addi %0, %3 : i32
    %c0_i32_0 = arith.constant 0 : i32
    %c0_i32_1 = arith.constant 0 : i32
    return %4, %c0_i32_0 : i32, i32
  }
  func.func @transform_2(%arg0: i32, %arg1: i32) -> (i32, i32) {
    %c16_i32 = arith.constant 16 : i32
    %0 = arith.muli %arg0, %c16_i32 : i32
    %c1_i32 = arith.constant 1 : i32
    %1 = arith.addi %arg1, %c1_i32 : i32
    %c8_i32 = arith.constant 8 : i32
    %2 = arith.muli %1, %c8_i32 : i32
    %c15_i32 = arith.constant 15 : i32
    %3 = arith.minsi %2, %c15_i32 : i32
    %4 = arith.addi %0, %3 : i32
    %c0_i32 = arith.constant 0 : i32
    %c0_i32_0 = arith.constant 0 : i32
    return %4, %c0_i32 : i32, i32
  }
  func.func @transform_3(%arg0: i32, %arg1: i32) -> (i32, i32) {
    %c0_i32 = arith.constant 0 : i32
    %c0_i32_0 = arith.constant 0 : i32
    %c0_i32_1 = arith.constant 0 : i32
    return %c0_i32, %c0_i32_0 : i32, i32
  }
  func.func @transform_4(%arg0: i32, %arg1: i32) -> (i32, i32, i32) {
    %c0_i32 = arith.constant 0 : i32
    %c0_i32_0 = arith.constant 0 : i32
    %c0_i32_1 = arith.constant 0 : i32
    %c0_i32_2 = arith.constant 0 : i32
    return %c0_i32, %c0_i32_0, %c0_i32_1 : i32, i32, i32
  }
  func.func @transform_5(%arg0: i32, %arg1: i32) -> (i32, i32) {
    %c2_i32 = arith.constant 2 : i32
    %0 = arith.muli %arg0, %c2_i32 : i32
    %1 = arith.addi %0, %arg1 : i32
    %c0_i32 = arith.constant 0 : i32
    %c0_i32_0 = arith.constant 0 : i32
    return %1, %c0_i32 : i32, i32
  }
  func.func @transform_6(%arg0: i32, %arg1: i32) -> (i32, i32) {
    %c2_i32 = arith.constant 2 : i32
    %0 = arith.muli %arg0, %c2_i32 : i32
    %1 = arith.addi %0, %arg1 : i32
    %c0_i32 = arith.constant 0 : i32
    %c0_i32_0 = arith.constant 0 : i32
    return %1, %c0_i32 : i32, i32
  }
}

module attributes {stable_mosaic.version = 11 : i64} {
  func.func @kernel(%arg0: i32, %arg1: memref<256x128xbf16, #tpu.memory_space<vmem>>, %arg2: memref<2x128xf32, #tpu.memory_space<vmem>>, %arg3: memref<128x128xbf16, #tpu.memory_space<vmem>>, %arg4: memref<256x128xbf16, #tpu.memory_space<vmem>>, %arg5: memref<8x128xf32, #tpu.memory_space<vmem>>) attributes {dimension_semantics = [#tpu.dimension_semantics<parallel>], iteration_bounds = array<i64: 2>, scalar_prefetch = 0 : i64, scratch_operands = 0 : i64, tpu.core_type = #tpu.core_type<tc>, window_params = [{transform_indices = @transform_0, window_bounds = array<i64: 256, 128>}, {pipeline_mode = #tpu.pipeline_mode<synchronous>, transform_indices = @transform_1, window_bounds = array<i64: 2, 128>}, {pipeline_mode = #tpu.pipeline_mode<synchronous>, transform_indices = @transform_2, window_bounds = array<i64: 128, 128>}, {transform_indices = @transform_3, window_bounds = array<i64: 256, 128>}, {transform_indices = @transform_4, window_bounds = array<i64: 8, 128>}]} {
    %c0 = arith.constant 0 : index
    %c0_0 = arith.constant 0 : index
    %0 = vector.load %arg1[%c0, %c0_0] : memref<256x128xbf16, #tpu.memory_space<vmem>>, vector<256x128xbf16>
    %1 = arith.extf %0 : vector<256x128xbf16> to vector<256x128xf32>
    %c0_1 = arith.constant 0 : index
    %c0_2 = arith.constant 0 : index
    %2 = vector.load %arg2[%c0_1, %c0_2] : memref<2x128xf32, #tpu.memory_space<vmem>>, vector<1x128xf32>
    %3 = vector.broadcast %2 : vector<1x128xf32> to vector<256x128xf32>
    %4 = arith.mulf %1, %3 : vector<256x128xf32>
    %c1 = arith.constant 1 : index
    %c0_3 = arith.constant 0 : index
    %5 = vector.load %arg2[%c1, %c0_3] : memref<2x128xf32, #tpu.memory_space<vmem>>, vector<1x128xf32>
    %6 = vector.broadcast %5 : vector<1x128xf32> to vector<256x128xf32>
    %7 = arith.addf %4, %6 : vector<256x128xf32>
    %cst = arith.constant 0.000000e+00 : f32
    %8 = vector.broadcast %cst : f32 to vector<256x128xf32>
    %9 = arith.maximumf %7, %8 : vector<256x128xf32>
    %10 = arith.truncf %9 : vector<256x128xf32> to vector<256x128xbf16>
    %c0_4 = arith.constant 0 : index
    %c0_5 = arith.constant 0 : index
    %11 = vector.load %arg3[%c0_4, %c0_5] : memref<128x128xbf16, #tpu.memory_space<vmem>>, vector<128x128xbf16>
    %cst_6 = arith.constant dense<0.000000e+00> : vector<256x128xf32>
    %12 = tpu.matmul %10, %11, %cst_6 {dimension_numbers = #tpu.dot_dimension_numbers<[1], [0], [0], [1], [0, 0, 1, 1], [], []>} : vector<256x128xbf16>, vector<128x128xbf16>, vector<256x128xf32> -> vector<256x128xf32>
    %13 = arith.truncf %12 : vector<256x128xf32> to vector<256x128xbf16>
    %c0_7 = arith.constant 0 : index
    %c0_8 = arith.constant 0 : index
    %14 = vector.load %arg4[%c0_7, %c0_8] : memref<256x128xbf16, #tpu.memory_space<vmem>>, vector<256x128xbf16>
    tpu.vector_store %arg4[%c0_7, %c0_8], %13 {strides = array<i32>} : memref<256x128xbf16, #tpu.memory_space<vmem>>, vector<256x128xbf16>,
    %cst_9 = arith.constant dense<0.000000e+00> : vector<128xf32>
    %15 = vector.multi_reduction <add>, %12, %cst_9 [0] : vector<256x128xf32> to vector<128xf32>
    %16 = vector.shape_cast %15 : vector<128xf32> to vector<1x128xf32>
    %c0_10 = arith.constant 0 : index
    %c0_11 = arith.constant 0 : index
    %17 = vector.load %arg5[%c0_10, %c0_11] : memref<8x128xf32, #tpu.memory_space<vmem>>, vector<1x128xf32>
    tpu.vector_store %arg5[%c0_10, %c0_11], %16 {strides = array<i32>} : memref<8x128xf32, #tpu.memory_space<vmem>>, vector<1x128xf32>,
    %18 = arith.mulf %12, %12 : vector<256x128xf32>
    %cst_12 = arith.constant dense<0.000000e+00> : vector<128xf32>
    %19 = vector.multi_reduction <add>, %18, %cst_12 [0] : vector<256x128xf32> to vector<128xf32>
    %20 = vector.shape_cast %19 : vector<128xf32> to vector<1x128xf32>
    %c1_13 = arith.constant 1 : index
    %c0_14 = arith.constant 0 : index
    %21 = vector.load %arg5[%c1_13, %c0_14] : memref<8x128xf32, #tpu.memory_space<vmem>>, vector<1x128xf32>
    tpu.vector_store %arg5[%c1_13, %c0_14], %20 {strides = array<i32>} : memref<8x128xf32, #tpu.memory_space<vmem>>, vector<1x128xf32>,
    return
  }
  func.func @transform_0(%arg0: i32) -> (i32, i32) {
    %c0_i32 = arith.constant 0 : i32
    %c0_i32_0 = arith.constant 0 : i32
    return %arg0, %c0_i32 : i32, i32
  }
  func.func @transform_1(%arg0: i32) -> (i32, i32) {
    %c0_i32 = arith.constant 0 : i32
    %c0_i32_0 = arith.constant 0 : i32
    %c0_i32_1 = arith.constant 0 : i32
    return %c0_i32, %c0_i32_0 : i32, i32
  }
  func.func @transform_2(%arg0: i32) -> (i32, i32) {
    %c0_i32 = arith.constant 0 : i32
    %c0_i32_0 = arith.constant 0 : i32
    %c0_i32_1 = arith.constant 0 : i32
    return %c0_i32, %c0_i32_0 : i32, i32
  }
  func.func @transform_3(%arg0: i32) -> (i32, i32) {
    %c0_i32 = arith.constant 0 : i32
    %c0_i32_0 = arith.constant 0 : i32
    return %arg0, %c0_i32 : i32, i32
  }
  func.func @transform_4(%arg0: i32) -> (i32, i32) {
    %c0_i32 = arith.constant 0 : i32
    %c0_i32_0 = arith.constant 0 : i32
    return %arg0, %c0_i32 : i32, i32
  }
}

module attributes {stable_mosaic.version = 11 : i64} {
  func.func @_bn_residual_relu_kernel(%arg0: i32, %arg1: memref<256x128xbf16, #tpu.memory_space<vmem>>, %arg2: memref<256x128xf32, #tpu.memory_space<vmem>>, %arg3: memref<2x128xf32, #tpu.memory_space<vmem>>, %arg4: memref<256x128xf32, #tpu.memory_space<vmem>>) attributes {dimension_semantics = [#tpu.dimension_semantics<parallel>], iteration_bounds = array<i64: 2>, scalar_prefetch = 0 : i64, scratch_operands = 0 : i64, tpu.core_type = #tpu.core_type<tc>, window_params = [{transform_indices = @transform_0, window_bounds = array<i64: 256, 128>}, {transform_indices = @transform_1, window_bounds = array<i64: 256, 128>}, {pipeline_mode = #tpu.pipeline_mode<synchronous>, transform_indices = @transform_2, window_bounds = array<i64: 2, 128>}, {transform_indices = @transform_3, window_bounds = array<i64: 256, 128>}]} {
    %c0 = arith.constant 0 : index
    %c0_0 = arith.constant 0 : index
    %0 = vector.load %arg1[%c0, %c0_0] : memref<256x128xbf16, #tpu.memory_space<vmem>>, vector<256x128xbf16>
    %1 = arith.extf %0 : vector<256x128xbf16> to vector<256x128xf32>
    %c0_1 = arith.constant 0 : index
    %c0_2 = arith.constant 0 : index
    %2 = vector.load %arg3[%c0_1, %c0_2] : memref<2x128xf32, #tpu.memory_space<vmem>>, vector<1x128xf32>
    %3 = vector.broadcast %2 : vector<1x128xf32> to vector<256x128xf32>
    %4 = arith.mulf %1, %3 : vector<256x128xf32>
    %c1 = arith.constant 1 : index
    %c0_3 = arith.constant 0 : index
    %5 = vector.load %arg3[%c1, %c0_3] : memref<2x128xf32, #tpu.memory_space<vmem>>, vector<1x128xf32>
    %6 = vector.broadcast %5 : vector<1x128xf32> to vector<256x128xf32>
    %7 = arith.addf %4, %6 : vector<256x128xf32>
    %c0_4 = arith.constant 0 : index
    %c0_5 = arith.constant 0 : index
    %8 = vector.load %arg2[%c0_4, %c0_5] : memref<256x128xf32, #tpu.memory_space<vmem>>, vector<256x128xf32>
    %9 = arith.addf %7, %8 : vector<256x128xf32>
    %cst = arith.constant 0.000000e+00 : f32
    %10 = vector.broadcast %cst : f32 to vector<256x128xf32>
    %11 = arith.maximumf %9, %10 : vector<256x128xf32>
    %c0_6 = arith.constant 0 : index
    %c0_7 = arith.constant 0 : index
    %12 = vector.load %arg4[%c0_6, %c0_7] : memref<256x128xf32, #tpu.memory_space<vmem>>, vector<256x128xf32>
    tpu.vector_store %arg4[%c0_6, %c0_7], %11 {strides = array<i32>} : memref<256x128xf32, #tpu.memory_space<vmem>>, vector<256x128xf32>,
    return
  }
  func.func @transform_0(%arg0: i32) -> (i32, i32) {
    %c0_i32 = arith.constant 0 : i32
    %c0_i32_0 = arith.constant 0 : i32
    return %arg0, %c0_i32 : i32, i32
  }
  func.func @transform_1(%arg0: i32) -> (i32, i32) {
    %c0_i32 = arith.constant 0 : i32
    %c0_i32_0 = arith.constant 0 : i32
    return %arg0, %c0_i32 : i32, i32
  }
  func.func @transform_2(%arg0: i32) -> (i32, i32) {
    %c0_i32 = arith.constant 0 : i32
    %c0_i32_0 = arith.constant 0 : i32
    %c0_i32_1 = arith.constant 0 : i32
    return %c0_i32, %c0_i32_0 : i32, i32
  }
  func.func @transform_3(%arg0: i32) -> (i32, i32) {
    %c0_i32 = arith.constant 0 : i32
    %c0_i32_0 = arith.constant 0 : i32
    return %arg0, %c0_i32 : i32, i32
  }
}

</mosaic_0001>

<bundles_post_ra>
// kernel: bottleneck_forward.4
= control target key start
LH: loop header
LB: loop body
LE: loop exit
PB: predicated region body
PF: predicated region fallthrough
CT: control target
= control target key end

     0   :  { %s1125_s12 = smov 0   ;;  %s1314_s0 = inlined_call_operand.vmem [shape: f32[512,128], index: 0, kind: input, shape index: {}]   ;;  %s1315_s1 = inlined_call_operand.vmem [shape: bf16[128,128], index: 1, kind: input, shape index: {}]   ;;  %s1316_s2 = inlined_call_operand.vmem [shape: bf16[512,128], index: 2, kind: output, shape index: {0}]   ;;  %s1317_s3 = inlined_call_operand.vmem [shape: f32[16,128], index: 3, kind: output, shape index: {1}]  }
   0x1 LB: > { %s1131_s13 = sadd.s32 4294967295, %s1103_s12   ;;  %p818_p0 = scmp.ge.s32.totalorder %s1103_s12, 1  ;;  %s1103_s12 = sphi %s1125_s12, %s14_s12  }
   0x2   : > { %p141_p1 = scmp.lt.s32.totalorder %s1103_s12, 3 }
   0x4   : > { %p142_p2 = pnand %p818_p0, %p141_p1 }
   0x5   : > { %s819_s16 = sshll.u32 (!%p142_p2), %s1131_s13, 5  ;;  %p181_p4 = scmp.lt.s32.totalorder (!%p142_p2), %s1131_s13, 1 }
   0x6   : > { %145 = sbr.rel (%p142_p2) target bundleno = 320 (0x140), region = 28  ;;  %p170_p3 = scmp.lt.s32.totalorder (!%p142_p2), %s819_s16, 63 }
   0xb   : > { %v1089_v0 = vld [vmem:[%s1315_s1 + $0x38] sm:$0xff]   ;;  %v1090_v1 = vld [vmem:[%s1315_s1 + $0x30] sm:$0xff]   ;;  %s1319_s16 = smov (!%p170_p3, %s819_s16), 63  ;;  %v1091_v2 = vld [vmem:[%s1315_s1 + $0x28] sm:$0xff]   ;;  %s1321_s13 = smov (!%p181_p4, %s1131_s13), 1 }
   0xc   : > { %1017 = vmatprep.subr.bf16.mxu0 %v1089_v0  ;;  %1065 = vmatprep.subr.bf16.mxu1 %v1089_v0  ;;  %s820_s21 = sshll.u32 %s1319_s16, 3  ;;  %v1092_v3 = vld [vmem:[%s1315_s1 + $0x20] sm:$0xff]   ;;  %v1093_v7 = vld [vmem:[%s1315_s1 + $0x18] sm:$0xff]   ;;  %v1094_v11 = vld [vmem:[%s1315_s1 + $0x10] sm:$0xff]   ;;  %s822_s8 = sshll.u32 %s1319_s16, 2 }
   0xd   : > { %1018 = vmatpush3.bf16.msra.mxu0 %v1089_v0  ;;  %1073 = vmatpush3.bf16.msra.mxu1 %v1089_v0  ;;  %s1151_s24 = scalar_lea.vmem %s1314_s0, %s820_s21  ;;  %v1095_v12 = vld [vmem:[%s1315_s1 + $0x8] sm:$0xff]   ;;  %v1096_v13 = vld [vmem:[%s1315_s1] sm:$0xff]   ;;  %s1208_s11 = scalar_lea.vmem %s1316_s2, %s822_s8 }
   0xe   : > { %1019 = vmatprep.subr.bf16.mxu0 %v1090_v1  ;;  %1066 = vmatprep.subr.bf16.mxu1 %v1090_v1  ;;  %v186_v4 = vld [vmem:[%s1151_s24] sm:$0xff]  ;;  %v187_v5 = vld [vmem:[%s1151_s24 + $0x8] sm:$0xff]  ;;  %v188_v14 = vld [vmem:[%s1151_s24 + $0x10] sm:$0xff]  ;;  %s823_s14 = sshll.u32 %s1321_s13, 3 }
   0xf   : > { %v218_v6 = vpack.c.bf16 %v187_v5, %v186_v4  ;;  %v202_v8 = vld [vmem:[%s1151_s24 + $0x80] sm:$0xff]  ;;  %v203_v9 = vld [vmem:[%s1151_s24 + $0x88] sm:$0xff]  ;;  %v189_v15 = vld [vmem:[%s1151_s24 + $0x18] sm:$0xff]  ;;  %s184_s17 = scalar_lea.vmem %s1317_s3, %s823_s14 }
  0x10   : > { %v226_v10 = vpack.c.bf16 %v203_v9, %v202_v8  ;;  %v190_v16 = vld [vmem:[%s1151_s24 + $0x20] sm:$0xff]  ;;  %v191_v17 = vld [vmem:[%s1151_s24 + $0x28] sm:$0xff]  ;;  %v204_v18 = vld [vmem:[%s1151_s24 + $0x90] sm:$0xff]  ;;  %v219_v22 = vpack.c.bf16 %v189_v15, %v188_v14 }
  0x11   : > { %1020 = vmatpush3.bf16.msra.mxu0 %v1090_v1  ;;  %1074 = vmatpush3.bf16.msra.mxu1 %v1090_v1  ;;  %v205_v19 = vld [vmem:[%s1151_s24 + $0x98] sm:$0xff]  ;;  %v206_v20 = vld [vmem:[%s1151_s24 + $0xa0] sm:$0xff]  ;;  %v207_v21 = vld [vmem:[%s1151_s24 + $0xa8] sm:$0xff]  ;;  %v220_v23 = vpack.c.bf16 %v191_v17, %v190_v16 }
  0x12   : > { %1021 = vmatprep.subr.bf16.mxu0 %v1091_v2  ;;  %1067 = vmatprep.subr.bf16.mxu1 %v1091_v2  ;;  %v227_v24 = vpack.c.bf16 %v205_v19, %v204_v18  ;;  %v228_v25 = vpack.c.bf16 %v207_v21, %v206_v20  ;;  %v192_v26 = vld [vmem:[%s1151_s24 + $0x30] sm:$0xff]  ;;  %v193_v27 = vld [vmem:[%s1151_s24 + $0x38] sm:$0xff]  ;;  %v194_v28 = vld [vmem:[%s1151_s24 + $0x40] sm:$0xff] }
  0x13   : > { %1033 = vmatprep.mubr.bf16.mxu0 %v218_v6  ;;  %1049 = vmatprep.mubr.bf16.mxu1 %v226_v10  ;;  %v195_v29 = vld [vmem:[%s1151_s24 + $0x48] sm:$0xff]  ;;  %v208_v30 = vld [vmem:[%s1151_s24 + $0xb0] sm:$0xff]  ;;  %v209_v31 = vld [vmem:[%s1151_s24 + $0xb8] sm:$0xff]  ;;  %v221_v34 = vpack.c.bf16 %v193_v27, %v192_v26 }
  0x14   : > { %v210_v32 = vld [vmem:[%s1151_s24 + $0xc0] sm:$0xff]  ;;  %v211_v33 = vld [vmem:[%s1151_s24 + $0xc8] sm:$0xff]  ;;  %v222_v35 = vpack.c.bf16 %v195_v29, %v194_v28  ;;  %v229_v36 = vpack.c.bf16 %v209_v31, %v208_v30  ;;  %v196_v38 = vld [vmem:[%s1151_s24 + $0x50] sm:$0xff] }
  0x15   : > { %1022 = vmatpush3.bf16.msra.mxu0 %v1091_v2  ;;  %1075 = vmatpush3.bf16.msra.mxu1 %v1091_v2  ;;  %v230_v37 = vpack.c.bf16 %v211_v33, %v210_v32  ;;  %v197_v39 = vld [vmem:[%s1151_s24 + $0x58] sm:$0xff]  ;;  %v198_v40 = vld [vmem:[%s1151_s24 + $0x60] sm:$0xff]  ;;  %v199_v41 = vld [vmem:[%s1151_s24 + $0x68] sm:$0xff] }
  0x16   : > { %1023 = vmatprep.subr.bf16.mxu0 %v1092_v3  ;;  %1068 = vmatprep.subr.bf16.mxu1 %v1092_v3  ;;  %v212_v42 = vld [vmem:[%s1151_s24 + $0xd0] sm:$0xff]  ;;  %v213_v43 = vld [vmem:[%s1151_s24 + $0xd8] sm:$0xff]  ;;  %v214_v44 = vld [vmem:[%s1151_s24 + $0xe0] sm:$0xff]  ;;  %v223_v46 = vpack.c.bf16 %v197_v39, %v196_v38  ;;  %v224_v47 = vpack.c.bf16 %v199_v41, %v198_v40 }
  0x17   : > { %v215_v45 = vld [vmem:[%s1151_s24 + $0xe8] sm:$0xff]  ;;  %v231_v48 = vpack.c.bf16 %v213_v43, %v212_v42  ;;  %v200_v50 = vld [vmem:[%s1151_s24 + $0x70] sm:$0xff]  ;;  %v201_v51 = vld [vmem:[%s1151_s24 + $0x78] sm:$0xff] }
  0x18   : > { %v232_v49 = vpack.c.bf16 %v215_v45, %v214_v44  ;;  %v216_v52 = vld [vmem:[%s1151_s24 + $0xf0] sm:$0xff]  ;;  %v217_v53 = vld [vmem:[%s1151_s24 + $0xf8] sm:$0xff]  ;;  %v225_v54 = vpack.c.bf16 %v201_v51, %v200_v50 }
  0x19   : > { %1024 = vmatpush3.bf16.msra.mxu0 %v1092_v3  ;;  %1076 = vmatpush3.bf16.msra.mxu1 %v1092_v3  ;;  %v233_v55 = vpack.c.bf16 %v217_v53, %v216_v52 }
  0x1a   : > { %1025 = vmatprep.subr.bf16.mxu0 %v1093_v7  ;;  %1069 = vmatprep.subr.bf16.mxu1 %v1093_v7 }
  0x1d   : > { %1026 = vmatpush3.bf16.msra.mxu0 %v1093_v7  ;;  %1077 = vmatpush3.bf16.msra.mxu1 %v1093_v7 }
  0x1e   : > { %1027 = vmatprep.subr.bf16.mxu0 %v1094_v11  ;;  %1070 = vmatprep.subr.bf16.mxu1 %v1094_v11 }
  0x21   : > { %1028 = vmatpush3.bf16.msra.mxu0 %v1094_v11  ;;  %1078 = vmatpush3.bf16.msra.mxu1 %v1094_v11 }
  0x22   : > { %1029 = vmatprep.subr.bf16.mxu0 %v1095_v12  ;;  %1071 = vmatprep.subr.bf16.mxu1 %v1095_v12 }
  0x25   : > { %1030 = vmatpush3.bf16.msra.mxu0 %v1095_v12  ;;  %1079 = vmatpush3.bf16.msra.mxu1 %v1095_v12 }
  0x26   : > { %1031 = vmatprep.subr.bf16.mxu0 %v1096_v13  ;;  %1072 = vmatprep.subr.bf16.mxu1 %v1096_v13 }
  0x29   : > { %1032 = vmatpush3.bf16.msra.mxu0 %v1096_v13  ;;  %1080 = vmatpush3.bf16.msra.mxu1 %v1096_v13 }
  0x2c   : > { %1034 = vmatmul.mubr.bf16.vlgmr.msra.gmra.mxu0 %v219_v22  ;;  %1050 = vmatmul.mubr.bf16.vlgmr.msra.gmra.mxu1 %v227_v24 }
  0x2d   : > { %1037 = vmatprep.mubr.bf16.mxu0 %v220_v23  ;;  %1053 = vmatprep.mubr.bf16.mxu1 %v228_v25 }
  0x34   : > { %1038 = vmatmul.mubr.bf16.gmra.mxu0 %v221_v34  ;;  %1054 = vmatmul.mubr.bf16.gmra.mxu1 %v229_v36 }
  0x35   : > { %1041 = vmatprep.mubr.bf16.mxu0 %v222_v35  ;;  %1057 = vmatprep.mubr.bf16.mxu1 %v230_v37 }
  0x3c   : > { %1042 = vmatmul.mubr.bf16.gmra.mxu0 %v223_v46  ;;  %1058 = vmatmul.mubr.bf16.gmra.mxu1 %v231_v48 }
  0x3d   : > { %1045 = vmatprep.mubr.bf16.mxu0 %v224_v47  ;;  %1061 = vmatprep.mubr.bf16.mxu1 %v232_v49 }
  0x44   : > { %1046 = vmatmul.mubr.bf16.gmra.mxu0 %v225_v54  ;;  %1062 = vmatmul.mubr.bf16.gmra.mxu1 %v233_v55 }
  0xec   : > { %v1035_v56 = vpop.f32.mrf.mxu0  ;;  %v1201_v57 = vpop.f32.mrf.mxu1 }
  0xed   : > { %v659_v8 = vmul.f32 %v1035_v56, %v1035_v56 }
  0xee   : > { %v332_v58 = vpop.f32.mrf.mxu0  ;;  %v1203_v59 = vpop.f32.mrf.mxu1 }
  0xef   : > { %v657_v1 = vmul.f32 %v332_v58, %v332_v58 }
  0xf0   : > { %v1036_v60 = vpop.f32.mrf.mxu0  ;;  %v1210_v62 = vpop.f32.mrf.mxu1 }
  0xf1   : > { %v906_v61 = vpack.c.bf16 %v1036_v60, %v1035_v56  ;;  %v946_v0 = vpack.c.bf16 %v1210_v62, %v1201_v57  ;;  %v660_v13 = vmul.f32 %v1036_v60, %v1036_v60 }
  0xf2   : > { %v335_v63 = vpop.f32.mrf.mxu0  ;;  %v1215_v5 = vpop.f32.mrf.mxu1 }
  0xf3   : > { %978 = vst [vmem:[%s1208_s11 + $0x8] sm:$0xff] %v906_v61   ;;  %v901_v2 = vpack.c.bf16 %v335_v63, %v332_v58  ;;  %v619_v3 = vadd.f32 %v335_v63, %v332_v58  ;;  %v658_v4 = vmul.f32 %v335_v63, %v335_v63  ;;  %986 = vst [vmem:[%s1208_s11 + $0x48] sm:$0xff] %v946_v0  }
  0xf4   : > { %v1039_v6 = vpop.f32.mrf.mxu0  ;;  %v941_v7 = vpack.c.bf16 %v1215_v5, %v1203_v59  ;;  %v1221_v11 = vpop.f32.mrf.mxu1 }
  0xf5   : > { %902 = vst [vmem:[%s1208_s11] sm:$0xff] %v901_v2   ;;  %v620_v9 = vadd.f32 %v1035_v56, %v619_v3  ;;  %v689_v10 = vadd.f32 %v658_v4, %v657_v1  ;;  %v663_v32 = vmul.f32 %v1039_v6, %v1039_v6 }
  0xf6   : > { %v348_v12 = vpop.f32.mrf.mxu0  ;;  %985 = vst [vmem:[%s1208_s11 + $0x40] sm:$0xff] %v941_v7   ;;  %v1224_v16 = vpop.f32.mrf.mxu1 }
  0xf7   : > { %v690_v14 = vadd.f32 %v689_v10, %v659_v8  ;;  %v621_v15 = vadd.f32 %v1036_v60, %v620_v9  ;;  %v661_v19 = vmul.f32 %v348_v12, %v348_v12 }
  0xf8   : > { %v1040_v17 = vpop.f32.mrf.mxu0  ;;  %v1226_v22 = vpop.f32.mrf.mxu1 }
  0xf9   : > { %v622_v18 = vadd.f32 %v621_v15, %v348_v12  ;;  %v691_v20 = vadd.f32 %v690_v14, %v660_v13  ;;  %v916_v21 = vpack.c.bf16 %v1040_v17, %v1039_v6  ;;  %v956_v24 = vpack.c.bf16 %v1226_v22, %v1221_v11 }
  0xfa   : > { %v351_v23 = vpop.f32.mrf.mxu0  ;;  %v1231_v29 = vpop.f32.mrf.mxu1  ;;  %v664_v37 = vmul.f32 %v1040_v17, %v1040_v17 }
  0xfb   : > { %v692_v25 = vadd.f32 %v691_v20, %v661_v19  ;;  %980 = vst [vmem:[%s1208_s11 + $0x18] sm:$0xff] %v916_v21   ;;  %v911_v26 = vpack.c.bf16 %v351_v23, %v348_v12  ;;  %v623_v27 = vadd.f32 %v622_v18, %v351_v23  ;;  %v662_v28 = vmul.f32 %v351_v23, %v351_v23 }
  0xfc   : > { %v1043_v30 = vpop.f32.mrf.mxu0  ;;  %988 = vst [vmem:[%s1208_s11 + $0x58] sm:$0xff] %v956_v24   ;;  %v951_v31 = vpack.c.bf16 %v1231_v29, %v1224_v16  ;;  %v1237_v35 = vpop.f32.mrf.mxu1 }
  0xfd   : > { %979 = vst [vmem:[%s1208_s11 + $0x10] sm:$0xff] %v911_v26   ;;  %v624_v33 = vadd.f32 %v1039_v6, %v623_v27  ;;  %v693_v34 = vadd.f32 %v692_v25, %v662_v28  ;;  %v667_v56 = vmul.f32 %v1043_v30, %v1043_v30  ;;  %v673_v28 = vmul.f32 %v1203_v59, %v1203_v59 }
  0xfe   : > { %v364_v36 = vpop.f32.mrf.mxu0  ;;  %987 = vst [vmem:[%s1208_s11 + $0x50] sm:$0xff] %v951_v31   ;;  %v1240_v40 = vpop.f32.mrf.mxu1 }
  0xff   : > { %v694_v38 = vadd.f32 %v693_v34, %v663_v32  ;;  %v625_v39 = vadd.f32 %v1040_v17, %v624_v33  ;;  %v665_v43 = vmul.f32 %v364_v36, %v364_v36  ;;  %v674_v33 = vmul.f32 %v1215_v5, %v1215_v5 }
 0x100   : > { %v1044_v41 = vpop.f32.mrf.mxu0  ;;  %v1242_v46 = vpop.f32.mrf.mxu1 }
 0x101   : > { %v626_v42 = vadd.f32 %v625_v39, %v364_v36  ;;  %v695_v44 = vadd.f32 %v694_v38, %v664_v37  ;;  %v926_v45 = vpack.c.bf16 %v1044_v41, %v1043_v30  ;;  %v966_v48 = vpack.c.bf16 %v1242_v46, %v1237_v35 }
 0x102   : > { %v367_v47 = vpop.f32.mrf.mxu0  ;;  %v1247_v53 = vpop.f32.mrf.mxu1  ;;  %v668_v0 = vmul.f32 %v1044_v41, %v1044_v41  ;;  %v676_v39 = vmul.f32 %v1210_v62, %v1210_v62 }
 0x103   : > { %v696_v49 = vadd.f32 %v695_v44, %v665_v43  ;;  %982 = vst [vmem:[%s1208_s11 + $0x28] sm:$0xff] %v926_v45   ;;  %v921_v50 = vpack.c.bf16 %v367_v47, %v364_v36  ;;  %v627_v51 = vadd.f32 %v626_v42, %v367_v47  ;;  %v666_v52 = vmul.f32 %v367_v47, %v367_v47 }
 0x104   : > { %v1047_v54 = vpop.f32.mrf.mxu0  ;;  %990 = vst [vmem:[%s1208_s11 + $0x68] sm:$0xff] %v966_v48   ;;  %v961_v55 = vpack.c.bf16 %v1247_v53, %v1240_v40  ;;  %v1253_v61 = vpop.f32.mrf.mxu1  ;;  %v675_v36 = vmul.f32 %v1201_v57, %v1201_v57  ;;  %v677_v43 = vmul.f32 %v1224_v16, %v1224_v16  ;;  %v678_v47 = vmul.f32 %v1231_v29, %v1231_v29 }
 0x105   : > { %981 = vst [vmem:[%s1208_s11 + $0x20] sm:$0xff] %v921_v50   ;;  %v628_v58 = vadd.f32 %v1043_v30, %v627_v51  ;;  %v697_v60 = vadd.f32 %v696_v49, %v666_v52  ;;  %v671_v21 = vmul.f32 %v1047_v54, %v1047_v54  ;;  %v681_v52 = vmul.f32 %v1240_v40, %v1240_v40 }
 0x106   : > { %v380_v63 = vpop.f32.mrf.mxu0  ;;  %989 = vst [vmem:[%s1208_s11 + $0x60] sm:$0xff] %v961_v55   ;;  %v444_v3 = vpop.f32.mrf.mxu1 }
 0x107   : > { %v698_v1 = vadd.f32 %v697_v60, %v667_v56  ;;  %v629_v2 = vadd.f32 %v1044_v41, %v628_v58  ;;  %v669_v7 = vmul.f32 %v380_v63, %v380_v63  ;;  %v682_v56 = vmul.f32 %v1247_v53, %v1247_v53 }
 0x108   : > { %v1048_v4 = vpop.f32.mrf.mxu0  ;;  %v1256_v10 = vpop.f32.mrf.mxu1 }
 0x109   : > { %v630_v6 = vadd.f32 %v629_v2, %v380_v63  ;;  %v699_v8 = vadd.f32 %v698_v1, %v668_v0  ;;  %v936_v9 = vpack.c.bf16 %v1048_v4, %v1047_v54  ;;  %v976_v13 = vpack.c.bf16 %v1256_v10, %v1253_v61 }
 0x10a   : > { %v383_v12 = vpop.f32.mrf.mxu0  ;;  %v447_v19 = vpop.f32.mrf.mxu1  ;;  %v672_v25 = vmul.f32 %v1048_v4, %v1048_v4  ;;  %v685_v1 = vmul.f32 %v444_v3, %v444_v3 }
 0x10b   : > { %v700_v14 = vadd.f32 %v699_v8, %v669_v7  ;;  %984 = vst [vmem:[%s1208_s11 + $0x38] sm:$0xff] %v936_v9   ;;  %v931_v15 = vpack.c.bf16 %v383_v12, %v380_v63  ;;  %v631_v17 = vadd.f32 %v630_v6, %v383_v12  ;;  %v670_v18 = vmul.f32 %v383_v12, %v383_v12 }
 0x10c   : > { %992 = vst [vmem:[%s1208_s11 + $0x78] sm:$0xff] %v976_v13   ;;  %v971_v20 = vpack.c.bf16 %v447_v19, %v444_v3  ;;  %v687_v7 = vmul.f32 %v1253_v61, %v1253_v61  ;;  %v688_v9 = vmul.f32 %v1256_v10, %v1256_v10 }
 0x10d   : > { %983 = vst [vmem:[%s1208_s11 + $0x30] sm:$0xff] %v931_v15   ;;  %v632_v23 = vadd.f32 %v1047_v54, %v631_v17  ;;  %v701_v24 = vadd.f32 %v700_v14, %v670_v18 }
 0x10e   : > { %991 = vst [vmem:[%s1208_s11 + $0x70] sm:$0xff] %v971_v20  }
 0x10f   : > { %v633_v26 = vadd.f32 %v1048_v4, %v632_v23  ;;  %v702_v27 = vadd.f32 %v701_v24, %v671_v21 }
 0x111   : > { %v703_v30 = vadd.f32 %v702_v27, %v672_v25  ;;  %v634_v31 = vadd.f32 %v633_v26, %v1203_v59 }
 0x113   : > { %v635_v32 = vadd.f32 %v634_v31, %v1215_v5  ;;  %v704_v34 = vadd.f32 %v703_v30, %v673_v28 }
 0x115   : > { %v636_v37 = vadd.f32 %v1201_v57, %v635_v32  ;;  %v705_v38 = vadd.f32 %v704_v34, %v674_v33  ;;  %v679_v57 = vmul.f32 %v1221_v11, %v1221_v11 }
 0x117   : > { %v706_v41 = vadd.f32 %v705_v38, %v675_v36  ;;  %v637_v42 = vadd.f32 %v1210_v62, %v636_v37  ;;  %v680_v62 = vmul.f32 %v1226_v22, %v1226_v22 }
 0x119   : > { %v638_v59 = vadd.f32 %v637_v42, %v1224_v16  ;;  %v707_v44 = vadd.f32 %v706_v41, %v676_v39 }
 0x11b   : > { %v708_v5 = vadd.f32 %v707_v44, %v677_v43  ;;  %v639_v45 = vadd.f32 %v638_v59, %v1231_v29 }
 0x11d   : > { %v640_v48 = vadd.f32 %v1221_v11, %v639_v45  ;;  %v709_v49 = vadd.f32 %v708_v5, %v678_v47  ;;  %v683_v11 = vmul.f32 %v1237_v35, %v1237_v35 }
 0x11f   : > { %v710_v50 = vadd.f32 %v709_v49, %v679_v57  ;;  %v641_v51 = vadd.f32 %v1226_v22, %v640_v48  ;;  %v684_v22 = vmul.f32 %v1242_v46, %v1242_v46 }
 0x121   : > { %v642_v16 = vadd.f32 %v641_v51, %v1240_v40  ;;  %v711_v54 = vadd.f32 %v710_v50, %v680_v62 }
 0x123   : > { %v712_v55 = vadd.f32 %v711_v54, %v681_v52  ;;  %v643_v29 = vadd.f32 %v642_v16, %v1247_v53  ;;  %v686_v53 = vmul.f32 %v447_v19, %v447_v19 }
 0x125   : > { %v644_v58 = vadd.f32 %v1237_v35, %v643_v29  ;;  %v713_v60 = vadd.f32 %v712_v55, %v682_v56 }
 0x127   : > { %v714_v63 = vadd.f32 %v713_v60, %v683_v11  ;;  %v645_v40 = vadd.f32 %v1242_v46, %v644_v58 }
 0x129   : > { %v646_v0 = vadd.f32 %v645_v40, %v444_v3  ;;  %v715_v2 = vadd.f32 %v714_v63, %v684_v22 }
 0x12b   : > { %v716_v4 = vadd.f32 %v715_v2, %v685_v1  ;;  %v647_v6 = vadd.f32 %v646_v0, %v447_v19 }
 0x12d   : > { %v648_v8 = vadd.f32 %v1253_v61, %v647_v6  ;;  %v717_v35 = vadd.f32 %v716_v4, %v686_v53 }
 0x12f   : > { %v649_v12 = vadd.f32 %v1256_v10, %v648_v8  ;;  %v718_v46 = vadd.f32 %v717_v35, %v687_v7 }
 0x131   : > { %v650_v13 = vrot.slane %v649_v12, 4  ;;  %v719_v14 = vadd.f32 %v718_v46, %v688_v9 }
 0x133   : > { %v651_v3 = vadd.f32 %v650_v13, %v649_v12  ;;  %v720_v15 = vrot.slane %v719_v14, 4 }
 0x135   : > { %v652_v17 = vrot.slane %v651_v3, 2  ;;  %v721_v18 = vadd.f32 %v720_v15, %v719_v14 }
 0x137   : > { %v653_v19 = vadd.f32 %v652_v17, %v651_v3  ;;  %v722_v20 = vrot.slane %v721_v18, 2 }
 0x139   : > { %v654_v21 = vrot.slane %v653_v19, 1  ;;  %v723_v61 = vadd.f32 %v722_v20, %v721_v18 }
 0x13b   : > { %v655_v23 = vadd.f32 %v654_v21, %v653_v19  ;;  %v724_v24 = vrot.slane %v723_v61, 1 }
 0x13d   : > { %656 = vst [vmem:[%s184_s17] sm:$0x1] %v655_v23  ;;  %v725_v10 = vadd.f32 %v724_v24, %v723_v61 }
 0x13f   : > { %726 = vst [vmem:[%s184_s17 + $0x1] sm:$0x1] %v725_v10 }
 0x140 PF: > { %s14_s12 = sadd.s32 1, %s1103_s12  }
 0x141   : > { %p11_p5 = scmp.ge.s32.totalorder %s14_s12, 4  }
 0x143   :  { %13 = sbr.rel (!%p11_p5) target bundleno = 1 (0x1), region = 70 }

// kernel: bottleneck_forward.7
= control target key start
LH: loop header
LB: loop body
LE: loop exit
PB: predicated region body
PF: predicated region fallthrough
CT: control target
= control target key end

     0   :  { %s660_s12 = smov 0   ;;  %s848_s0 = inlined_call_operand.vmem [shape: bf16[512,128], index: 0, kind: input, shape index: {}]   ;;  %s849_s1 = inlined_call_operand.vmem [shape: f32[512,128], index: 1, kind: input, shape index: {}]   ;;  %s850_s2 = inlined_call_operand.vmem [shape: f32[2,128], index: 2, kind: input, shape index: {}]   ;;  %s851_s3 = inlined_call_operand.vmem [shape: f32[512,128], index: 3, kind: output, shape index: {}]  }
   0x1 LB: > { %s530_s13 = sadd.s32 4294967295, %s638_s12   ;;  %p534_p0 = scmp.ge.s32.totalorder %s638_s12, 1  ;;  %s638_s12 = sphi %s660_s12, %s13_s12  }
   0x2   : > { %p149_p1 = scmp.lt.s32.totalorder %s638_s12, 3 }
   0x4   : > { %p150_p2 = pnand %p534_p0, %p149_p1 }
   0x5   : > { %s535_s14 = sshll.u32 (!%p150_p2), %s530_s13, 5 }
   0x6   : > { %153 = sbr.rel (%p150_p2) target bundleno = 58 (0x3a), region = 32  ;;  %p179_p3 = scmp.lt.s32.totalorder (!%p150_p2), %s535_s14, 63 }
   0xb   : > { %s853_s14 = smov (!%p179_p3, %s535_s14), 63  ;;  %v681_v1 = vld [vmem:[%s850_s2] ss:$0 sm:$0xff]  ;;  %v694_v5 = vld [vmem:[%s850_s2 + $0x1] ss:$0 sm:$0xff] }
   0xc   : > { %s536_s15 = sshll.u32 %s853_s14, 2  ;;  %s538_s16 = sshll.u32 %s853_s14, 3 }
   0xd   : > { %s675_s19 = scalar_lea.vmem %s848_s0, %s536_s15  ;;  %s688_s24 = scalar_lea.vmem %s849_s1, %s538_s16 }
   0xe   : > { %v546_v0 = vld [vmem:[%s675_s19] sm:$0xff]   ;;  %v609_v4 = vld [vmem:[%s675_s19 + $0x8] sm:$0xff]   ;;  %v610_v8 = vld [vmem:[%s675_s19 + $0x10] sm:$0xff]   ;;  %s725_s29 = scalar_lea.vmem %s851_s3, %s538_s16 }
   0xf   : > { %v547_v2 = vunpack.c.l.bf16 %v546_v0  ;;  %v548_v3 = vunpack.c.h.bf16 %v546_v0  ;;  %v551_v6 = vunpack.c.l.bf16 %v609_v4  ;;  %v552_v7 = vunpack.c.h.bf16 %v609_v4  ;;  %v611_v13 = vld [vmem:[%s675_s19 + $0x18] sm:$0xff]   ;;  %v334_v14 = vld [vmem:[%s688_s24] sm:$0xff]  ;;  %v335_v15 = vld [vmem:[%s688_s24 + $0x8] sm:$0xff] }
  0x10   : > { %v555_v11 = vunpack.c.l.bf16 %v610_v8  ;;  %v556_v12 = vunpack.c.h.bf16 %v610_v8  ;;  %v559_v18 = vunpack.c.l.bf16 %v611_v13  ;;  %v560_v19 = vunpack.c.h.bf16 %v611_v13  ;;  %v336_v22 = vld [vmem:[%s688_s24 + $0x10] sm:$0xff]  ;;  %v337_v23 = vld [vmem:[%s688_s24 + $0x18] sm:$0xff]  ;;  %v338_v28 = vld [vmem:[%s688_s24 + $0x20] sm:$0xff] }
  0x11   : > { %v265_v9 = vmul.f32 %v547_v2, %v681_v1  ;;  %v266_v10 = vmul.f32 %v548_v3, %v681_v1  ;;  %v267_v16 = vmul.f32 %v551_v6, %v681_v1  ;;  %v268_v17 = vmul.f32 %v552_v7, %v681_v1  ;;  %v339_v29 = vld [vmem:[%s688_s24 + $0x28] sm:$0xff]  ;;  %v340_v36 = vld [vmem:[%s688_s24 + $0x30] sm:$0xff]  ;;  %v341_v37 = vld [vmem:[%s688_s24 + $0x38] sm:$0xff] }
  0x12   : > { %v269_v24 = vmul.f32 %v555_v11, %v681_v1  ;;  %v270_v25 = vmul.f32 %v556_v12, %v681_v1  ;;  %v271_v30 = vmul.f32 %v559_v18, %v681_v1  ;;  %v272_v31 = vmul.f32 %v560_v19, %v681_v1  ;;  %v612_v42 = vld [vmem:[%s675_s19 + $0x20] sm:$0xff]   ;;  %v613_v47 = vld [vmem:[%s675_s19 + $0x28] sm:$0xff]   ;;  %v614_v52 = vld [vmem:[%s675_s19 + $0x30] sm:$0xff]  }
  0x13   : > { %v302_v20 = vadd.f32 %v694_v5, %v265_v9  ;;  %v303_v21 = vadd.f32 %v694_v5, %v266_v10  ;;  %v304_v26 = vadd.f32 %v694_v5, %v267_v16  ;;  %v305_v27 = vadd.f32 %v694_v5, %v268_v17  ;;  %v615_v57 = vld [vmem:[%s675_s19 + $0x38] sm:$0xff]   ;;  %v342_v3 = vld [vmem:[%s688_s24 + $0x40] sm:$0xff]  ;;  %v343_v4 = vld [vmem:[%s688_s24 + $0x48] sm:$0xff] }
  0x14   : > { %v306_v34 = vadd.f32 %v694_v5, %v269_v24  ;;  %v307_v35 = vadd.f32 %v694_v5, %v270_v25  ;;  %v308_v40 = vadd.f32 %v694_v5, %v271_v30  ;;  %v309_v41 = vadd.f32 %v694_v5, %v272_v31  ;;  %v344_v12 = vld [vmem:[%s688_s24 + $0x50] sm:$0xff]  ;;  %v345_v13 = vld [vmem:[%s688_s24 + $0x58] sm:$0xff]  ;;  %v346_v18 = vld [vmem:[%s688_s24 + $0x60] sm:$0xff] }
  0x15   : > { %v366_v32 = vadd.f32 %v334_v14, %v302_v20  ;;  %v367_v33 = vadd.f32 %v335_v15, %v303_v21  ;;  %v368_v38 = vadd.f32 %v336_v22, %v304_v26  ;;  %v369_v39 = vadd.f32 %v337_v23, %v305_v27  ;;  %v347_v19 = vld [vmem:[%s688_s24 + $0x68] sm:$0xff]  ;;  %v348_v26 = vld [vmem:[%s688_s24 + $0x70] sm:$0xff]  ;;  %v349_v27 = vld [vmem:[%s688_s24 + $0x78] sm:$0xff] }
  0x16   : > { %v370_v45 = vadd.f32 %v338_v28, %v306_v34  ;;  %v371_v46 = vadd.f32 %v339_v29, %v307_v35  ;;  %v372_v50 = vadd.f32 %v340_v36, %v308_v40  ;;  %v373_v51 = vadd.f32 %v341_v37, %v309_v41  ;;  %v617_v37 = vld [vmem:[%s675_s19 + $0x48] sm:$0xff]  }
  0x17   : > { %v398_v43 = vmax.f32 %v366_v32, 0.0  ;;  %v399_v44 = vmax.f32 %v367_v33, 0.0  ;;  %v400_v48 = vmax.f32 %v368_v38, 0.0  ;;  %v401_v49 = vmax.f32 %v369_v39, 0.0  ;;  %v616_v32 = vld [vmem:[%s675_s19 + $0x40] sm:$0xff]  }
  0x18   : > { %v402_v53 = vmax.f32 %v370_v45, 0.0  ;;  %v403_v54 = vmax.f32 %v371_v46, 0.0  ;;  %v563_v55 = vunpack.c.l.bf16 %v612_v42  ;;  %v564_v56 = vunpack.c.h.bf16 %v612_v42  ;;  %v618_v42 = vld [vmem:[%s675_s19 + $0x50] sm:$0xff]  }
  0x19   : > { %430 = vst [vmem:[%s725_s29] sm:$0xff] %v398_v43  ;;  %431 = vst [vmem:[%s725_s29 + $0x8] sm:$0xff] %v399_v44  ;;  %v404_v58 = vmax.f32 %v372_v50, 0.0  ;;  %v405_v59 = vmax.f32 %v373_v51, 0.0  ;;  %v567_v60 = vunpack.c.l.bf16 %v613_v47  ;;  %v568_v61 = vunpack.c.h.bf16 %v613_v47  ;;  %v619_v47 = vld [vmem:[%s675_s19 + $0x58] sm:$0xff]  }
  0x1a   : > { %432 = vst [vmem:[%s725_s29 + $0x10] sm:$0xff] %v400_v48  ;;  %433 = vst [vmem:[%s725_s29 + $0x18] sm:$0xff] %v401_v49  ;;  %v273_v62 = vmul.f32 %v563_v55, %v681_v1  ;;  %v274_v63 = vmul.f32 %v564_v56, %v681_v1  ;;  %v571_v0 = vunpack.c.l.bf16 %v614_v52  ;;  %v572_v2 = vunpack.c.h.bf16 %v614_v52  ;;  %v350_v56 = vld [vmem:[%s688_s24 + $0x80] sm:$0xff] }
  0x1b   : > { %434 = vst [vmem:[%s725_s29 + $0x20] sm:$0xff] %v402_v53  ;;  %435 = vst [vmem:[%s725_s29 + $0x28] sm:$0xff] %v403_v54  ;;  %v275_v6 = vmul.f32 %v567_v60, %v681_v1  ;;  %v276_v7 = vmul.f32 %v568_v61, %v681_v1  ;;  %v575_v8 = vunpack.c.l.bf16 %v615_v57  ;;  %v576_v9 = vunpack.c.h.bf16 %v615_v57  ;;  %v351_v57 = vld [vmem:[%s688_s24 + $0x88] sm:$0xff] }
  0x1c   : > { %436 = vst [vmem:[%s725_s29 + $0x30] sm:$0xff] %v404_v58  ;;  %437 = vst [vmem:[%s725_s29 + $0x38] sm:$0xff] %v405_v59  ;;  %v310_v10 = vadd.f32 %v694_v5, %v273_v62  ;;  %v311_v11 = vadd.f32 %v694_v5, %v274_v63  ;;  %v277_v14 = vmul.f32 %v571_v0, %v681_v1  ;;  %v579_v45 = vunpack.c.l.bf16 %v616_v32  ;;  %v352_v0 = vld [vmem:[%s688_s24 + $0x90] sm:$0xff] }
  0x1d   : > { %v278_v15 = vmul.f32 %v572_v2, %v681_v1  ;;  %v312_v16 = vadd.f32 %v694_v5, %v275_v6  ;;  %v313_v17 = vadd.f32 %v694_v5, %v276_v7  ;;  %v279_v20 = vmul.f32 %v575_v8, %v681_v1  ;;  %v353_v2 = vld [vmem:[%s688_s24 + $0x98] sm:$0xff]  ;;  %v354_v8 = vld [vmem:[%s688_s24 + $0xa0] sm:$0xff] }
  0x1e   : > { %v280_v21 = vmul.f32 %v576_v9, %v681_v1  ;;  %v374_v22 = vadd.f32 %v342_v3, %v310_v10  ;;  %v375_v23 = vadd.f32 %v343_v4, %v311_v11  ;;  %v314_v24 = vadd.f32 %v694_v5, %v277_v14  ;;  %v355_v9 = vld [vmem:[%s688_s24 + $0xa8] sm:$0xff] }
  0x1f   : > { %v315_v25 = vadd.f32 %v694_v5, %v278_v15  ;;  %v376_v28 = vadd.f32 %v344_v12, %v312_v16  ;;  %v377_v29 = vadd.f32 %v345_v13, %v313_v17  ;;  %v316_v30 = vadd.f32 %v694_v5, %v279_v20  ;;  %v356_v16 = vld [vmem:[%s688_s24 + $0xb0] sm:$0xff]  ;;  %v357_v17 = vld [vmem:[%s688_s24 + $0xb8] sm:$0xff] }
  0x20   : > { %v317_v31 = vadd.f32 %v694_v5, %v280_v21  ;;  %v406_v33 = vmax.f32 %v374_v22, 0.0  ;;  %v407_v34 = vmax.f32 %v375_v23, 0.0  ;;  %v378_v35 = vadd.f32 %v346_v18, %v314_v24  ;;  %v620_v22 = vld [vmem:[%s675_s19 + $0x60] sm:$0xff]  }
  0x21   : > { %v379_v36 = vadd.f32 %v347_v19, %v315_v25  ;;  %v408_v38 = vmax.f32 %v376_v28, 0.0  ;;  %v409_v39 = vmax.f32 %v377_v29, 0.0  ;;  %v380_v40 = vadd.f32 %v348_v26, %v316_v30 }
  0x22   : > { %v381_v41 = vadd.f32 %v349_v27, %v317_v31  ;;  %438 = vst [vmem:[%s725_s29 + $0x40] sm:$0xff] %v406_v33  ;;  %439 = vst [vmem:[%s725_s29 + $0x48] sm:$0xff] %v407_v34  ;;  %v410_v43 = vmax.f32 %v378_v35, 0.0  ;;  %v580_v46 = vunpack.c.h.bf16 %v616_v32  ;;  %v583_v50 = vunpack.c.l.bf16 %v617_v37  ;;  %v621_v27 = vld [vmem:[%s675_s19 + $0x68] sm:$0xff]   ;;  %v622_v32 = vld [vmem:[%s675_s19 + $0x70] sm:$0xff]  }
  0x23   : > { %v411_v44 = vmax.f32 %v379_v36, 0.0  ;;  %440 = vst [vmem:[%s725_s29 + $0x50] sm:$0xff] %v408_v38  ;;  %441 = vst [vmem:[%s725_s29 + $0x58] sm:$0xff] %v409_v39  ;;  %v412_v48 = vmax.f32 %v380_v40, 0.0  ;;  %v584_v51 = vunpack.c.h.bf16 %v617_v37  ;;  %v281_v52 = vmul.f32 %v579_v45, %v681_v1  ;;  %v623_v37 = vld [vmem:[%s675_s19 + $0x78] sm:$0xff]  }
  0x24   : > { %v413_v49 = vmax.f32 %v381_v41, 0.0  ;;  %442 = vst [vmem:[%s725_s29 + $0x60] sm:$0xff] %v410_v43  ;;  %v282_v53 = vmul.f32 %v580_v46, %v681_v1  ;;  %v587_v54 = vunpack.c.l.bf16 %v618_v42  ;;  %v588_v55 = vunpack.c.h.bf16 %v618_v42  ;;  %v358_v46 = vld [vmem:[%s688_s24 + $0xc0] sm:$0xff] }
  0x25   : > { %443 = vst [vmem:[%s725_s29 + $0x68] sm:$0xff] %v411_v44  ;;  %444 = vst [vmem:[%s725_s29 + $0x70] sm:$0xff] %v412_v48  ;;  %v283_v58 = vmul.f32 %v583_v50, %v681_v1  ;;  %v284_v59 = vmul.f32 %v584_v51, %v681_v1  ;;  %v591_v60 = vunpack.c.l.bf16 %v619_v47  ;;  %v592_v61 = vunpack.c.h.bf16 %v619_v47  ;;  %v359_v47 = vld [vmem:[%s688_s24 + $0xc8] sm:$0xff] }
  0x26   : > { %445 = vst [vmem:[%s725_s29 + $0x78] sm:$0xff] %v413_v49  ;;  %v318_v62 = vadd.f32 %v694_v5, %v281_v52  ;;  %v319_v63 = vadd.f32 %v694_v5, %v282_v53  ;;  %v285_v3 = vmul.f32 %v587_v54, %v681_v1  ;;  %v286_v4 = vmul.f32 %v588_v55, %v681_v1  ;;  %v360_v54 = vld [vmem:[%s688_s24 + $0xd0] sm:$0xff]  ;;  %v361_v55 = vld [vmem:[%s688_s24 + $0xd8] sm:$0xff] }
  0x27   : > { %v320_v6 = vadd.f32 %v694_v5, %v283_v58  ;;  %v321_v7 = vadd.f32 %v694_v5, %v284_v59  ;;  %v287_v10 = vmul.f32 %v591_v60, %v681_v1  ;;  %v288_v11 = vmul.f32 %v592_v61, %v681_v1  ;;  %v362_v60 = vld [vmem:[%s688_s24 + $0xe0] sm:$0xff]  ;;  %v363_v61 = vld [vmem:[%s688_s24 + $0xe8] sm:$0xff] }
  0x28   : > { %v382_v12 = vadd.f32 %v350_v56, %v318_v62  ;;  %v383_v13 = vadd.f32 %v351_v57, %v319_v63  ;;  %v322_v14 = vadd.f32 %v694_v5, %v285_v3  ;;  %v323_v15 = vadd.f32 %v694_v5, %v286_v4 }
  0x29   : > { %v384_v18 = vadd.f32 %v352_v0, %v320_v6  ;;  %v385_v19 = vadd.f32 %v353_v2, %v321_v7  ;;  %v324_v20 = vadd.f32 %v694_v5, %v287_v10  ;;  %v325_v21 = vadd.f32 %v694_v5, %v288_v11  ;;  %v364_v6 = vld [vmem:[%s688_s24 + $0xf0] sm:$0xff]  ;;  %v365_v7 = vld [vmem:[%s688_s24 + $0xf8] sm:$0xff] }
  0x2a   : > { %v414_v23 = vmax.f32 %v382_v12, 0.0  ;;  %v415_v24 = vmax.f32 %v383_v13, 0.0  ;;  %v386_v25 = vadd.f32 %v354_v8, %v322_v14  ;;  %v387_v26 = vadd.f32 %v355_v9, %v323_v15 }
  0x2b   : > { %v416_v28 = vmax.f32 %v384_v18, 0.0  ;;  %v417_v29 = vmax.f32 %v385_v19, 0.0  ;;  %v388_v30 = vadd.f32 %v356_v16, %v324_v20  ;;  %v389_v31 = vadd.f32 %v357_v17, %v325_v21 }
  0x2c   : > { %446 = vst [vmem:[%s725_s29 + $0x80] sm:$0xff] %v414_v23  ;;  %447 = vst [vmem:[%s725_s29 + $0x88] sm:$0xff] %v415_v24  ;;  %v418_v33 = vmax.f32 %v386_v25, 0.0  ;;  %v419_v34 = vmax.f32 %v387_v26, 0.0  ;;  %v595_v35 = vunpack.c.l.bf16 %v620_v22  ;;  %v596_v36 = vunpack.c.h.bf16 %v620_v22 }
  0x2d   : > { %448 = vst [vmem:[%s725_s29 + $0x90] sm:$0xff] %v416_v28  ;;  %449 = vst [vmem:[%s725_s29 + $0x98] sm:$0xff] %v417_v29  ;;  %v420_v38 = vmax.f32 %v388_v30, 0.0  ;;  %v421_v39 = vmax.f32 %v389_v31, 0.0  ;;  %v599_v40 = vunpack.c.l.bf16 %v621_v27  ;;  %v600_v41 = vunpack.c.h.bf16 %v621_v27 }
  0x2e   : > { %450 = vst [vmem:[%s725_s29 + $0xa0] sm:$0xff] %v418_v33  ;;  %451 = vst [vmem:[%s725_s29 + $0xa8] sm:$0xff] %v419_v34  ;;  %v289_v42 = vmul.f32 %v595_v35, %v681_v1  ;;  %v290_v43 = vmul.f32 %v596_v36, %v681_v1  ;;  %v603_v44 = vunpack.c.l.bf16 %v622_v32  ;;  %v604_v45 = vunpack.c.h.bf16 %v622_v32 }
  0x2f   : > { %452 = vst [vmem:[%s725_s29 + $0xb0] sm:$0xff] %v420_v38  ;;  %453 = vst [vmem:[%s725_s29 + $0xb8] sm:$0xff] %v421_v39  ;;  %v291_v48 = vmul.f32 %v599_v40, %v681_v1  ;;  %v292_v49 = vmul.f32 %v600_v41, %v681_v1  ;;  %v607_v50 = vunpack.c.l.bf16 %v623_v37  ;;  %v608_v51 = vunpack.c.h.bf16 %v623_v37 }
  0x30   : > { %v326_v52 = vadd.f32 %v694_v5, %v289_v42  ;;  %v327_v53 = vadd.f32 %v694_v5, %v290_v43  ;;  %v293_v56 = vmul.f32 %v603_v44, %v681_v1  ;;  %v294_v57 = vmul.f32 %v604_v45, %v681_v1 }
  0x31   : > { %v328_v58 = vadd.f32 %v694_v5, %v291_v48  ;;  %v329_v59 = vadd.f32 %v694_v5, %v292_v49  ;;  %v295_v62 = vmul.f32 %v607_v50, %v681_v1  ;;  %v296_v63 = vmul.f32 %v608_v51, %v681_v1 }
  0x32   : > { %v390_v0 = vadd.f32 %v358_v46, %v326_v52  ;;  %v391_v2 = vadd.f32 %v359_v47, %v327_v53  ;;  %v330_v3 = vadd.f32 %v694_v5, %v293_v56  ;;  %v331_v4 = vadd.f32 %v694_v5, %v294_v57 }
  0x33   : > { %v392_v8 = vadd.f32 %v360_v54, %v328_v58  ;;  %v393_v9 = vadd.f32 %v361_v55, %v329_v59  ;;  %v332_v10 = vadd.f32 %v694_v5, %v295_v62  ;;  %v333_v11 = vadd.f32 %v694_v5, %v296_v63 }
  0x34   : > { %v422_v12 = vmax.f32 %v390_v0, 0.0  ;;  %v423_v1 = vmax.f32 %v391_v2, 0.0  ;;  %v394_v13 = vadd.f32 %v362_v60, %v330_v3  ;;  %v395_v14 = vadd.f32 %v363_v61, %v331_v4 }
  0x35   : > { %v424_v15 = vmax.f32 %v392_v8, 0.0  ;;  %v425_v16 = vmax.f32 %v393_v9, 0.0  ;;  %v396_v17 = vadd.f32 %v364_v6, %v332_v10  ;;  %v397_v18 = vadd.f32 %v365_v7, %v333_v11 }
  0x36   : > { %454 = vst [vmem:[%s725_s29 + $0xc0] sm:$0xff] %v422_v12  ;;  %455 = vst [vmem:[%s725_s29 + $0xc8] sm:$0xff] %v423_v1  ;;  %v426_v19 = vmax.f32 %v394_v13, 0.0  ;;  %v427_v20 = vmax.f32 %v395_v14, 0.0 }
  0x37   : > { %456 = vst [vmem:[%s725_s29 + $0xd0] sm:$0xff] %v424_v15  ;;  %457 = vst [vmem:[%s725_s29 + $0xd8] sm:$0xff] %v425_v16  ;;  %v428_v21 = vmax.f32 %v396_v17, 0.0  ;;  %v429_v5 = vmax.f32 %v397_v18, 0.0 }
  0x38   : > { %458 = vst [vmem:[%s725_s29 + $0xe0] sm:$0xff] %v426_v19  ;;  %459 = vst [vmem:[%s725_s29 + $0xe8] sm:$0xff] %v427_v20 }
  0x39   : > { %460 = vst [vmem:[%s725_s29 + $0xf0] sm:$0xff] %v428_v21  ;;  %461 = vst [vmem:[%s725_s29 + $0xf8] sm:$0xff] %v429_v5 }
  0x3a PF: > { %s13_s12 = sadd.s32 1, %s638_s12  }
  0x3b   : > { %p10_p4 = scmp.ge.s32.totalorder %s13_s12, 4  }
  0x3d   :  { %12 = sbr.rel (!%p10_p4) target bundleno = 1 (0x1), region = 65 }

// kernel: bottleneck_forward.6
= control target key start
LH: loop header
LB: loop body
LE: loop exit
PB: predicated region body
PF: predicated region fallthrough
CT: control target
= control target key end

     0   :  { %s1376_s15 = smov 0   ;;  %s1650_s0 = inlined_call_operand.vmem [shape: bf16[512,128], index: 0, kind: input, shape index: {}]   ;;  %s1651_s1 = inlined_call_operand.vmem [shape: f32[2,128], index: 1, kind: input, shape index: {}]   ;;  %s1652_s2 = inlined_call_operand.vmem [shape: bf16[128,128], index: 2, kind: input, shape index: {}]   ;;  %s1653_s3 = inlined_call_operand.vmem [shape: bf16[512,128], index: 3, kind: output, shape index: {0}]   ;;  %s1654_s4 = inlined_call_operand.vmem [shape: f32[16,128], index: 4, kind: output, shape index: {1}]  }
   0x1 LB: > { %s1382_s16 = sadd.s32 4294967295, %s1349_s15   ;;  %p983_p0 = scmp.ge.s32.totalorder %s1349_s15, 1  ;;  %s1349_s15 = sphi %s1376_s15, %s15_s15  }
   0x2   : > { %p166_p1 = scmp.lt.s32.totalorder %s1349_s15, 3 }
   0x4   : > { %p167_p2 = pnand %p983_p0, %p166_p1 }
   0x5   : > { %s984_s19 = sshll.u32 (!%p167_p2), %s1382_s16, 5  ;;  %p208_p4 = scmp.lt.s32.totalorder (!%p167_p2), %s1382_s16, 1 }
   0x6   : > { %170 = sbr.rel (%p167_p2) target bundleno = 320 (0x140), region = 32  ;;  %p197_p3 = scmp.lt.s32.totalorder (!%p167_p2), %s984_s19, 63 }
   0xb   : > { %v1335_v0 = vld [vmem:[%s1652_s2 + $0x38] sm:$0xff]   ;;  %v1336_v1 = vld [vmem:[%s1652_s2 + $0x30] sm:$0xff]   ;;  %s1656_s19 = smov (!%p197_p3, %s984_s19), 63  ;;  %v1337_v2 = vld [vmem:[%s1652_s2 + $0x28] sm:$0xff]   ;;  %s1658_s16 = smov (!%p208_p4, %s1382_s16), 1 }
   0xc   : > { %1263 = vmatprep.subr.bf16.mxu0 %v1335_v0  ;;  %1311 = vmatprep.subr.bf16.mxu1 %v1335_v0  ;;  %s985_s24 = sshll.u32 %s1656_s19, 2  ;;  %v1338_v3 = vld [vmem:[%s1652_s2 + $0x20] sm:$0xff]   ;;  %v1339_v21 = vld [vmem:[%s1652_s2 + $0x18] sm:$0xff]   ;;  %v1340_v35 = vld [vmem:[%s1652_s2 + $0x10] sm:$0xff]   ;;  %s988_s19 = sshll.u32 %s1658_s16, 3 }
   0xd   : > { %1264 = vmatpush3.bf16.msra.mxu0 %v1335_v0  ;;  %1319 = vmatpush3.bf16.msra.mxu1 %v1335_v0  ;;  %s1404_s27 = scalar_lea.vmem %s1650_s0, %s985_s24  ;;  %v1413_v5 = vld [vmem:[%s1651_s1] ss:$0 sm:$0xff]  ;;  %v1421_v11 = vld [vmem:[%s1651_s1 + $0x1] ss:$0 sm:$0xff]  ;;  %v1341_v50 = vld [vmem:[%s1652_s2 + $0x8] sm:$0xff]   ;;  %s1554_s21 = scalar_lea.vmem %s1653_s3, %s985_s24 }
   0xe   : > { %1265 = vmatprep.subr.bf16.mxu0 %v1336_v1  ;;  %1312 = vmatprep.subr.bf16.mxu1 %v1336_v1  ;;  %v1066_v4 = vld [vmem:[%s1404_s27] sm:$0xff]   ;;  %v1209_v8 = vld [vmem:[%s1404_s27 + $0x8] sm:$0xff]   ;;  %v1210_v9 = vld [vmem:[%s1404_s27 + $0x10] sm:$0xff]   ;;  %s211_s24 = scalar_lea.vmem %s1654_s4, %s988_s19 }
   0xf   : > { %v1067_v6 = vunpack.c.l.bf16 %v1066_v4  ;;  %v1068_v7 = vunpack.c.h.bf16 %v1066_v4  ;;  %v1211_v10 = vld [vmem:[%s1404_s27 + $0x18] sm:$0xff]   ;;  %v1071_v12 = vunpack.c.l.bf16 %v1209_v8  ;;  %v1072_v13 = vunpack.c.h.bf16 %v1209_v8  ;;  %v1212_v20 = vld [vmem:[%s1404_s27 + $0x20] sm:$0xff]   ;;  %v1213_v34 = vld [vmem:[%s1404_s27 + $0x28] sm:$0xff]  }
  0x10   : > { %v1075_v14 = vunpack.c.l.bf16 %v1210_v9  ;;  %v1076_v15 = vunpack.c.h.bf16 %v1210_v9  ;;  %v1079_v18 = vunpack.c.l.bf16 %v1211_v10  ;;  %v1080_v19 = vunpack.c.h.bf16 %v1211_v10  ;;  %v1214_v39 = vld [vmem:[%s1404_s27 + $0x30] sm:$0xff]   ;;  %v1458_v59 = vld [vmem:[%s1404_s27 + $0x38] sm:$0xff]   ;;  %v1216_v60 = vld [vmem:[%s1404_s27 + $0x40] sm:$0xff]  }
  0x11   : > { %1266 = vmatpush3.bf16.msra.mxu0 %v1336_v1  ;;  %1320 = vmatpush3.bf16.msra.mxu1 %v1336_v1  ;;  %v282_v16 = vmul.f32 %v1067_v6, %v1413_v5  ;;  %v283_v17 = vmul.f32 %v1068_v7, %v1413_v5  ;;  %v284_v22 = vmul.f32 %v1071_v12, %v1413_v5  ;;  %v1083_v30 = vunpack.c.l.bf16 %v1212_v20  ;;  %v1342_v0 = vld [vmem:[%s1652_s2] sm:$0xff]   ;;  %v1217_v6 = vld [vmem:[%s1404_s27 + $0x48] sm:$0xff]  }
  0x12   : > { %1267 = vmatprep.subr.bf16.mxu0 %v1337_v2  ;;  %1313 = vmatprep.subr.bf16.mxu1 %v1337_v2  ;;  %v285_v23 = vmul.f32 %v1072_v13, %v1413_v5  ;;  %v286_v24 = vmul.f32 %v1075_v14, %v1413_v5  ;;  %v287_v27 = vmul.f32 %v1076_v15, %v1413_v5  ;;  %v1084_v43 = vunpack.c.h.bf16 %v1212_v20 }
  0x13   : > { %v319_v25 = vadd.f32 %v1421_v11, %v282_v16  ;;  %v320_v26 = vadd.f32 %v1421_v11, %v283_v17  ;;  %v288_v28 = vmul.f32 %v1079_v18, %v1413_v5  ;;  %v289_v29 = vmul.f32 %v1080_v19, %v1413_v5  ;;  %v1218_v16 = vld [vmem:[%s1404_s27 + $0x50] sm:$0xff]  }
  0x14   : > { %v321_v33 = vadd.f32 %v1421_v11, %v284_v22  ;;  %v322_v36 = vadd.f32 %v1421_v11, %v285_v23  ;;  %v323_v37 = vadd.f32 %v1421_v11, %v286_v24  ;;  %v324_v38 = vadd.f32 %v1421_v11, %v287_v27 }
  0x15   : > { %1268 = vmatpush3.bf16.msra.mxu0 %v1337_v2  ;;  %1321 = vmatpush3.bf16.msra.mxu1 %v1337_v2  ;;  %v351_v31 = vmax.f32 %v319_v25, 0.0  ;;  %v352_v32 = vmax.f32 %v320_v26, 0.0  ;;  %v325_v41 = vadd.f32 %v1421_v11, %v288_v28  ;;  %v326_v42 = vadd.f32 %v1421_v11, %v289_v29 }
  0x16   : > { %1269 = vmatprep.subr.bf16.mxu0 %v1338_v3  ;;  %1314 = vmatprep.subr.bf16.mxu1 %v1338_v3  ;;  %v290_v44 = vmul.f32 %v1083_v30, %v1413_v5  ;;  %v1087_v45 = vunpack.c.l.bf16 %v1213_v34  ;;  %v353_v46 = vmax.f32 %v321_v33, 0.0  ;;  %v291_v47 = vmul.f32 %v1084_v43, %v1413_v5  ;;  %v1220_v30 = vld [vmem:[%s1404_s27 + $0x60] sm:$0xff]  }
  0x17   : > { %v383_v40 = vpack.c.bf16 %v352_v32, %v351_v31  ;;  %v1088_v48 = vunpack.c.h.bf16 %v1213_v34  ;;  %v1091_v49 = vunpack.c.l.bf16 %v1214_v39  ;;  %v354_v51 = vmax.f32 %v322_v36, 0.0 }
  0x18   : > { %v355_v52 = vmax.f32 %v323_v37, 0.0  ;;  %v356_v53 = vmax.f32 %v324_v38, 0.0  ;;  %v292_v54 = vmul.f32 %v1087_v45, %v1413_v5  ;;  %v357_v55 = vmax.f32 %v325_v41, 0.0 }
  0x19   : > { %1270 = vmatpush3.bf16.msra.mxu0 %v1338_v3  ;;  %1322 = vmatpush3.bf16.msra.mxu1 %v1338_v3  ;;  %v358_v56 = vmax.f32 %v326_v42, 0.0  ;;  %v1455_v57 = vadd.f32 %v1421_v11, %v290_v44  ;;  %v1092_v58 = vunpack.c.h.bf16 %v1214_v39  ;;  %v1462_v61 = vadd.f32 %v1421_v11, %v291_v47  ;;  %v1221_v47 = vld [vmem:[%s1404_s27 + $0x68] sm:$0xff]  }
  0x1a   : > { %1271 = vmatprep.subr.bf16.mxu0 %v1339_v21  ;;  %1315 = vmatprep.subr.bf16.mxu1 %v1339_v21  ;;  %v293_v62 = vmul.f32 %v1088_v48, %v1413_v5  ;;  %v294_v63 = vmul.f32 %v1091_v49, %v1413_v5  ;;  %v384_v1 = vpack.c.bf16 %v354_v51, %v353_v46  ;;  %v1095_v3 = vunpack.c.l.bf16 %v1458_v59 }
  0x1b   : > { %1279 = vmatprep.mubr.bf16.mxu0 %v383_v40  ;;  %v1470_v2 = vadd.f32 %v1421_v11, %v292_v54  ;;  %v1099_v4 = vunpack.c.l.bf16 %v1216_v60  ;;  %v385_v7 = vpack.c.bf16 %v356_v53, %v355_v52  ;;  %v1474_v8 = vpack.c.bf16 %v358_v56, %v357_v55  ;;  %v1222_v52 = vld [vmem:[%s1404_s27 + $0x70] sm:$0xff]  }
  0x1c   : > { %v359_v9 = vmax.f32 %v1455_v57, 0.0  ;;  %v295_v10 = vmul.f32 %v1092_v58, %v1413_v5  ;;  %v360_v12 = vmax.f32 %v1462_v61, 0.0  ;;  %v1096_v13 = vunpack.c.h.bf16 %v1458_v59 }
  0x1d   : > { %1272 = vmatpush3.bf16.msra.mxu0 %v1339_v21  ;;  %1323 = vmatpush3.bf16.msra.mxu1 %v1339_v21  ;;  %v1100_v14 = vunpack.c.h.bf16 %v1216_v60  ;;  %v298_v15 = vmul.f32 %v1099_v4, %v1413_v5  ;;  %v1483_v17 = vadd.f32 %v1421_v11, %v293_v62  ;;  %v1486_v18 = vadd.f32 %v1421_v11, %v294_v63  ;;  %v1219_v21 = vld [vmem:[%s1404_s27 + $0x58] sm:$0xff]  }
  0x1e   : > { %1273 = vmatprep.subr.bf16.mxu0 %v1340_v35  ;;  %1316 = vmatprep.subr.bf16.mxu1 %v1340_v35  ;;  %v1103_v19 = vunpack.c.l.bf16 %v1217_v6  ;;  %v1104_v20 = vunpack.c.h.bf16 %v1217_v6  ;;  %v361_v22 = vmax.f32 %v1470_v2, 0.0  ;;  %v1491_v23 = vmul.f32 %v1095_v3, %v1413_v5  ;;  %v1223_v6 = vld [vmem:[%s1404_s27 + $0x78] sm:$0xff]  }
  0x1f   : > { %v299_v24 = vmul.f32 %v1100_v14, %v1413_v5  ;;  %v335_v25 = vadd.f32 %v1421_v11, %v298_v15  ;;  %v1107_v28 = vunpack.c.l.bf16 %v1218_v16  ;;  %v1108_v29 = vunpack.c.h.bf16 %v1218_v16 }
  0x20   : > { %v300_v26 = vmul.f32 %v1103_v19, %v1413_v5  ;;  %v301_v27 = vmul.f32 %v1104_v20, %v1413_v5  ;;  %v1499_v31 = vadd.f32 %v1421_v11, %v295_v10  ;;  %v1111_v34 = vunpack.c.l.bf16 %v1219_v21 }
  0x21   : > { %1274 = vmatpush3.bf16.msra.mxu0 %v1340_v35  ;;  %1324 = vmatpush3.bf16.msra.mxu1 %v1340_v35  ;;  %v336_v32 = vadd.f32 %v1421_v11, %v299_v24  ;;  %v367_v33 = vmax.f32 %v335_v25, 0.0  ;;  %v302_v37 = vmul.f32 %v1107_v28, %v1413_v5  ;;  %v303_v38 = vmul.f32 %v1108_v29, %v1413_v5 }
  0x22   : > { %1275 = vmatprep.subr.bf16.mxu0 %v1341_v50  ;;  %1317 = vmatprep.subr.bf16.mxu1 %v1341_v50  ;;  %v337_v35 = vadd.f32 %v1421_v11, %v300_v26  ;;  %v338_v36 = vadd.f32 %v1421_v11, %v301_v27  ;;  %v1112_v40 = vunpack.c.h.bf16 %v1219_v21  ;;  %v304_v41 = vmul.f32 %v1111_v34, %v1413_v5 }
  0x23   : > { %v368_v39 = vmax.f32 %v336_v32, 0.0  ;;  %v1115_v42 = vunpack.c.l.bf16 %v1220_v30  ;;  %v339_v45 = vadd.f32 %v1421_v11, %v302_v37  ;;  %v340_v46 = vadd.f32 %v1421_v11, %v303_v38 }
  0x24   : > { %v369_v43 = vmax.f32 %v337_v35, 0.0  ;;  %v370_v44 = vmax.f32 %v338_v36, 0.0  ;;  %v305_v49 = vmul.f32 %v1112_v40, %v1413_v5  ;;  %v1116_v51 = vunpack.c.h.bf16 %v1220_v30 }
  0x25   : > { %1276 = vmatpush3.bf16.msra.mxu0 %v1341_v50  ;;  %1325 = vmatpush3.bf16.msra.mxu1 %v1341_v50  ;;  %v391_v48 = vpack.c.bf16 %v368_v39, %v367_v33  ;;  %v341_v50 = vadd.f32 %v1421_v11, %v304_v41  ;;  %v371_v54 = vmax.f32 %v339_v45, 0.0  ;;  %v372_v55 = vmax.f32 %v340_v46, 0.0 }
  0x26   : > { %1277 = vmatprep.subr.bf16.mxu0 %v1342_v0  ;;  %1318 = vmatprep.subr.bf16.mxu1 %v1342_v0  ;;  %v392_v53 = vpack.c.bf16 %v370_v44, %v369_v43  ;;  %v306_v56 = vmul.f32 %v1115_v42, %v1413_v5  ;;  %v342_v58 = vadd.f32 %v1421_v11, %v305_v49  ;;  %v1119_v63 = vunpack.c.l.bf16 %v1221_v47 }
  0x27   : > { %1295 = vmatprep.mubr.bf16.mxu1 %v391_v48  ;;  %v373_v60 = vmax.f32 %v341_v50, 0.0  ;;  %v307_v62 = vmul.f32 %v1116_v51, %v1413_v5  ;;  %v1120_v3 = vunpack.c.h.bf16 %v1221_v47  ;;  %v1123_v4 = vunpack.c.l.bf16 %v1222_v52 }
  0x28   : > { %v308_v14 = vmul.f32 %v1119_v63, %v1413_v5  ;;  %v1124_v15 = vunpack.c.h.bf16 %v1222_v52  ;;  %v387_v16 = vpack.c.bf16 %v360_v12, %v359_v9  ;;  %v297_v24 = vmul.f32 %v1096_v13, %v1413_v5 }
  0x29   : > { %1278 = vmatpush3.bf16.msra.mxu0 %v1342_v0  ;;  %1326 = vmatpush3.bf16.msra.mxu1 %v1342_v0  ;;  %v393_v0 = vpack.c.bf16 %v372_v55, %v371_v54  ;;  %v344_v10 = vadd.f32 %v1421_v11, %v307_v62  ;;  %v309_v20 = vmul.f32 %v1120_v3, %v1413_v5  ;;  %v1127_v27 = vunpack.c.l.bf16 %v1223_v6 }
  0x2a   : > { %v310_v21 = vmul.f32 %v1123_v4, %v1413_v5  ;;  %v311_v26 = vmul.f32 %v1124_v15, %v1413_v5  ;;  %v345_v57 = vadd.f32 %v1421_v11, %v308_v14  ;;  %v1128_v9 = vunpack.c.h.bf16 %v1223_v6 }
  0x2b   : > { %v376_v25 = vmax.f32 %v344_v10, 0.0  ;;  %v346_v61 = vadd.f32 %v1421_v11, %v309_v20  ;;  %v362_v12 = vmax.f32 %v1483_v17, 0.0  ;;  %v363_v13 = vmax.f32 %v1486_v18, 0.0 }
  0x2c   : > { %1280 = vmatmul.mubr.bf16.vlgmr.msra.gmra.mxu0 %v384_v1  ;;  %1296 = vmatmul.mubr.bf16.vlgmr.msra.gmra.mxu1 %v392_v53  ;;  %v343_v1 = vadd.f32 %v1421_v11, %v306_v56  ;;  %v347_v30 = vadd.f32 %v1421_v11, %v310_v21  ;;  %v348_v59 = vadd.f32 %v1421_v11, %v311_v26  ;;  %v364_v32 = vmax.f32 %v1499_v31, 0.0 }
  0x2d   : > { %1283 = vmatprep.mubr.bf16.mxu0 %v385_v7  ;;  %v374_v7 = vmax.f32 %v342_v58, 0.0  ;;  %1299 = vmatprep.mubr.bf16.mxu1 %v393_v0  ;;  %v333_v33 = vadd.f32 %v1421_v11, %v1491_v23  ;;  %v377_v34 = vmax.f32 %v345_v57, 0.0  ;;  %v378_v35 = vmax.f32 %v346_v61, 0.0 }
  0x2e   : > { %v375_v19 = vmax.f32 %v343_v1, 0.0  ;;  %v313_v17 = vmul.f32 %v1128_v9, %v1413_v5  ;;  %v388_v36 = vpack.c.bf16 %v362_v12, %v361_v22  ;;  %v334_v37 = vadd.f32 %v1421_v11, %v297_v24 }
  0x2f   : > { %v394_v28 = vpack.c.bf16 %v374_v7, %v373_v60  ;;  %v379_v38 = vmax.f32 %v347_v30, 0.0  ;;  %v380_v18 = vmax.f32 %v348_v59, 0.0  ;;  %v389_v39 = vpack.c.bf16 %v364_v32, %v363_v13 }
  0x30   : > { %v395_v29 = vpack.c.bf16 %v376_v25, %v375_v19  ;;  %v396_v31 = vpack.c.bf16 %v378_v35, %v377_v34  ;;  %v350_v23 = vadd.f32 %v1421_v11, %v313_v17  ;;  %v365_v41 = vmax.f32 %v333_v33, 0.0 }
  0x31   : > { %v366_v42 = vmax.f32 %v334_v37, 0.0  ;;  %v397_v43 = vpack.c.bf16 %v380_v18, %v379_v38 }
  0x32   : > { %v382_v2 = vmax.f32 %v350_v23, 0.0 }
  0x33   : > { %v390_v22 = vpack.c.bf16 %v366_v42, %v365_v41 }
  0x34   : > { %1284 = vmatmul.mubr.bf16.gmra.mxu0 %v1474_v8  ;;  %1300 = vmatmul.mubr.bf16.gmra.mxu1 %v394_v28  ;;  %v312_v8 = vmul.f32 %v1127_v27, %v1413_v5 }
  0x35   : > { %1287 = vmatprep.mubr.bf16.mxu0 %v387_v16  ;;  %1303 = vmatprep.mubr.bf16.mxu1 %v395_v29 }
  0x36   : > { %v349_v40 = vadd.f32 %v1421_v11, %v312_v8 }
  0x38   : > { %v381_v5 = vmax.f32 %v349_v40, 0.0 }
  0x3a   : > { %v398_v44 = vpack.c.bf16 %v382_v2, %v381_v5 }
  0x3c   : > { %1288 = vmatmul.mubr.bf16.gmra.mxu0 %v388_v36  ;;  %1304 = vmatmul.mubr.bf16.gmra.mxu1 %v396_v31 }
  0x3d   : > { %1291 = vmatprep.mubr.bf16.mxu0 %v389_v39  ;;  %1307 = vmatprep.mubr.bf16.mxu1 %v397_v43 }
  0x44   : > { %1292 = vmatmul.mubr.bf16.gmra.mxu0 %v390_v22  ;;  %1308 = vmatmul.mubr.bf16.gmra.mxu1 %v398_v44 }
  0xec   : > { %v1281_v45 = vpop.f32.mrf.mxu0  ;;  %v1547_v47 = vpop.f32.mrf.mxu1 }
  0xed   : > { %v824_v60 = vmul.f32 %v1281_v45, %v1281_v45 }
  0xee   : > { %v497_v46 = vpop.f32.mrf.mxu0  ;;  %v1556_v49 = vpop.f32.mrf.mxu1 }
  0xef   : > { %v822_v51 = vmul.f32 %v497_v46, %v497_v46 }
  0xf0   : > { %v1282_v11 = vpop.f32.mrf.mxu0  ;;  %v1559_v55 = vpop.f32.mrf.mxu1 }
  0xf1   : > { %v1137_v48 = vpack.c.bf16 %v1282_v11, %v1281_v45  ;;  %v1177_v58 = vpack.c.bf16 %v1559_v55, %v1547_v47  ;;  %v825_v4 = vmul.f32 %v1282_v11, %v1282_v11 }
  0xf2   : > { %v500_v50 = vpop.f32.mrf.mxu0  ;;  %v1564_v0 = vpop.f32.mrf.mxu1 }
  0xf3   : > { %1224 = vst [vmem:[%s1554_s21 + $0x8] sm:$0xff] %v1137_v48   ;;  %v1132_v52 = vpack.c.bf16 %v500_v50, %v497_v46  ;;  %v784_v53 = vadd.f32 %v500_v50, %v497_v46  ;;  %v823_v54 = vmul.f32 %v500_v50, %v500_v50  ;;  %1232 = vst [vmem:[%s1554_s21 + $0x48] sm:$0xff] %v1177_v58  }
  0xf4   : > { %v1285_v56 = vpop.f32.mrf.mxu0  ;;  %v1172_v3 = vpack.c.bf16 %v1564_v0, %v1556_v49  ;;  %v1569_v10 = vpop.f32.mrf.mxu1 }
  0xf5   : > { %1133 = vst [vmem:[%s1554_s21] sm:$0xff] %v1132_v52   ;;  %v785_v62 = vadd.f32 %v1281_v45, %v784_v53  ;;  %v854_v63 = vadd.f32 %v823_v54, %v822_v51  ;;  %v828_v12 = vmul.f32 %v1285_v56, %v1285_v56 }
  0xf6   : > { %v513_v1 = vpop.f32.mrf.mxu0  ;;  %1231 = vst [vmem:[%s1554_s21 + $0x40] sm:$0xff] %v1172_v3   ;;  %v1572_v21 = vpop.f32.mrf.mxu1 }
  0xf7   : > { %v855_v6 = vadd.f32 %v854_v63, %v824_v60  ;;  %v786_v7 = vadd.f32 %v1282_v11, %v785_v62  ;;  %v826_v16 = vmul.f32 %v513_v1, %v513_v1 }
  0xf8   : > { %v1286_v14 = vpop.f32.mrf.mxu0  ;;  %v1575_v57 = vpop.f32.mrf.mxu1 }
  0xf9   : > { %v787_v15 = vadd.f32 %v786_v7, %v513_v1  ;;  %v856_v19 = vadd.f32 %v855_v6, %v825_v4  ;;  %v1147_v20 = vpack.c.bf16 %v1286_v14, %v1285_v56  ;;  %v1187_v9 = vpack.c.bf16 %v1575_v57, %v1569_v10 }
  0xfa   : > { %v516_v24 = vpop.f32.mrf.mxu0  ;;  %v1580_v59 = vpop.f32.mrf.mxu1  ;;  %v829_v33 = vmul.f32 %v1286_v14, %v1286_v14 }
  0xfb   : > { %v857_v25 = vadd.f32 %v856_v19, %v826_v16  ;;  %1226 = vst [vmem:[%s1554_s21 + $0x18] sm:$0xff] %v1147_v20   ;;  %v1142_v26 = vpack.c.bf16 %v516_v24, %v513_v1  ;;  %v788_v27 = vadd.f32 %v787_v15, %v516_v24  ;;  %v827_v28 = vmul.f32 %v516_v24, %v516_v24 }
  0xfc   : > { %v1289_v61 = vpop.f32.mrf.mxu0  ;;  %1234 = vst [vmem:[%s1554_s21 + $0x58] sm:$0xff] %v1187_v9   ;;  %v1182_v32 = vpack.c.bf16 %v1580_v59, %v1572_v21  ;;  %v1585_v8 = vpop.f32.mrf.mxu1 }
  0xfd   : > { %1225 = vst [vmem:[%s1554_s21 + $0x10] sm:$0xff] %v1142_v26   ;;  %v789_v29 = vadd.f32 %v1285_v56, %v788_v27  ;;  %v858_v30 = vadd.f32 %v857_v25, %v827_v28  ;;  %v832_v22 = vmul.f32 %v1289_v61, %v1289_v61 }
  0xfe   : > { %v529_v13 = vpop.f32.mrf.mxu0  ;;  %1233 = vst [vmem:[%s1554_s21 + $0x50] sm:$0xff] %v1182_v32   ;;  %v1588_v39 = vpop.f32.mrf.mxu1  ;;  %v840_v32 = vmul.f32 %v1547_v47, %v1547_v47 }
  0xff   : > { %v859_v34 = vadd.f32 %v858_v30, %v828_v12  ;;  %v790_v35 = vadd.f32 %v1286_v14, %v789_v29  ;;  %v830_v37 = vmul.f32 %v529_v13, %v529_v13  ;;  %v839_v30 = vmul.f32 %v1564_v0, %v1564_v0 }
 0x100   : > { %v1290_v17 = vpop.f32.mrf.mxu0  ;;  %v1591_v43 = vpop.f32.mrf.mxu1 }
 0x101   : > { %v791_v36 = vadd.f32 %v790_v35, %v529_v13  ;;  %v860_v38 = vadd.f32 %v859_v34, %v829_v33  ;;  %v1157_v18 = vpack.c.bf16 %v1290_v17, %v1289_v61  ;;  %v1197_v2 = vpack.c.bf16 %v1591_v43, %v1585_v8 }
 0x102   : > { %v532_v31 = vpop.f32.mrf.mxu0  ;;  %v596_v46 = vpop.f32.mrf.mxu1  ;;  %v833_v50 = vmul.f32 %v1290_v17, %v1290_v17  ;;  %v841_v35 = vmul.f32 %v1559_v55, %v1559_v55 }
 0x103   : > { %v861_v40 = vadd.f32 %v860_v38, %v830_v37  ;;  %1228 = vst [vmem:[%s1554_s21 + $0x28] sm:$0xff] %v1157_v18   ;;  %v1152_v23 = vpack.c.bf16 %v532_v31, %v529_v13  ;;  %v792_v41 = vadd.f32 %v791_v36, %v532_v31  ;;  %v831_v42 = vmul.f32 %v532_v31, %v532_v31 }
 0x104   : > { %v1293_v5 = vpop.f32.mrf.mxu0  ;;  %1236 = vst [vmem:[%s1554_s21 + $0x68] sm:$0xff] %v1197_v2   ;;  %v1192_v48 = vpack.c.bf16 %v596_v46, %v1588_v39  ;;  %v1598_v53 = vpop.f32.mrf.mxu1  ;;  %v842_v37 = vmul.f32 %v1572_v21, %v1572_v21  ;;  %v843_v31 = vmul.f32 %v1580_v59, %v1580_v59 }
 0x105   : > { %1227 = vst [vmem:[%s1554_s21 + $0x20] sm:$0xff] %v1152_v23   ;;  %v793_v44 = vadd.f32 %v1289_v61, %v792_v41  ;;  %v862_v45 = vadd.f32 %v861_v40, %v831_v42  ;;  %v836_v16 = vmul.f32 %v1293_v5, %v1293_v5  ;;  %v838_v61 = vmul.f32 %v1556_v49, %v1556_v49 }
 0x106   : > { %v545_v11 = vpop.f32.mrf.mxu0  ;;  %1235 = vst [vmem:[%s1554_s21 + $0x60] sm:$0xff] %v1192_v48   ;;  %v609_v63 = vpop.f32.mrf.mxu1  ;;  %v849_v48 = vmul.f32 %v1591_v43, %v1591_v43 }
 0x107   : > { %v863_v51 = vadd.f32 %v862_v45, %v832_v22  ;;  %v794_v52 = vadd.f32 %v1290_v17, %v793_v44  ;;  %v834_v58 = vmul.f32 %v545_v11, %v545_v11  ;;  %v847_v44 = vmul.f32 %v596_v46, %v596_v46 }
 0x108   : > { %v1294_v54 = vpop.f32.mrf.mxu0  ;;  %v1310_v14 = vpop.f32.mrf.mxu1  ;;  %v848_v45 = vmul.f32 %v1585_v8, %v1585_v8 }
 0x109   : > { %v795_v56 = vadd.f32 %v794_v52, %v545_v11  ;;  %v864_v60 = vadd.f32 %v863_v51, %v833_v50  ;;  %v1167_v62 = vpack.c.bf16 %v1294_v54, %v1293_v5  ;;  %v1207_v15 = vpack.c.bf16 %v1310_v14, %v1598_v53 }
 0x10a   : > { %v548_v1 = vpop.f32.mrf.mxu0  ;;  %v612_v24 = vpop.f32.mrf.mxu1  ;;  %v837_v26 = vmul.f32 %v1294_v54, %v1294_v54 }
 0x10b   : > { %v865_v3 = vadd.f32 %v864_v60, %v834_v58  ;;  %1230 = vst [vmem:[%s1554_s21 + $0x38] sm:$0xff] %v1167_v62   ;;  %v1162_v4 = vpack.c.bf16 %v548_v1, %v545_v11  ;;  %v796_v6 = vadd.f32 %v795_v56, %v548_v1  ;;  %v835_v7 = vmul.f32 %v548_v1, %v548_v1 }
 0x10c   : > { %1238 = vst [vmem:[%s1554_s21 + $0x78] sm:$0xff] %v1207_v15   ;;  %v1202_v25 = vpack.c.bf16 %v612_v24, %v609_v63  ;;  %v852_v58 = vmul.f32 %v1598_v53, %v1598_v53  ;;  %v853_v62 = vmul.f32 %v1310_v14, %v1310_v14 }
 0x10d   : > { %1229 = vst [vmem:[%s1554_s21 + $0x30] sm:$0xff] %v1162_v4   ;;  %v797_v19 = vadd.f32 %v1293_v5, %v796_v6  ;;  %v866_v20 = vadd.f32 %v865_v3, %v835_v7  ;;  %v846_v5 = vmul.f32 %v1588_v39, %v1588_v39 }
 0x10e   : > { %1237 = vst [vmem:[%s1554_s21 + $0x70] sm:$0xff] %v1202_v25  }
 0x10f   : > { %v798_v27 = vadd.f32 %v1294_v54, %v797_v19  ;;  %v867_v28 = vadd.f32 %v866_v20, %v836_v16 }
 0x111   : > { %v868_v9 = vadd.f32 %v867_v28, %v837_v26  ;;  %v799_v12 = vadd.f32 %v798_v27, %v1556_v49 }
 0x113   : > { %v800_v29 = vadd.f32 %v799_v12, %v1564_v0  ;;  %v869_v13 = vadd.f32 %v868_v9, %v838_v61 }
 0x115   : > { %v801_v33 = vadd.f32 %v1547_v47, %v800_v29  ;;  %v870_v34 = vadd.f32 %v869_v13, %v839_v30  ;;  %v844_v47 = vmul.f32 %v1569_v10, %v1569_v10 }
 0x117   : > { %v871_v17 = vadd.f32 %v870_v34, %v840_v32  ;;  %v802_v36 = vadd.f32 %v1559_v55, %v801_v33  ;;  %v845_v55 = vmul.f32 %v1575_v57, %v1575_v57 }
 0x119   : > { %v803_v49 = vadd.f32 %v802_v36, %v1572_v21  ;;  %v872_v38 = vadd.f32 %v871_v17, %v841_v35 }
 0x11b   : > { %v873_v0 = vadd.f32 %v872_v38, %v842_v37  ;;  %v804_v18 = vadd.f32 %v803_v49, %v1580_v59 }
 0x11d   : > { %v805_v40 = vadd.f32 %v1569_v10, %v804_v18  ;;  %v874_v23 = vadd.f32 %v873_v0, %v843_v31 }
 0x11f   : > { %v875_v41 = vadd.f32 %v874_v23, %v844_v47  ;;  %v806_v42 = vadd.f32 %v1575_v57, %v805_v40 }
 0x121   : > { %v807_v21 = vadd.f32 %v806_v42, %v1588_v39  ;;  %v876_v2 = vadd.f32 %v875_v41, %v845_v55  ;;  %v850_v39 = vmul.f32 %v609_v63, %v609_v63 }
 0x123   : > { %v877_v22 = vadd.f32 %v876_v2, %v846_v5  ;;  %v808_v59 = vadd.f32 %v807_v21, %v596_v46  ;;  %v851_v46 = vmul.f32 %v612_v24, %v612_v24 }
 0x125   : > { %v809_v10 = vadd.f32 %v1585_v8, %v808_v59  ;;  %v878_v11 = vadd.f32 %v877_v22, %v847_v44 }
 0x127   : > { %v879_v57 = vadd.f32 %v878_v11, %v848_v45  ;;  %v810_v50 = vadd.f32 %v1591_v43, %v809_v10 }
 0x129   : > { %v811_v51 = vadd.f32 %v810_v50, %v609_v63  ;;  %v880_v52 = vadd.f32 %v879_v57, %v849_v48 }
 0x12b   : > { %v881_v54 = vadd.f32 %v880_v52, %v850_v39  ;;  %v812_v56 = vadd.f32 %v811_v51, %v612_v24 }
 0x12d   : > { %v813_v60 = vadd.f32 %v1598_v53, %v812_v56  ;;  %v882_v8 = vadd.f32 %v881_v54, %v851_v46 }
 0x12f   : > { %v814_v1 = vadd.f32 %v1310_v14, %v813_v60  ;;  %v883_v3 = vadd.f32 %v882_v8, %v852_v58 }
 0x131   : > { %v815_v4 = vrot.slane %v814_v1, 4  ;;  %v884_v6 = vadd.f32 %v883_v3, %v853_v62 }
 0x133   : > { %v816_v43 = vadd.f32 %v815_v4, %v814_v1  ;;  %v885_v7 = vrot.slane %v884_v6, 4 }
 0x135   : > { %v817_v63 = vrot.slane %v816_v43, 2  ;;  %v886_v15 = vadd.f32 %v885_v7, %v884_v6 }
 0x137   : > { %v818_v16 = vadd.f32 %v817_v63, %v816_v43  ;;  %v887_v19 = vrot.slane %v886_v15, 2 }
 0x139   : > { %v819_v20 = vrot.slane %v818_v16, 1  ;;  %v888_v24 = vadd.f32 %v887_v19, %v886_v15 }
 0x13b   : > { %v820_v53 = vadd.f32 %v819_v20, %v818_v16  ;;  %v889_v25 = vrot.slane %v888_v24, 1 }
 0x13d   : > { %821 = vst [vmem:[%s211_s24] sm:$0x1] %v820_v53  ;;  %v890_v14 = vadd.f32 %v889_v25, %v888_v24 }
 0x13f   : > { %891 = vst [vmem:[%s211_s24 + $0x1] sm:$0x1] %v890_v14 }
 0x140 PF: > { %s15_s15 = sadd.s32 1, %s1349_s15  }
 0x141   : > { %p12_p5 = scmp.ge.s32.totalorder %s15_s15, 4  }
 0x143   :  { %14 = sbr.rel (!%p12_p5) target bundleno = 1 (0x1), region = 74 }

// kernel: bottleneck_forward.5
= control target key start
LH: loop header
LB: loop body
LE: loop exit
PB: predicated region body
PF: predicated region fallthrough
CT: control target
= control target key end

     0   :  { %s3683_s21 = smov 0   ;;  %s3685_s22 = smov 0   ;;  %s4404_s0 = inlined_call_operand.vmem [shape: bf16[512,128], index: 0, kind: input, shape index: {}, may-alias: {0,1,2}]   ;;  %s4405_s1 = inlined_call_operand.vmem [shape: bf16[512,128], index: 1, kind: input, shape index: {}, may-alias: {0,1,2}]   ;;  %s4406_s2 = inlined_call_operand.vmem [shape: bf16[512,128], index: 2, kind: input, shape index: {}, may-alias: {0,1,2}]   ;;  %s4407_s3 = inlined_call_operand.vmem [shape: f32[2,128], index: 3, kind: input, shape index: {}]   ;;  %s4408_s4 = inlined_call_operand.vmem [shape: bf16[9,128,128], index: 4, kind: input, shape index: {}]   ;;  %s4409_s5 = inlined_call_operand.vmem [shape: bf16[512,128], index: 5, kind: output, shape index: {0}]   ;;  %s4410_s6 = inlined_call_operand.vmem [shape: f32[32,128], index: 6, kind: output, shape index: {1}]  }
   0x1   :  { %s3687_s23 = smov 0   ;;  %s3689_s24 = smov 0  }
   0x2   :  { %s3691_s25 = smov 0  }
   0x3 LB: > { %s26_s26 = sadd.s32 1, %s3637_s23  ;;  %s29_s27 = sadd.s32 1, %s3641_s24  ;;  %s3645_s25 = sphi %s3691_s25, %s17_s25   ;;  %s3641_s24 = sphi %s3689_s24, %s4452_s24   ;;  %s3637_s23 = sphi %s3687_s23, %s4451_s23   ;;  %s3633_s22 = sphi %s3685_s22, %s4450_s22   ;;  %s3629_s21 = sphi %s3683_s21, %s4449_s21  }
   0x4   : > { %p27_p0 = scmp.ge.s32.totalorder %s26_s26, 2  ;;  %p2686_p1 = scmp.ge.s32.totalorder %s3645_s25, 1 }
   0x5   : > { %p314_p2 = scmp.lt.s32.totalorder %s3645_s25, 5 }
   0x6   : > { %s4454_s26 = smov (%p27_p0, %s26_s26), 0  ;;  %s4456_s27 = smov (!%p27_p0, %s29_s27), %s3641_s24 }
   0x7   : > { %p315_p3 = pnand %p2686_p1, %p314_p2  ;;  %p31_p4 = scmp.ge.s32.totalorder %s4456_s27, 2 }
   0x9   : > { %s4458_s27 = smov (%p31_p4, %s4456_s27), 0  ;;  %318 = sbr.rel (%p315_p3) target bundleno = 421 (0x1a5), region = 40 }
   0xe   : > { %v3529_v0 = vld [vmem:[%s4408_s4 + $0x78] sm:$0xff]   ;;  %s2690_s30 = sshll.u32 %s3633_s22, 4  ;;  %s2691_s9 = sshll.u32 %s3629_s21, 3  ;;  %v3531_v2 = vld [vmem:[%s4408_s4 + $0x70] sm:$0xff]   ;;  %v3533_v4 = vld [vmem:[%s4408_s4 + $0x68] sm:$0xff]   ;;  %v3647_v10 = vmov 0.0  }
   0xf   : > { %v3530_v1 = vld [vmem:[%s4408_s4 + $0x38] sm:$0xff]   ;;  %3184 = vmatprep.subr.bf16.mxu0 %v3529_v0  ;;  %s2692_s12 = sadd.s32 4294967295, %s2691_s9  ;;  %v3532_v3 = vld [vmem:[%s4408_s4 + $0x30] sm:$0xff]   ;;  %s2929_s17 = sadd.s32 8, %s2691_s9  ;;  %v3534_v5 = vld [vmem:[%s4408_s4 + $0x28] sm:$0xff]  }
  0x10   : > { %3216 = vmatprep.subr.bf16.mxu1 %v3530_v1  ;;  %3185 = vmatpush3.bf16.msra.mxu0 %v3529_v0  ;;  %p389_p5 = scmp.gt.s32.totalorder %s2692_s12, 0  ;;  %p407_p6 = scmp.lt.s32.totalorder %s2929_s17, 15  ;;  %v3535_v6 = vld [vmem:[%s4408_s4 + $0x60] sm:$0xff]   ;;  %v3537_v8 = vld [vmem:[%s4408_s4 + $0x58] sm:$0xff]   ;;  %585 = vst [vmem:[#allocation2] sm:$0x1] %v3647_v10 }
  0x11   : > { %3217 = vmatpush3.bf16.msra.mxu1 %v3530_v1  ;;  %3186 = vmatprep.subr.bf16.mxu0 %v3531_v2  ;;  %v3536_v7 = vld [vmem:[%s4408_s4 + $0x20] sm:$0xff]   ;;  %p568_p8 = scmp.gt.s32.totalorder %s3629_s21, 0  ;;  %v3538_v9 = vld [vmem:[%s4408_s4 + $0x18] sm:$0xff]   ;;  %586 = vst [vmem:[#allocation2 + $0x18] sm:$0x1] %v3647_v10  ;;  %v3539_v11 = vld [vmem:[%s4408_s4 + $0x50] sm:$0xff]  }
  0x12   : > { %3218 = vmatprep.subr.bf16.mxu1 %v3532_v3  ;;  %s4460_s12 = smov (!%p389_p5, %s2692_s12), 0  ;;  %s4462_s17 = smov (!%p407_p6, %s2929_s17), 15  ;;  %587 = vst [vmem:[#allocation2 + $0x30] sm:$0x1] %v3647_v10  ;;  %588 = vst [vmem:[#allocation2 + $0x48] sm:$0x1] %v3647_v10 }
  0x13   : > { %s391_s29 = sadd.s32 %s2690_s30, %s4460_s12  ;;  %s3753_s12 = sadd.s32 %s2690_s30, %s4462_s17  ;;  %589 = vst [vmem:[#allocation2 + $0x60] sm:$0x1] %v3647_v10  ;;  %590 = vst [vmem:[#allocation2 + $0x78] sm:$0x1] %v3647_v10  ;;  %v3540_v12 = vld [vmem:[%s4408_s4 + $0x10] sm:$0xff]   ;;  %v3541_v21 = vld [vmem:[%s4408_s4 + $0x48] sm:$0xff]  }
  0x14   : > { %3187 = vmatpush3.bf16.msra.mxu0 %v3531_v2  ;;  %s2693_s9 = sshll.u32 %s391_s29, 1  ;;  %591 = vst [vmem:[#allocation2 + $0x90] sm:$0x1] %v3647_v10  ;;  %592 = vst [vmem:[#allocation2 + $0xa8] sm:$0x1] %v3647_v10  ;;  %s2687_s8 = sshll.u32 %s3633_s22, 1 }
  0x15   : > { %3219 = vmatpush3.bf16.msra.mxu1 %v3532_v3  ;;  %3188 = vmatprep.subr.bf16.mxu0 %v3533_v4  ;;  %p393_p7 = scmp.lt.s32.totalorder %s2693_s9, 63  ;;  %593 = vst [vmem:[#allocation2 + $0xc0] sm:$0x1] %v3647_v10  ;;  %594 = vst [vmem:[#allocation2 + $0xd8] sm:$0x1] %v3647_v10  ;;  %s3782_s13 = sadd.s32 %s3629_s21, %s2687_s8  ;;  %v3542_v22 = vld [vmem:[%s4408_s4 + $0x8] sm:$0xff]  }
  0x16   : > { %3220 = vmatprep.subr.bf16.mxu1 %v3534_v5  ;;  %595 = vst [vmem:[#allocation2 + $0x11] sm:$0x1] %v3647_v10  ;;  %596 = vst [vmem:[#allocation2 + $0x29] sm:$0x1] %v3647_v10  ;;  %v3771_v13 = vld [vmem:[%s4407_s3] ss:$0 sm:$0xff] }
  0x17   : > { %s4464_s9 = smov (!%p393_p7, %s2693_s9), 63  ;;  %597 = vst [vmem:[#allocation2 + $0x41] sm:$0x1] %v3647_v10  ;;  %598 = vst [vmem:[#allocation2 + $0x59] sm:$0x1] %v3647_v10  ;;  %s2688_s22 = sshll.u32 %s3782_s13, 4 }
  0x18   : > { %3189 = vmatpush3.bf16.msra.mxu0 %v3533_v4  ;;  %s2694_s15 = sshll.u32 %s4464_s9, 2  ;;  %599 = vst [vmem:[#allocation2 + $0x71] sm:$0x1] %v3647_v10  ;;  %600 = vst [vmem:[#allocation2 + $0x89] sm:$0x1] %v3647_v10  ;;  %p379_p9 = scmp.lt.s32.totalorder %s2688_s22, 63 }
  0x19   : > { %3221 = vmatpush3.bf16.msra.mxu1 %v3534_v5  ;;  %3190 = vmatprep.subr.bf16.mxu0 %v3535_v6  ;;  %601 = vst [vmem:[#allocation2 + $0xa1] sm:$0x1] %v3647_v10  ;;  %602 = vst [vmem:[#allocation2 + $0xb9] sm:$0x1] %v3647_v10  ;;  %s396_s17 = scalar_lea.vmem %s4405_s1, %s2694_s15  ;;  %v3779_v17 = vld [vmem:[%s4407_s3 + $0x1] ss:$0 sm:$0xff] }
  0x1a   : > { %3222 = vmatprep.subr.bf16.mxu1 %v3536_v7  ;;  %603 = vst [vmem:[#allocation2 + $0xd1] sm:$0x1] %v3647_v10  ;;  %604 = vst [vmem:[#allocation2 + $0xe9] sm:$0x1] %v3647_v10  ;;  %v2979_v14 = vld [vmem:[%s396_s17] sm:$0xff]   ;;  %s4466_s22 = smov (!%p379_p9, %s2688_s22), 63 }
  0x1b   : > { %v2980_v15 = vunpack.c.l.bf16 %v2979_v14  ;;  %v2981_v16 = vunpack.c.h.bf16 %v2979_v14  ;;  %s569_s9 = scalar_select %p568_p8, 1, 0  ;;  %v3543_v26 = vld [vmem:[%s4408_s4 + $0x40] sm:$0xff]   ;;  %v3545_v41 = vld [vmem:[%s4408_s4 + $0xb8] sm:$0xff]   ;;  %v3547_v14 = vld [vmem:[%s4408_s4 + $0xb0] sm:$0xff]  }
  0x1c   : > { %3191 = vmatpush3.bf16.msra.mxu0 %v3535_v6  ;;  %v3544_v29 = vld [vmem:[%s4408_s4] sm:$0xff]   ;;  %s2689_s28 = sshll.u32 %s4466_s22, 2  ;;  %v3835_v49 = vld [vmem:[%s4408_s4 + $0xf8] sm:$0xff]   ;;  %s2697_s17 = sshll.u32 %s3753_s12, 1 }
  0x1d   : > { %3223 = vmatpush3.bf16.msra.mxu1 %v3536_v7  ;;  %3192 = vmatprep.subr.bf16.mxu0 %v3537_v8  ;;  %v552_v18 = vmul.f32 %v2980_v15, %v3771_v13  ;;  %v553_v19 = vmul.f32 %v2981_v16, %v3771_v13  ;;  %v570_v20 = vstv %s569_s9  ;;  %s3817_s8 = scalar_lea.vmem %s4404_s0, %s2689_s28  ;;  %p411_p10 = scmp.lt.s32.totalorder %s2697_s17, 63 }
  0x1e   : > { %3224 = vmatprep.subr.bf16.mxu1 %v3538_v9  ;;  %vm3795_vm0 = vcmp.eq.s32.totalorder %v570_v20, 1  ;;  %v2947_v32 = vld [vmem:[%s3817_s8] sm:$0xff]   ;;  %v3026_v33 = vld [vmem:[%s3817_s8 + $0x8] sm:$0xff]   ;;  %v3027_v34 = vld [vmem:[%s3817_s8 + $0x10] sm:$0xff]   ;;  %p574_p11 = scmp.lt.s32.totalorder %s3629_s21, 1  ;;  %p434_p12 = scmp.lt.s32.totalorder %s3782_s13, 3 }
  0x1f   : > { %v554_v23 = vadd.f32 %v3779_v17, %v552_v18  ;;  %v555_v24 = vadd.f32 %v3779_v17, %v553_v19  ;;  %v2948_v35 = vunpack.c.l.bf16 %v2947_v32  ;;  %v2949_v36 = vunpack.c.h.bf16 %v2947_v32  ;;  %v3028_v39 = vld [vmem:[%s3817_s8 + $0x18] sm:$0xff]   ;;  %v3029_v40 = vld [vmem:[%s3817_s8 + $0x20] sm:$0xff]   ;;  %vm3601_vm1 = vmpackc.low %vm3795_vm0, %vm3795_vm0  ;;  %s4468_s17 = smov (!%p411_p10, %s2697_s17), 63 }
  0x20   : > { %3193 = vmatpush3.bf16.msra.mxu0 %v3537_v8  ;;  %v2952_v37 = vunpack.c.l.bf16 %v3026_v33  ;;  %v2953_v38 = vunpack.c.h.bf16 %v3026_v33  ;;  %v2956_v42 = vunpack.c.l.bf16 %v3027_v34  ;;  %v2957_v43 = vunpack.c.h.bf16 %v3027_v34  ;;  %v3030_v6 = vld [vmem:[%s3817_s8 + $0x28] sm:$0xff]   ;;  %s2698_s18 = sshll.u32 %s4468_s17, 2  ;;  %s4344_s17 = scalar_lea.vmem %s4409_s5, %s2689_s28 }
  0x21   : > { %3225 = vmatpush3.bf16.msra.mxu1 %v3538_v9  ;;  %3194 = vmatprep.subr.bf16.mxu0 %v3539_v11  ;;  %v556_v27 = vmax.f32 %v554_v23, 0.0  ;;  %v557_v28 = vmax.f32 %v555_v24, 0.0  ;;  %v2960_v44 = vunpack.c.l.bf16 %v3028_v39  ;;  %v2961_v45 = vunpack.c.h.bf16 %v3028_v39  ;;  %s414_s12 = scalar_lea.vmem %s4406_s2, %s2698_s18  ;;  %s4470_s13 = smov (!%p434_p12, %s3782_s13), 3 }
  0x22   : > { %3226 = vmatprep.subr.bf16.mxu1 %v3540_v12  ;;  %v479_v47 = vmul.f32 %v2948_v35, %v3771_v13  ;;  %v480_v48 = vmul.f32 %v2949_v36, %v3771_v13  ;;  %v481_v50 = vmul.f32 %v2952_v37, %v3771_v13  ;;  %v2964_v51 = vunpack.c.l.bf16 %v3029_v40  ;;  %s575_s9 = scalar_select %p574_p11, 1, 0 }
  0x23   : > { %v572_v30 = vsel %vm3795_vm0, %v556_v27, 0.0  ;;  %v573_v31 = vsel %vm3795_vm0, %v557_v28, 0.0  ;;  %v3602_v46 = vpack.c.bf16 %v557_v28, %v556_v27  ;;  %v482_v52 = vmul.f32 %v2953_v38, %v3771_v13  ;;  %s2703_s22 = sshll.u32 %s4470_s13, 3 }
  0x24   : > { %3195 = vmatpush3.bf16.msra.mxu0 %v3539_v11  ;;  %580 = vst [vmem:[#allocation2 + $0x1] sm:$0xff] %v572_v30  ;;  %581 = vst [vmem:[#allocation2 + $0x9] sm:$0xff] %v573_v31  ;;  %v483_v53 = vmul.f32 %v2956_v42, %v3771_v13  ;;  %v484_v54 = vmul.f32 %v2957_v43, %v3771_v13  ;;  %v485_v55 = vmul.f32 %v2960_v44, %v3771_v13  ;;  %v3031_v11 = vld [vmem:[%s3817_s8 + $0x30] sm:$0xff]   ;;  %s437_s11 = scalar_lea.vmem %s4410_s6, %s2703_s22 }
  0x25   : > { %3227 = vmatpush3.bf16.msra.mxu1 %v3540_v12  ;;  %3196 = vmatprep.subr.bf16.mxu0 %v3541_v21  ;;  %v499_v56 = vadd.f32 %v3779_v17, %v479_v47  ;;  %v500_v57 = vadd.f32 %v3779_v17, %v480_v48  ;;  %v501_v58 = vadd.f32 %v3779_v17, %v481_v50  ;;  %v2965_v63 = vunpack.c.h.bf16 %v3029_v40 }
  0x26   : > { %3228 = vmatprep.subr.bf16.mxu1 %v3542_v22  ;;  %3603 = vmatprep.mubr.msk.bf16.mxu0 %vm3601_vm1, %v3602_v46  ;;  %v486_v59 = vmul.f32 %v2961_v45, %v3771_v13  ;;  %v502_v60 = vadd.f32 %v3779_v17, %v482_v52  ;;  %v503_v61 = vadd.f32 %v3779_v17, %v483_v53  ;;  %v2969_v24 = vunpack.c.h.bf16 %v3030_v6  ;;  %v3548_v45 = vld [vmem:[%s4408_s4 + $0xf0] sm:$0xff]  }
  0x27   : > { %v504_v62 = vadd.f32 %v3779_v17, %v484_v54  ;;  %v515_v2 = vmax.f32 %v499_v56, 0.0  ;;  %v516_v3 = vmax.f32 %v500_v57, 0.0  ;;  %v517_v4 = vmax.f32 %v501_v58, 0.0 }
  0x28   : > { %3197 = vmatpush3.bf16.msra.mxu0 %v3541_v21  ;;  %v505_v5 = vadd.f32 %v3779_v17, %v485_v55  ;;  %v518_v8 = vmax.f32 %v502_v60, 0.0  ;;  %v519_v9 = vmax.f32 %v503_v61, 0.0  ;;  %v506_v15 = vadd.f32 %v3779_v17, %v486_v59  ;;  %v3550_v55 = vld [vmem:[%s4408_s4 + $0xe8] sm:$0xff]   ;;  %v3553_v59 = vld [vmem:[%s4408_s4 + $0x98] sm:$0xff]  }
  0x29   : > { %3229 = vmatpush3.bf16.msra.mxu1 %v3542_v22  ;;  %3198 = vmatprep.subr.bf16.mxu0 %v3543_v26  ;;  %v520_v10 = vmax.f32 %v504_v62, 0.0  ;;  %532 = vst [vmem:[#allocation2 + $0x19] sm:$0xff] %v515_v2  ;;  %533 = vst [vmem:[#allocation2 + $0x21] sm:$0xff] %v516_v3  ;;  %v3853_v12 = vpack.c.bf16 %v516_v3, %v515_v2  ;;  %v487_v18 = vmul.f32 %v2964_v51, %v3771_v13  ;;  %v3551_v51 = vld [vmem:[%s4408_s4 + $0xa0] sm:$0xff]   ;;  %v3554_v3 = vld [vmem:[%s4408_s4 + $0xd8] sm:$0xff]  }
  0x2a   : > { %3230 = vmatprep.subr.bf16.mxu1 %v3544_v29  ;;  %534 = vst [vmem:[#allocation2 + $0x31] sm:$0xff] %v517_v4  ;;  %v521_v16 = vmax.f32 %v505_v5, 0.0  ;;  %535 = vst [vmem:[#allocation2 + $0x39] sm:$0xff] %v518_v8  ;;  %v3860_v19 = vpack.c.bf16 %v518_v8, %v517_v4  ;;  %v488_v20 = vmul.f32 %v2965_v63, %v3771_v13  ;;  %v2968_v21 = vunpack.c.l.bf16 %v3030_v6  ;;  %v3552_v62 = vld [vmem:[%s4408_s4 + $0xe0] sm:$0xff]   ;;  %v3555_v63 = vld [vmem:[%s4408_s4 + $0x90] sm:$0xff]  }
  0x2b   : > { %v605_v0 = vld [vmem:[#allocation2] sm:$0xff]  ;;  %v606_v1 = vld [vmem:[#allocation2 + $0x8] sm:$0xff]  ;;  %536 = vst [vmem:[#allocation2 + $0x49] sm:$0xff] %v519_v9  ;;  %537 = vst [vmem:[#allocation2 + $0x51] sm:$0xff] %v520_v10  ;;  %v522_v22 = vmax.f32 %v506_v15, 0.0  ;;  %v507_v23 = vadd.f32 %v3779_v17, %v487_v18  ;;  %v2972_v25 = vunpack.c.l.bf16 %v3031_v11  ;;  %v2973_v28 = vunpack.c.h.bf16 %v3031_v11 }
  0x2c   : > { %3199 = vmatpush3.bf16.msra.mxu0 %v3543_v26  ;;  %v621_v7 = vpack.c.bf16 %v606_v1, %v605_v0  ;;  %538 = vst [vmem:[#allocation2 + $0x61] sm:$0xff] %v521_v16  ;;  %v508_v26 = vadd.f32 %v3779_v17, %v488_v20  ;;  %v489_v27 = vmul.f32 %v2968_v21, %v3771_v13  ;;  %v3557_v6 = vld [vmem:[%s4408_s4 + $0x88] sm:$0xff]   ;;  %v3556_v11 = vld [vmem:[%s4408_s4 + $0xd0] sm:$0xff]   ;;  %v3032_v15 = vld [vmem:[%s3817_s8 + $0x38] sm:$0xff]  }
  0x2d   : > { %3231 = vmatpush3.bf16.msra.mxu1 %v3544_v29  ;;  %3248 = vmatprep.subr.bf16.mxu0 %v3545_v41  ;;  %v3549_v29 = vld [vmem:[%s4408_s4 + $0xa8] sm:$0xff]   ;;  %539 = vst [vmem:[#allocation2 + $0x69] sm:$0xff] %v522_v22  ;;  %v523_v30 = vmax.f32 %v507_v23, 0.0  ;;  %v490_v31 = vmul.f32 %v2969_v24, %v3771_v13  ;;  %v491_v32 = vmul.f32 %v2972_v25, %v3771_v13  ;;  %v2976_v20 = vunpack.c.l.bf16 %v3032_v15 }
  0x2e   : > { %3280 = vmatprep.subr.bf16.mxu1 %v3835_v49  ;;  %3232 = vmatprep.mubr.bf16.mxu1 %v621_v7  ;;  %v524_v33 = vmax.f32 %v508_v26, 0.0  ;;  %v509_v34 = vadd.f32 %v3779_v17, %v489_v27  ;;  %v492_v35 = vmul.f32 %v2973_v28, %v3771_v13  ;;  %v3875_v36 = vpack.c.bf16 %v520_v10, %v519_v9  ;;  %v976_v9 = vld [vmem:[#allocation2 + $0x2] sm:$0xff]  ;;  %v977_v10 = vld [vmem:[#allocation2 + $0xa] sm:$0xff]  ;;  %v3561_v26 = vld [vmem:[%s4408_s4 + $0x138] sm:$0xff]  }
  0x2f   : > { %3201 = vmatmul.mubr.bf16.vlgmr.msra.gmra.mxu0 %v3853_v12  ;;  %540 = vst [vmem:[#allocation2 + $0x79] sm:$0xff] %v523_v30  ;;  %v510_v37 = vadd.f32 %v3779_v17, %v490_v31  ;;  %v511_v38 = vadd.f32 %v3779_v17, %v491_v32  ;;  %v3890_v52 = vpack.c.bf16 %v522_v22, %v521_v16  ;;  %v3559_v16 = vld [vmem:[%s4408_s4 + $0x80] sm:$0xff]   ;;  %v2977_v21 = vunpack.c.h.bf16 %v3032_v15  ;;  %v3558_v23 = vld [vmem:[%s4408_s4 + $0xc8] sm:$0xff]  }
  0x30   : > { %3249 = vmatpush3.bf16.msra.mxu0 %v3545_v41  ;;  %3204 = vmatprep.mubr.bf16.mxu0 %v3860_v19  ;;  %v607_v39 = vld [vmem:[#allocation2 + $0x18] sm:$0xff]  ;;  %v608_v40 = vld [vmem:[#allocation2 + $0x20] sm:$0xff]  ;;  %541 = vst [vmem:[#allocation2 + $0x81] sm:$0xff] %v524_v33  ;;  %v525_v42 = vmax.f32 %v509_v34, 0.0  ;;  %v512_v43 = vadd.f32 %v3779_v17, %v492_v35  ;;  %v3905_v61 = vpack.c.bf16 %v524_v33, %v523_v30  ;;  %v3573_v15 = vld [vmem:[%s4408_s4 + $0x108] sm:$0xff]  }
  0x31   : > { %3250 = vmatprep.subr.bf16.mxu0 %v3547_v14  ;;  %v609_v41 = vld [vmem:[#allocation2 + $0x30] sm:$0xff]  ;;  %v3880_v44 = vpack.c.bf16 %v608_v40, %v607_v39  ;;  %v610_v46 = vld [vmem:[#allocation2 + $0x38] sm:$0xff]  ;;  %v526_v47 = vmax.f32 %v510_v37, 0.0  ;;  %v527_v48 = vmax.f32 %v511_v38, 0.0  ;;  %v992_v18 = vpack.c.bf16 %v977_v10, %v976_v9  ;;  %v3560_v35 = vld [vmem:[%s4408_s4 + $0xc0] sm:$0xff]  }
  0x32   : > { %v3885_v50 = vpack.c.bf16 %v610_v46, %v609_v41  ;;  %542 = vst [vmem:[#allocation2 + $0x91] sm:$0xff] %v525_v42  ;;  %v528_v53 = vmax.f32 %v512_v43, 0.0  ;;  %v611_v54 = vld [vmem:[#allocation2 + $0x48] sm:$0xff]  ;;  %v612_v56 = vld [vmem:[#allocation2 + $0x50] sm:$0xff]  ;;  %v978_v25 = vld [vmem:[#allocation2 + $0x1a] sm:$0xff]  ;;  %v493_v27 = vmul.f32 %v2976_v20, %v3771_v13  ;;  %v494_v28 = vmul.f32 %v2977_v21, %v3771_v13 }
  0x33   : > { %3233 = vmatmul.mubr.bf16.vlgmr.msra.gmra.mxu1 %v3880_v44  ;;  %543 = vst [vmem:[#allocation2 + $0x99] sm:$0xff] %v526_v47  ;;  %544 = vst [vmem:[#allocation2 + $0xa9] sm:$0xff] %v527_v48  ;;  %v613_v57 = vld [vmem:[#allocation2 + $0x60] sm:$0xff]  ;;  %v3903_v60 = vpack.c.bf16 %v612_v56, %v611_v54  ;;  %v3915_v0 = vpack.c.bf16 %v526_v47, %v525_v42  ;;  %v980_v30 = vld [vmem:[#allocation2 + $0x32] sm:$0xff]  ;;  %v576_v20 = vstv %s575_s9 }
  0x34   : > { %3251 = vmatpush3.bf16.msra.mxu0 %v3547_v14  ;;  %3281 = vmatpush3.bf16.msra.mxu1 %v3835_v49  ;;  %545 = vst [vmem:[#allocation2 + $0xb1] sm:$0xff] %v528_v53  ;;  %v614_v58 = vld [vmem:[#allocation2 + $0x68] sm:$0xff]  ;;  %v3929_v8 = vpack.c.bf16 %v528_v53, %v527_v48  ;;  %v3952_v31 = vadd.f32 %v3779_v17, %v493_v27  ;;  %v981_v34 = vld [vmem:[#allocation2 + $0x3a] sm:$0xff]  ;;  %v3563_v42 = vld [vmem:[%s4408_s4 + $0x130] sm:$0xff]   ;;  %vm4045_vm2 = vcmp.eq.s32.totalorder %v576_v20, 1 }
  0x35   : > { %3252 = vmatprep.subr.bf16.mxu0 %v3549_v29  ;;  %3236 = vmatprep.mubr.bf16.mxu1 %v3885_v50  ;;  %v3907_v49 = vpack.c.bf16 %v614_v58, %v613_v57  ;;  %v3955_v32 = vadd.f32 %v3779_v17, %v494_v28  ;;  %v3966_v40 = vpack.c.bf16 %v981_v34, %v980_v30  ;;  %v3562_v41 = vld [vmem:[%s4408_s4 + $0x178] sm:$0xff]   ;;  %v982_v43 = vld [vmem:[#allocation2 + $0x4a] sm:$0xff]  ;;  %v984_v47 = vld [vmem:[#allocation2 + $0x62] sm:$0xff] }
  0x36   : > { %3282 = vmatprep.subr.bf16.mxu1 %v3548_v45  ;;  %v615_v1 = vld [vmem:[#allocation2 + $0x78] sm:$0xff]  ;;  %v529_v37 = vmax.f32 %v3952_v31, 0.0  ;;  %v3565_v46 = vld [vmem:[%s4408_s4 + $0x128] sm:$0xff]   ;;  %v3572_v21 = vld [vmem:[%s4408_s4 + $0x150] sm:$0xff]  }
  0x37   : > { %3205 = vmatmul.mubr.bf16.gmra.mxu0 %v3875_v36  ;;  %v616_v2 = vld [vmem:[#allocation2 + $0x80] sm:$0xff]  ;;  %v530_v38 = vmax.f32 %v3955_v32, 0.0  ;;  %v985_v48 = vld [vmem:[#allocation2 + $0x6a] sm:$0xff]  ;;  %v3569_v58 = vld [vmem:[%s4408_s4 + $0x118] sm:$0xff]  }
  0x38   : > { %3253 = vmatpush3.bf16.msra.mxu0 %v3549_v29  ;;  %3208 = vmatprep.mubr.bf16.mxu0 %v3890_v52  ;;  %v3927_v7 = vpack.c.bf16 %v616_v2, %v615_v1  ;;  %v979_v29 = vld [vmem:[#allocation2 + $0x22] sm:$0xff]  ;;  %546 = vst [vmem:[#allocation2 + $0xc1] sm:$0xff] %v529_v37  ;;  %v3991_v53 = vpack.c.bf16 %v985_v48, %v984_v47  ;;  %v986_v56 = vld [vmem:[#allocation2 + $0x7a] sm:$0xff]  ;;  %vm3604_vm3 = vmpackc.low %vm4045_vm2, %vm4045_vm2 }
  0x39   : > { %3254 = vmatprep.subr.bf16.mxu0 %v3551_v51  ;;  %3283 = vmatpush3.bf16.msra.mxu1 %v3548_v45  ;;  %v617_v4 = vld [vmem:[#allocation2 + $0x90] sm:$0xff]  ;;  %v3964_v39 = vpack.c.bf16 %v979_v29, %v978_v25  ;;  %547 = vst [vmem:[#allocation2 + $0xc9] sm:$0xff] %v530_v38  ;;  %v3566_v54 = vld [vmem:[%s4408_s4 + $0x168] sm:$0xff]   ;;  %v3585_v48 = vld [vmem:[%s4408_s4 + $0x198] sm:$0xff]  }
  0x3a   : > { %3284 = vmatprep.subr.bf16.mxu1 %v3550_v55  ;;  %v618_v5 = vld [vmem:[#allocation2 + $0x98] sm:$0xff]  ;;  %v619_v22 = vld [vmem:[#allocation2 + $0xa8] sm:$0xff] }
  0x3b   : > { %3237 = vmatmul.mubr.bf16.gmra.mxu1 %v3903_v60  ;;  %v3934_v14 = vpack.c.bf16 %v618_v5, %v617_v4  ;;  %v620_v24 = vld [vmem:[#allocation2 + $0xb0] sm:$0xff]  ;;  %v987_v57 = vld [vmem:[#allocation2 + $0x82] sm:$0xff]  ;;  %v3570_v4 = vld [vmem:[%s4408_s4 + $0x158] sm:$0xff]  }
  0x3c   : > { %3255 = vmatpush3.bf16.msra.mxu0 %v3551_v51  ;;  %3240 = vmatprep.mubr.bf16.mxu1 %v3907_v49  ;;  %v3957_v33 = vpack.c.bf16 %v620_v24, %v619_v22  ;;  %v983_v45 = vld [vmem:[#allocation2 + $0x52] sm:$0xff]  ;;  %v4010_v1 = vpack.c.bf16 %v987_v57, %v986_v56  ;;  %v2983_v5 = vld [vmem:[%s414_s12] sm:$0xff]   ;;  %v3574_v29 = vld [vmem:[%s4408_s4 + $0x148] sm:$0xff]  }
  0x3d   : > { %3256 = vmatprep.subr.bf16.mxu0 %v3553_v59  ;;  %3285 = vmatpush3.bf16.msra.mxu1 %v3550_v55  ;;  %v3989_v51 = vpack.c.bf16 %v983_v45, %v982_v43  ;;  %v3567_v55 = vld [vmem:[%s4408_s4 + $0x120] sm:$0xff]   ;;  %v2984_v9 = vunpack.c.l.bf16 %v2983_v5  ;;  %v2985_v10 = vunpack.c.h.bf16 %v2983_v5  ;;  %v3578_v43 = vld [vmem:[%s4408_s4 + $0x1f8] sm:$0xff]   ;;  %v3581_v45 = vld [vmem:[%s4408_s4 + $0x1a8] sm:$0xff]  }
  0x3e   : > { %3286 = vmatprep.subr.bf16.mxu1 %v3552_v62  ;;  %v3582_v47 = vld [vmem:[%s4408_s4 + $0x1e8] sm:$0xff]   ;;  %v3588_v57 = vld [vmem:[%s4408_s4 + $0x1d0] sm:$0xff]  }
  0x3f   : > { %3209 = vmatmul.mubr.bf16.gmra.mxu0 %v3905_v61  ;;  %v3589_v56 = vld [vmem:[%s4408_s4 + $0x188] sm:$0xff]  }
  0x40   : > { %3257 = vmatpush3.bf16.msra.mxu0 %v3553_v59  ;;  %3212 = vmatprep.mubr.bf16.mxu0 %v3915_v0  ;;  %v988_v59 = vld [vmem:[#allocation2 + $0x92] sm:$0xff]  ;;  %v1193_v28 = vld [vmem:[#allocation2 + $0xc8] sm:$0xff] }
  0x41   : > { %3258 = vmatprep.subr.bf16.mxu0 %v3555_v63  ;;  %3287 = vmatpush3.bf16.msra.mxu1 %v3552_v62  ;;  %v989_v62 = vld [vmem:[#allocation2 + $0x9a] sm:$0xff]  ;;  %v3590_v31 = vld [vmem:[%s4408_s4 + $0x1c8] sm:$0xff]  }
  0x42   : > { %3288 = vmatprep.subr.bf16.mxu1 %v3554_v3  ;;  %v4015_v2 = vpack.c.bf16 %v989_v62, %v988_v59  ;;  %v3591_v59 = vld [vmem:[%s4408_s4 + $0x180] sm:$0xff]  }
  0x43   : > { %3241 = vmatmul.mubr.bf16.gmra.mxu1 %v3927_v7  ;;  %v1596_v62 = vld [vmem:[#allocation2 + $0xc2] sm:$0xff] }
  0x44   : > { %3259 = vmatpush3.bf16.msra.mxu0 %v3555_v63  ;;  %3244 = vmatprep.mubr.bf16.mxu1 %v3934_v14  ;;  %v3568_v63 = vld [vmem:[%s4408_s4 + $0x160] sm:$0xff]  }
  0x45   : > { %3260 = vmatprep.subr.bf16.mxu0 %v3557_v6  ;;  %3289 = vmatpush3.bf16.msra.mxu1 %v3554_v3  ;;  %v3571_v3 = vld [vmem:[%s4408_s4 + $0x110] sm:$0xff]  }
  0x46   : > { %3290 = vmatprep.subr.bf16.mxu1 %v3556_v11 }
  0x47   : > { %3213 = vmatmul.mubr.bf16.gmra.mxu0 %v3929_v8 }
  0x48   : > { %3261 = vmatpush3.bf16.msra.mxu0 %v3557_v6  ;;  %3264 = vmatprep.mubr.bf16.mxu0 %v992_v18  ;;  %v990_v6 = vld [vmem:[#allocation2 + $0xaa] sm:$0xff]  ;;  %v563_v18 = vmul.f32 %v2985_v10, %v3771_v13 }
  0x49   : > { %3262 = vmatprep.subr.bf16.mxu0 %v3559_v16  ;;  %3291 = vmatpush3.bf16.msra.mxu1 %v3556_v11  ;;  %v991_v11 = vld [vmem:[#allocation2 + $0xb2] sm:$0xff] }
  0x4a   : > { %3292 = vmatprep.subr.bf16.mxu1 %v3558_v23  ;;  %v4037_v22 = vpack.c.bf16 %v991_v11, %v990_v6  ;;  %v4043_v24 = vadd.f32 %v3779_v17, %v563_v18 }
  0x4b   : > { %3245 = vmatmul.mubr.bf16.gmra.mxu1 %v3957_v33 }
  0x4c   : > { %3263 = vmatpush3.bf16.msra.mxu0 %v3559_v16  ;;  %3296 = vmatprep.mubr.bf16.mxu1 %v3880_v44  ;;  %v3564_v44 = vld [vmem:[%s4408_s4 + $0x170] sm:$0xff]   ;;  %v562_v16 = vmul.f32 %v2984_v9, %v3771_v13  ;;  %v3575_v13 = vld [vmem:[%s4408_s4 + $0x100] sm:$0xff]   ;;  %v567_v27 = vmax.f32 %v4043_v24, 0.0 }
  0x4d   : > { %3312 = vmatprep.subr.bf16.mxu0 %v3561_v26  ;;  %3293 = vmatpush3.bf16.msra.mxu1 %v3558_v23 }
  0x4e   : > { %3294 = vmatprep.subr.bf16.mxu1 %v3560_v35  ;;  %v4040_v23 = vadd.f32 %v3779_v17, %v562_v16  ;;  %v1192_v17 = vld [vmem:[#allocation2 + $0xc0] sm:$0xff]  ;;  %v579_v34 = vsel %vm4045_vm2, %v567_v27, 0.0 }
  0x4f   : > { %3265 = vmatmul.mubr.bf16.vlgmr.msra.gmra.mxu0 %v3964_v39  ;;  %584 = vst [vmem:[#allocation2 + $0xe1] sm:$0xff] %v579_v34 }
  0x50   : > { %3313 = vmatpush3.bf16.msra.mxu0 %v3561_v26  ;;  %3268 = vmatprep.mubr.bf16.mxu0 %v3966_v40  ;;  %v566_v26 = vmax.f32 %v4040_v23, 0.0 }
  0x51   : > { %3314 = vmatprep.subr.bf16.mxu0 %v3563_v42  ;;  %3295 = vmatpush3.bf16.msra.mxu1 %v3560_v35  ;;  %v4069_v35 = vpack.c.bf16 %v1193_v28, %v1192_v17 }
  0x52   : > { %3344 = vmatprep.subr.bf16.mxu1 %v3562_v41  ;;  %v578_v30 = vsel %vm4045_vm2, %v566_v26, 0.0 }
  0x53   : > { %583 = vst [vmem:[#allocation2 + $0xd9] sm:$0xff] %v578_v30 }
  0x54   : > { %3315 = vmatpush3.bf16.msra.mxu0 %v3563_v42  ;;  %3297 = vmatmul.mubr.bf16.vlgmr.msra.gmra.mxu1 %v3885_v50  ;;  %v3576_v42 = vld [vmem:[%s4408_s4 + $0x140] sm:$0xff]  }
  0x55   : > { %3316 = vmatprep.subr.bf16.mxu0 %v3565_v46  ;;  %3345 = vmatpush3.bf16.msra.mxu1 %v3562_v41  ;;  %v3577_v41 = vld [vmem:[%s4408_s4 + $0x1b8] sm:$0xff]  }
  0x56   : > { %3300 = vmatprep.mubr.bf16.mxu1 %v3903_v60  ;;  %3346 = vmatprep.subr.bf16.mxu1 %v3564_v44 }
  0x57   : > { %3269 = vmatmul.mubr.bf16.gmra.mxu0 %v3989_v51 }
  0x58   : > { %3317 = vmatpush3.bf16.msra.mxu0 %v3565_v46  ;;  %3272 = vmatprep.mubr.bf16.mxu0 %v3991_v53  ;;  %v3583_v46 = vld [vmem:[%s4408_s4 + $0x1a0] sm:$0xff]  }
  0x59   : > { %3318 = vmatprep.subr.bf16.mxu0 %v3567_v55  ;;  %3347 = vmatpush3.bf16.msra.mxu1 %v3564_v44  ;;  %v3584_v44 = vld [vmem:[%s4408_s4 + $0x1e0] sm:$0xff]  }
  0x5a   : > { %3348 = vmatprep.subr.bf16.mxu1 %v3566_v54 }
  0x5c   : > { %3319 = vmatpush3.bf16.msra.mxu0 %v3567_v55  ;;  %3301 = vmatmul.mubr.bf16.gmra.mxu1 %v3907_v49  ;;  %v3586_v55 = vld [vmem:[%s4408_s4 + $0x1d8] sm:$0xff]  }
  0x5d   : > { %3320 = vmatprep.subr.bf16.mxu0 %v3569_v58  ;;  %3349 = vmatpush3.bf16.msra.mxu1 %v3566_v54  ;;  %v3587_v54 = vld [vmem:[%s4408_s4 + $0x190] sm:$0xff]  }
  0x5e   : > { %3304 = vmatprep.mubr.bf16.mxu1 %v3927_v7  ;;  %3350 = vmatprep.subr.bf16.mxu1 %v3568_v63 }
  0x5f   : > { %3273 = vmatmul.mubr.bf16.gmra.mxu0 %v4010_v1 }
  0x60   : > { %3321 = vmatpush3.bf16.msra.mxu0 %v3569_v58  ;;  %3276 = vmatprep.mubr.bf16.mxu0 %v4015_v2  ;;  %v4129_v58 = vpack.c.bf16 %v530_v38, %v529_v37  ;;  %v3593_v37 = vld [vmem:[%s4408_s4 + $0x238] sm:$0xff]   ;;  %v3592_v38 = vld [vmem:[%s4408_s4 + $0x1c0] sm:$0xff]  }
  0x61   : > { %3322 = vmatprep.subr.bf16.mxu0 %v3571_v3  ;;  %3351 = vmatpush3.bf16.msra.mxu1 %v3568_v63  ;;  %v1597_v63 = vld [vmem:[#allocation2 + $0xca] sm:$0xff] }
  0x62   : > { %3352 = vmatprep.subr.bf16.mxu1 %v3570_v4  ;;  %v4141_v32 = vpack.c.bf16 %v1597_v63, %v1596_v62 }
  0x64   : > { %3323 = vmatpush3.bf16.msra.mxu0 %v3571_v3  ;;  %3305 = vmatmul.mubr.bf16.gmra.mxu1 %v3934_v14  ;;  %v3595_v3 = vld [vmem:[%s4408_s4 + $0x228] sm:$0xff]  }
  0x65   : > { %3324 = vmatprep.subr.bf16.mxu0 %v3573_v15  ;;  %3353 = vmatpush3.bf16.msra.mxu1 %v3570_v4 }
  0x66   : > { %3308 = vmatprep.mubr.bf16.mxu1 %v3957_v33  ;;  %3354 = vmatprep.subr.bf16.mxu1 %v3572_v21 }
  0x67   : > { %3277 = vmatmul.mubr.bf16.gmra.mxu0 %v4037_v22 }
  0x68   : > { %3325 = vmatpush3.bf16.msra.mxu0 %v3573_v15  ;;  %3328 = vmatprep.mubr.bf16.mxu0 %v3853_v12  ;;  %v3579_v12 = vld [vmem:[%s4408_s4 + $0x1b0] sm:$0xff]  }
  0x69   : > { %3326 = vmatprep.subr.bf16.mxu0 %v3575_v13  ;;  %3355 = vmatpush3.bf16.msra.mxu1 %v3572_v21 }
  0x6a   : > { %3356 = vmatprep.subr.bf16.mxu1 %v3574_v29 }
  0x6c   : > { %3327 = vmatpush3.bf16.msra.mxu0 %v3575_v13  ;;  %3309 = vmatmul.mubr.bf16.gmra.mxu1 %v4069_v35 }
  0x6d   : > { %3376 = vmatprep.subr.bf16.mxu0 %v3577_v41  ;;  %3357 = vmatpush3.bf16.msra.mxu1 %v3574_v29 }
  0x6e   : > { %3360 = vmatprep.mubr.bf16.mxu1 %v3964_v39  ;;  %3358 = vmatprep.subr.bf16.mxu1 %v3576_v42  ;;  %v3580_v39 = vld [vmem:[%s4408_s4 + $0x1f0] sm:$0xff]  }
  0x6f   : > { %3329 = vmatmul.mubr.bf16.vlgmr.msra.gmra.mxu0 %v3860_v19 }
  0x70   : > { %3377 = vmatpush3.bf16.msra.mxu0 %v3577_v41  ;;  %3332 = vmatprep.mubr.bf16.mxu0 %v3875_v36 }
  0x71   : > { %3378 = vmatprep.subr.bf16.mxu0 %v3579_v12  ;;  %3359 = vmatpush3.bf16.msra.mxu1 %v3576_v42 }
  0x72   : > { %3408 = vmatprep.subr.bf16.mxu1 %v3578_v43 }
  0x74   : > { %3379 = vmatpush3.bf16.msra.mxu0 %v3579_v12  ;;  %3361 = vmatmul.mubr.bf16.vlgmr.msra.gmra.mxu1 %v3966_v40 }
  0x75   : > { %3380 = vmatprep.subr.bf16.mxu0 %v3581_v45  ;;  %3409 = vmatpush3.bf16.msra.mxu1 %v3578_v43 }
  0x76   : > { %3364 = vmatprep.mubr.bf16.mxu1 %v3989_v51  ;;  %3410 = vmatprep.subr.bf16.mxu1 %v3580_v39 }
  0x77   : > { %3333 = vmatmul.mubr.bf16.gmra.mxu0 %v3890_v52 }
  0x78   : > { %3381 = vmatpush3.bf16.msra.mxu0 %v3581_v45  ;;  %3336 = vmatprep.mubr.bf16.mxu0 %v3905_v61 }
  0x79   : > { %3382 = vmatprep.subr.bf16.mxu0 %v3583_v46  ;;  %3411 = vmatpush3.bf16.msra.mxu1 %v3580_v39 }
  0x7a   : > { %3412 = vmatprep.subr.bf16.mxu1 %v3582_v47 }
  0x7c   : > { %3383 = vmatpush3.bf16.msra.mxu0 %v3583_v46  ;;  %3365 = vmatmul.mubr.bf16.gmra.mxu1 %v3991_v53 }
  0x7d   : > { %3384 = vmatprep.subr.bf16.mxu0 %v3585_v48  ;;  %3413 = vmatpush3.bf16.msra.mxu1 %v3582_v47 }
  0x7e   : > { %3368 = vmatprep.mubr.bf16.mxu1 %v4010_v1  ;;  %3414 = vmatprep.subr.bf16.mxu1 %v3584_v44 }
  0x7f   : > { %3337 = vmatmul.mubr.bf16.gmra.mxu0 %v3915_v0 }
  0x80   : > { %3385 = vmatpush3.bf16.msra.mxu0 %v3585_v48  ;;  %3340 = vmatprep.mubr.bf16.mxu0 %v3929_v8 }
  0x81   : > { %3386 = vmatprep.subr.bf16.mxu0 %v3587_v54  ;;  %3415 = vmatpush3.bf16.msra.mxu1 %v3584_v44 }
  0x82   : > { %3416 = vmatprep.subr.bf16.mxu1 %v3586_v55 }
  0x84   : > { %3387 = vmatpush3.bf16.msra.mxu0 %v3587_v54  ;;  %3369 = vmatmul.mubr.bf16.gmra.mxu1 %v4015_v2 }
  0x85   : > { %3388 = vmatprep.subr.bf16.mxu0 %v3589_v56  ;;  %3417 = vmatpush3.bf16.msra.mxu1 %v3586_v55 }
  0x86   : > { %3372 = vmatprep.mubr.bf16.mxu1 %v4037_v22  ;;  %3418 = vmatprep.subr.bf16.mxu1 %v3588_v57 }
  0x87   : > { %3341 = vmatmul.mubr.bf16.gmra.mxu0 %v4129_v58 }
  0x88   : > { %3389 = vmatpush3.bf16.msra.mxu0 %v3589_v56  ;;  %3392 = vmatprep.mubr.bf16.mxu0 %v3885_v50  ;;  %v3594_v50 = vld [vmem:[%s4408_s4 + $0x230] sm:$0xff]  }
  0x89   : > { %3390 = vmatprep.subr.bf16.mxu0 %v3591_v59  ;;  %3419 = vmatpush3.bf16.msra.mxu1 %v3588_v57 }
  0x8a   : > { %3420 = vmatprep.subr.bf16.mxu1 %v3590_v31 }
  0x8c   : > { %3391 = vmatpush3.bf16.msra.mxu0 %v3591_v59  ;;  %3373 = vmatmul.mubr.bf16.gmra.mxu1 %v4141_v32 }
  0x8d   : > { %3440 = vmatprep.subr.bf16.mxu0 %v3593_v37  ;;  %3421 = vmatpush3.bf16.msra.mxu1 %v3590_v31 }
  0x8e   : > { %3424 = vmatprep.mubr.bf16.mxu1 %v3860_v19  ;;  %3422 = vmatprep.subr.bf16.mxu1 %v3592_v38  ;;  %v3596_v19 = vld [vmem:[%s4408_s4 + $0x220] sm:$0xff]  }
  0x8f   : > { %3393 = vmatmul.mubr.bf16.vlgmr.msra.gmra.mxu0 %v3903_v60  ;;  %v3597_v60 = vld [vmem:[%s4408_s4 + $0x218] sm:$0xff]  }
  0x90   : > { %3441 = vmatpush3.bf16.msra.mxu0 %v3593_v37  ;;  %3396 = vmatprep.mubr.bf16.mxu0 %v3907_v49  ;;  %v1800_v49 = vld [vmem:[#allocation2 + $0xe0] sm:$0xff] }
  0x91   : > { %3442 = vmatprep.subr.bf16.mxu0 %v3594_v50  ;;  %3423 = vmatpush3.bf16.msra.mxu1 %v3592_v38 }
  0x92   : > { %3472 = vmatprep.subr.bf16.mxu1 %v3593_v37 }
  0x94   : > { %3443 = vmatpush3.bf16.msra.mxu0 %v3594_v50  ;;  %3425 = vmatmul.mubr.bf16.vlgmr.msra.gmra.mxu1 %v3875_v36  ;;  %v3598_v36 = vld [vmem:[%s4408_s4 + $0x210] sm:$0xff]  }
  0x95   : > { %3444 = vmatprep.subr.bf16.mxu0 %v3595_v3  ;;  %3480 = vmatpush3.bf16.msra.mxu1 %v3593_v37 }
  0x96   : > { %3428 = vmatprep.mubr.bf16.mxu1 %v3890_v52  ;;  %3473 = vmatprep.subr.bf16.mxu1 %v3594_v50  ;;  %v1799_v52 = vld [vmem:[#allocation2 + $0xd8] sm:$0xff] }
  0x97   : > { %3397 = vmatmul.mubr.bf16.gmra.mxu0 %v3927_v7  ;;  %v1808_v7 = vpack.c.bf16 %v1800_v49, %v1799_v52 }
  0x98   : > { %3445 = vmatpush3.bf16.msra.mxu0 %v3595_v3  ;;  %3400 = vmatprep.mubr.bf16.mxu0 %v3934_v14  ;;  %v2203_v14 = vld [vmem:[#allocation2 + $0xda] sm:$0xff] }
  0x99   : > { %3446 = vmatprep.subr.bf16.mxu0 %v3596_v19  ;;  %3481 = vmatpush3.bf16.msra.mxu1 %v3594_v50 }
  0x9a   : > { %3474 = vmatprep.subr.bf16.mxu1 %v3595_v3 }
  0x9c   : > { %3447 = vmatpush3.bf16.msra.mxu0 %v3596_v19  ;;  %3429 = vmatmul.mubr.bf16.gmra.mxu1 %v3905_v61  ;;  %v3599_v61 = vld [vmem:[%s4408_s4 + $0x208] sm:$0xff]  }
  0x9d   : > { %3448 = vmatprep.subr.bf16.mxu0 %v3597_v60  ;;  %3482 = vmatpush3.bf16.msra.mxu1 %v3595_v3 }
  0x9e   : > { %3432 = vmatprep.mubr.bf16.mxu1 %v3915_v0  ;;  %3475 = vmatprep.subr.bf16.mxu1 %v3596_v19  ;;  %v3600_v0 = vld [vmem:[%s4408_s4 + $0x200] sm:$0xff]  }
  0x9f   : > { %3401 = vmatmul.mubr.bf16.gmra.mxu0 %v3957_v33  ;;  %v2204_v33 = vld [vmem:[#allocation2 + $0xe2] sm:$0xff] }
  0xa0   : > { %3449 = vmatpush3.bf16.msra.mxu0 %v3597_v60  ;;  %3404 = vmatprep.mubr.bf16.mxu0 %v4069_v35 }
  0xa1   : > { %3450 = vmatprep.subr.bf16.mxu0 %v3598_v36  ;;  %3483 = vmatpush3.bf16.msra.mxu1 %v3596_v19 }
  0xa2   : > { %3476 = vmatprep.subr.bf16.mxu1 %v3597_v60 }
  0xa4   : > { %3451 = vmatpush3.bf16.msra.mxu0 %v3598_v36  ;;  %3433 = vmatmul.mubr.bf16.gmra.mxu1 %v3929_v8  ;;  %v3605_v8 = vpack.c.bf16 %v567_v27, %v566_v26 }
  0xa5   : > { %3452 = vmatprep.subr.bf16.mxu0 %v3599_v61  ;;  %3484 = vmatpush3.bf16.msra.mxu1 %v3597_v60 }
  0xa6   : > { %3436 = vmatprep.mubr.bf16.mxu1 %v4129_v58  ;;  %3477 = vmatprep.subr.bf16.mxu1 %v3598_v36 }
  0xa7   : > { %3405 = vmatmul.mubr.bf16.gmra.mxu0 %v1808_v7 }
  0xa8   : > { %3453 = vmatpush3.bf16.msra.mxu0 %v3599_v61  ;;  %3456 = vmatprep.mubr.bf16.mxu0 %v3966_v40  ;;  %v2212_v40 = vpack.c.bf16 %v2204_v33, %v2203_v14 }
  0xa9   : > { %3454 = vmatprep.subr.bf16.mxu0 %v3600_v0  ;;  %3485 = vmatpush3.bf16.msra.mxu1 %v3598_v36 }
  0xaa   : > { %3478 = vmatprep.subr.bf16.mxu1 %v3599_v61 }
  0xac   : > { %3455 = vmatpush3.bf16.msra.mxu0 %v3600_v0  ;;  %3606 = vmatmul.mubr.msk.bf16.gmra.mxu1 %vm3604_vm3, %v3605_v8 }
  0xad   : > { %3486 = vmatpush3.bf16.msra.mxu1 %v3599_v61  ;;  %3464 = vmatprep.mubr.bf16.mxu1 %v4015_v2 }
  0xae   : > { %3479 = vmatprep.subr.bf16.mxu1 %v3600_v0 }
  0xaf   : > { %3457 = vmatmul.mubr.bf16.vlgmr.msra.gmra.mxu0 %v3989_v51 }
  0xb0   : > { %3460 = vmatprep.mubr.bf16.mxu0 %v3991_v53 }
  0xb1   : > { %3487 = vmatpush3.bf16.msra.mxu1 %v3600_v0 }
  0xb4   : > { %3465 = vmatmul.mubr.bf16.vlgmr.msra.gmra.mxu1 %v4037_v22 }
  0xb5   : > { %3468 = vmatprep.mubr.bf16.mxu1 %v4141_v32 }
  0xb7   : > { %3461 = vmatmul.mubr.bf16.gmra.mxu0 %v4010_v1 }
  0xbc   : > { %3469 = vmatmul.mubr.bf16.gmra.mxu1 %v2212_v40 }
  0xef   : > { %v3202_v4 = vpop.f32.mrf.mxu0 }
  0xf1   : > { %v768_v5 = vpop.f32.mrf.mxu0 }
  0xf3   : > { %v3203_v6 = vpop.f32.mrf.mxu0  ;;  %v3234_v9 = vpop.f32.mrf.mxu1 }
  0xf4   : > { %v922_v51 = vadd.f32 %v3234_v9, %v3202_v4 }
  0xf5   : > { %v771_v2 = vpop.f32.mrf.mxu0  ;;  %v913_v11 = vpop.f32.mrf.mxu1 }
  0xf6   : > { %v914_v15 = vadd.f32 %v913_v11, %v768_v5 }
  0xf7   : > { %v3206_v10 = vpop.f32.mrf.mxu0  ;;  %v3235_v16 = vpop.f32.mrf.mxu1 }
  0xf8   : > { %v925_v20 = vadd.f32 %v3235_v16, %v3203_v6 }
  0xf9   : > { %v784_v53 = vpop.f32.mrf.mxu0  ;;  %v916_v21 = vpop.f32.mrf.mxu1 }
  0xfa   : > { %v917_v23 = vadd.f32 %v916_v21, %v771_v2 }
  0xfb   : > { %v3207_v18 = vpop.f32.mrf.mxu0  ;;  %v3238_v24 = vpop.f32.mrf.mxu1 }
  0xfc   : > { %v938_v25 = vadd.f32 %v3238_v24, %v3206_v10 }
  0xfd   : > { %v787_v22 = vpop.f32.mrf.mxu0  ;;  %v929_v13 = vpop.f32.mrf.mxu1 }
  0xfe   : > { %v930_v27 = vadd.f32 %v929_v13, %v784_v53 }
  0xff   : > { %v3210_v1 = vpop.f32.mrf.mxu0  ;;  %v3239_v17 = vpop.f32.mrf.mxu1 }
 0x100   : > { %v941_v29 = vadd.f32 %v3239_v17, %v3207_v18 }
 0x101   : > { %v800_v26 = vpop.f32.mrf.mxu0  ;;  %v932_v30 = vpop.f32.mrf.mxu1 }
 0x102   : > { %v933_v35 = vadd.f32 %v932_v30, %v787_v22 }
 0x103   : > { %v3211_v28 = vpop.f32.mrf.mxu0  ;;  %v3242_v41 = vpop.f32.mrf.mxu1 }
 0x104   : > { %v954_v12 = vadd.f32 %v3242_v41, %v3210_v1 }
 0x105   : > { %v803_v34 = vpop.f32.mrf.mxu0  ;;  %v945_v43 = vpop.f32.mrf.mxu1 }
 0x106   : > { %v946_v39 = vadd.f32 %v945_v43, %v800_v26 }
 0x107   : > { %v3214_v42 = vpop.f32.mrf.mxu0  ;;  %v3243_v46 = vpop.f32.mrf.mxu1 }
 0x108   : > { %v957_v48 = vadd.f32 %v3243_v46, %v3211_v28 }
 0x109   : > { %v816_v45 = vpop.f32.mrf.mxu0  ;;  %v948_v44 = vpop.f32.mrf.mxu1 }
 0x10a   : > { %v949_v55 = vadd.f32 %v948_v44, %v803_v34 }
 0x10b   : > { %v3215_v47 = vpop.f32.mrf.mxu0  ;;  %v3246_v56 = vpop.f32.mrf.mxu1 }
 0x10c   : > { %v970_v57 = vadd.f32 %v3246_v56, %v3214_v42 }
 0x10d   : > { %v819_v54 = vpop.f32.mrf.mxu0  ;;  %v961_v58 = vpop.f32.mrf.mxu1 }
 0x10e   : > { %v962_v62 = vadd.f32 %v961_v58, %v816_v45 }
 0x10f   : > { %v3266_v59 = vpop.f32.mrf.mxu0  ;;  %v3247_v31 = vpop.f32.mrf.mxu1 }
 0x110   : > { %v1164_v63 = vadd.f32 %v3266_v59, %v922_v51  ;;  %v973_v37 = vadd.f32 %v3247_v31, %v3215_v47 }
 0x111   : > { %v1099_v32 = vpop.f32.mrf.mxu0  ;;  %v964_v50 = vpop.f32.mrf.mxu1 }
 0x112   : > { %v1162_v38 = vadd.f32 %v1099_v32, %v914_v15  ;;  %v965_v19 = vadd.f32 %v964_v50, %v819_v54 }
 0x113   : > { %v3267_v3 = vpop.f32.mrf.mxu0 }
 0x114   : > { %v1165_v60 = vadd.f32 %v3267_v3, %v925_v20  ;;  %v3298_v36 = vpop.f32.mrf.mxu1 }
 0x115   : > { %v1102_v52 = vpop.f32.mrf.mxu0  ;;  %v4198_v49 = vadd.f32 %v3298_v36, %v1164_v63 }
 0x116   : > { %v1163_v61 = vadd.f32 %v1102_v52, %v917_v23  ;;  %v1301_v7 = vpop.f32.mrf.mxu1 }
 0x117   : > { %v3270_v0 = vpop.f32.mrf.mxu0  ;;  %v4200_v8 = vadd.f32 %v1301_v7, %v1162_v38 }
 0x118   : > { %v1168_v14 = vadd.f32 %v3270_v0, %v938_v25  ;;  %v3299_v33 = vpop.f32.mrf.mxu1 }
 0x119   : > { %v1115_v40 = vpop.f32.mrf.mxu0  ;;  %v4202_v4 = vadd.f32 %v3299_v33, %v1165_v60 }
 0x11a   : > { %v1166_v5 = vadd.f32 %v1115_v40, %v930_v27  ;;  %v1304_v6 = vpop.f32.mrf.mxu1 }
 0x11b   : > { %v3271_v2 = vpop.f32.mrf.mxu0  ;;  %v4204_v9 = vadd.f32 %v1304_v6, %v1163_v61 }
 0x11c   : > { %v1169_v10 = vadd.f32 %v3271_v2, %v941_v29  ;;  %v3302_v51 = vpop.f32.mrf.mxu1 }
 0x11d   : > { %v1118_v11 = vpop.f32.mrf.mxu0  ;;  %v4206_v53 = vadd.f32 %v3302_v51, %v1168_v14 }
 0x11e   : > { %v1167_v15 = vadd.f32 %v1118_v11, %v933_v35  ;;  %v1317_v16 = vpop.f32.mrf.mxu1 }
 0x11f   : > { %v3274_v18 = vpop.f32.mrf.mxu0  ;;  %v4208_v20 = vadd.f32 %v1317_v16, %v1166_v5 }
 0x120   : > { %v1172_v21 = vadd.f32 %v3274_v18, %v954_v12  ;;  %v3303_v22 = vpop.f32.mrf.mxu1 }
 0x121   : > { %v1131_v23 = vpop.f32.mrf.mxu0  ;;  %v4210_v24 = vadd.f32 %v3303_v22, %v1169_v10 }
 0x122   : > { %v1170_v1 = vadd.f32 %v1131_v23, %v946_v39  ;;  %v1320_v25 = vpop.f32.mrf.mxu1 }
 0x123   : > { %v3275_v13 = vpop.f32.mrf.mxu0  ;;  %v4212_v26 = vadd.f32 %v1320_v25, %v1167_v15 }
 0x124   : > { %v1173_v27 = vadd.f32 %v3275_v13, %v957_v48  ;;  %v3306_v17 = vpop.f32.mrf.mxu1 }
 0x125   : > { %v1134_v28 = vpop.f32.mrf.mxu0  ;;  %v4214_v29 = vadd.f32 %v3306_v17, %v1172_v21 }
 0x126   : > { %v1171_v30 = vadd.f32 %v1134_v28, %v949_v55  ;;  %v1333_v34 = vpop.f32.mrf.mxu1 }
 0x127   : > { %v3278_v35 = vpop.f32.mrf.mxu0  ;;  %v4216_v41 = vadd.f32 %v1333_v34, %v1170_v1 }
 0x128   : > { %v1176_v42 = vadd.f32 %v3278_v35, %v970_v57  ;;  %v3307_v12 = vpop.f32.mrf.mxu1 }
 0x129   : > { %v1147_v43 = vpop.f32.mrf.mxu0  ;;  %v4218_v45 = vadd.f32 %v3307_v12, %v1173_v27 }
 0x12a   : > { %v1174_v39 = vadd.f32 %v1147_v43, %v962_v62  ;;  %v1336_v46 = vpop.f32.mrf.mxu1 }
 0x12b   : > { %v3279_v47 = vpop.f32.mrf.mxu0  ;;  %v4220_v44 = vadd.f32 %v1336_v46, %v1171_v30 }
 0x12c   : > { %v1177_v48 = vadd.f32 %v3279_v47, %v973_v37  ;;  %v3310_v54 = vpop.f32.mrf.mxu1 }
 0x12d   : > { %v1150_v56 = vpop.f32.mrf.mxu0  ;;  %v4222_v58 = vadd.f32 %v3310_v54, %v1176_v42 }
 0x12e   : > { %v1175_v55 = vadd.f32 %v1150_v56, %v965_v19  ;;  %v1349_v59 = vpop.f32.mrf.mxu1 }
 0x12f   : > { %v3330_v63 = vpop.f32.mrf.mxu0  ;;  %v4224_v31 = vadd.f32 %v1349_v59, %v1174_v39 }
 0x130   : > { %v3311_v57 = vpop.f32.mrf.mxu1 }
 0x131   : > { %v1503_v32 = vpop.f32.mrf.mxu0  ;;  %v4226_v38 = vadd.f32 %v3311_v57, %v1177_v48 }
 0x132   : > { %v1352_v50 = vpop.f32.mrf.mxu1 }
 0x133   : > { %v3331_v62 = vpop.f32.mrf.mxu0  ;;  %v4228_v3 = vadd.f32 %v1352_v50, %v1175_v55 }
 0x134   : > { %v3362_v60 = vpop.f32.mrf.mxu1 }
 0x135   : > { %4415 = vst [vmem:[#allocation3_spill] sm:$0xff] %v4228_v3  ;;  %v1506_v36 = vpop.f32.mrf.mxu0 }
 0x136   : > { %v1705_v37 = vpop.f32.mrf.mxu1 }
 0x137   : > { %v3334_v52 = vpop.f32.mrf.mxu0 }
 0x138   : > { %v3363_v61 = vpop.f32.mrf.mxu1 }
 0x139   : > { %v1519_v7 = vpop.f32.mrf.mxu0 }
 0x13a   : > { %v4230_v0 = vpop.f32.mrf.mxu1 }
 0x13b   : > { %v3335_v19 = vpop.f32.mrf.mxu0 }
 0x13c   : > { %v4232_v14 = vpop.f32.mrf.mxu1 }
 0x13d   : > { %v1522_v33 = vpop.f32.mrf.mxu0 }
 0x13e   : > { %v4234_v40 = vpop.f32.mrf.mxu1 }
 0x13f   : > { %v3338_v5 = vpop.f32.mrf.mxu0 }
 0x140   : > { %v4236_v6 = vpop.f32.mrf.mxu1 }
 0x141   : > { %v1535_v2 = vpop.f32.mrf.mxu0 }
 0x142   : > { %v4238_v10 = vpop.f32.mrf.mxu1 }
 0x143   : > { %v3339_v51 = vpop.f32.mrf.mxu0 }
 0x144   : > { %v4240_v11 = vpop.f32.mrf.mxu1 }
 0x145   : > { %v1538_v15 = vpop.f32.mrf.mxu0 }
 0x146   : > { %v4242_v16 = vpop.f32.mrf.mxu1 }
 0x147   : > { %v3342_v18 = vpop.f32.mrf.mxu0 }
 0x148   : > { %v4244_v21 = vpop.f32.mrf.mxu1 }
 0x149   : > { %v4246_v22 = vpop.f32.mrf.mxu0 }
 0x14a   : > { %v4248_v23 = vpop.f32.mrf.mxu1 }
 0x14b   : > { %v4250_v1 = vpop.f32.mrf.mxu0 }
 0x14c   : > { %4416 = vst [vmem:[#allocation4_spill] sm:$0xff] %v4250_v1  ;;  %v4252_v25 = vpop.f32.mrf.mxu1 }
 0x14d   : > { %v4254_v13 = vpop.f32.mrf.mxu0 }
 0x14e   : > { %4417 = vst [vmem:[#allocation5_spill] sm:$0xff] %v4254_v13  ;;  %v4256_v27 = vpop.f32.mrf.mxu1  ;;  %v1566_v13 = vadd.f32 %v1503_v32, %v4200_v8  ;;  %v1573_v8 = vadd.f32 %v3335_v19, %v4210_v24 }
 0x14f   : > { %4418 = vst [vmem:[#allocation6_spill] sm:$0xff] %v4256_v27  ;;  %v3394_v17 = vpop.f32.mrf.mxu0 }
 0x150   : > { %v4258_v28 = vpop.f32.mrf.mxu1 }
 0x151   : > { %4419 = vst [vmem:[#allocation7_spill] sm:$0xff] %v4258_v28  ;;  %v1908_v30 = vpop.f32.mrf.mxu0 }
 0x152   : > { %v4260_v34 = vpop.f32.mrf.mxu1 }
 0x153   : > { %4420 = vst [vmem:[#allocation8_spill] sm:$0xff] %v4260_v34  ;;  %v3395_v35 = vpop.f32.mrf.mxu0 }
 0x154   : > { %v4262_v42 = vpop.f32.mrf.mxu1 }
 0x155   : > { %4421 = vst [vmem:[#allocation9_spill] sm:$0xff] %v4262_v42  ;;  %v1911_v12 = vpop.f32.mrf.mxu0 }
 0x156   : > { %v2110_v43 = vpop.f32.mrf.mxu1 }
 0x157   : > { %v4264_v39 = vpop.f32.mrf.mxu0 }
 0x158   : > { %4422 = vst [vmem:[#allocation10_spill] sm:$0xff] %v4264_v39  ;;  %v3427_v46 = vpop.f32.mrf.mxu1 }
 0x159   : > { %v4266_v47 = vpop.f32.mrf.mxu0 }
 0x15a   : > { %4423 = vst [vmem:[#allocation11_spill] sm:$0xff] %v4266_v47  ;;  %v2113_v48 = vpop.f32.mrf.mxu1  ;;  %v1568_v47 = vadd.f32 %v3330_v63, %v4198_v49  ;;  %v1570_v49 = vadd.f32 %v1519_v7, %v4208_v20  ;;  %v1571_v63 = vadd.f32 %v1522_v33, %v4212_v26  ;;  %v1580_v20 = vadd.f32 %v3342_v18, %v4222_v58 }
 0x15b   : > { %v3399_v54 = vpop.f32.mrf.mxu0 }
 0x15c   : > { %v4268_v56 = vpop.f32.mrf.mxu1  ;;  %v1770_v1 = vadd.f32 %v3362_v60, %v1568_v47  ;;  %v1577_v60 = vadd.f32 %v3339_v51, %v4218_v45  ;;  %v1773_v45 = vadd.f32 %v4238_v10, %v1571_v63  ;;  %v4433_v51 = vld [vmem:[#allocation3_spill] sm:$0xff] }
 0x15d   : > { %4424 = vst [vmem:[#allocation12_spill] sm:$0xff] %v4268_v56  ;;  %v1927_v55 = vpop.f32.mrf.mxu0  ;;  %v4439_v63 = vld [vmem:[#allocation7_spill] sm:$0xff] }
 0x15e   : > { %v4270_v59 = vpop.f32.mrf.mxu1 }
 0x15f   : > { %4425 = vst [vmem:[#allocation13_spill] sm:$0xff] %v4270_v59  ;;  %v3402_v57 = vpop.f32.mrf.mxu0  ;;  %v1569_v59 = vadd.f32 %v3331_v62, %v4202_v4  ;;  %v1574_v62 = vadd.f32 %v1535_v2, %v4216_v41  ;;  %v1775_v41 = vadd.f32 %v4236_v6, %v1573_v8  ;;  %v4432_v6 = vld [vmem:[#allocation4_spill] sm:$0xff] }
 0x160   : > { %v4272_v50 = vpop.f32.mrf.mxu1  ;;  %v1581_v10 = vadd.f32 %v4432_v6, %v4226_v38 }
 0x161   : > { %4426 = vst [vmem:[#allocation14_spill] sm:$0xff] %v4272_v50  ;;  %v4274_v34 = vpop.f32.mrf.mxu0  ;;  %v1567_v50 = vadd.f32 %v1506_v36, %v4204_v9  ;;  %v1771_v4 = vadd.f32 %v3363_v61, %v1569_v59  ;;  %v1576_v9 = vadd.f32 %v3338_v5, %v4214_v29  ;;  %v1575_v36 = vadd.f32 %v1538_v15, %v4220_v44  ;;  %v4434_v15 = vld [vmem:[#allocation5_spill] sm:$0xff] }
 0x162   : > { %4427 = vst [vmem:[#allocation15_spill] sm:$0xff] %v4274_v34  ;;  %v4276_v28 = vpop.f32.mrf.mxu1  ;;  %v1772_v29 = vadd.f32 %v4234_v40, %v1570_v49  ;;  %v1776_v33 = vadd.f32 %v4242_v16, %v1574_v62  ;;  %v1779_v5 = vadd.f32 %v4244_v21, %v1577_v60  ;;  %v1782_v40 = vadd.f32 %v4252_v25, %v1580_v20  ;;  %v4438_v49 = vld [vmem:[#allocation6_spill] sm:$0xff] }
 0x163   : > { %4428 = vst [vmem:[#allocation16_spill] sm:$0xff] %v4276_v28  ;;  %v3403_v27 = vpop.f32.mrf.mxu0  ;;  %v1974_v7 = vadd.f32 %v3395_v35, %v1771_v4  ;;  %v1778_v58 = vadd.f32 %v4240_v11, %v1576_v9  ;;  %v1777_v2 = vadd.f32 %v4248_v23, %v1575_v36  ;;  %v1579_v18 = vadd.f32 %v4434_v15, %v4433_v51 }
 0x164   : > { %v4278_v42 = vpop.f32.mrf.mxu1  ;;  %v1978_v25 = vadd.f32 %v3399_v54, %v1775_v41  ;;  %v1982_v47 = vadd.f32 %v3403_v27, %v1779_v5  ;;  %v4441_v54 = vld [vmem:[#allocation8_spill] sm:$0xff] }
 0x165   : > { %4429 = vst [vmem:[#allocation17_spill] sm:$0xff] %v4278_v42  ;;  %v4280_v39 = vpop.f32.mrf.mxu0  ;;  %v1572_v42 = vadd.f32 %v3334_v52, %v4206_v53  ;;  %v1769_v53 = vadd.f32 %v4230_v0, %v1567_v50  ;;  %v1973_v52 = vadd.f32 %v3394_v17, %v1770_v1  ;;  %v2176_v21 = vadd.f32 %v3427_v46, %v1974_v7  ;;  %v4443_v36 = vld [vmem:[#allocation12_spill] sm:$0xff] }
 0x166   : > { %4430 = vst [vmem:[#allocation18_spill] sm:$0xff] %v4280_v39  ;;  %v4284_v56 = vpop.f32.mrf.mxu1  ;;  %v1768_v39 = vadd.f32 %v1705_v37, %v1566_v13  ;;  %v4435_v13 = vld [vmem:[#allocation9_spill] sm:$0xff]  ;;  %v1781_v27 = vadd.f32 %v4441_v54, %v1579_v18 }
 0x167   : > { %v4286_v3 = vpop.f32.mrf.mxu0  ;;  %v1774_v37 = vadd.f32 %v4232_v14, %v1572_v42  ;;  %v1972_v0 = vadd.f32 %v1911_v12, %v1769_v53  ;;  %v1578_v14 = vadd.f32 %v4246_v22, %v4224_v31  ;;  %v2175_v16 = vadd.f32 %v4435_v13, %v1973_v52  ;;  %v4437_v22 = vld [vmem:[#allocation11_spill] sm:$0xff] }
 0x168   : > { %4431 = vst [vmem:[#allocation19_spill] sm:$0xff] %v4286_v3  ;;  %v4290_v34 = vpop.f32.mrf.mxu1  ;;  %v1971_v61 = vadd.f32 %v1908_v30, %v1768_v39  ;;  %v4436_v30 = vld [vmem:[#allocation10_spill] sm:$0xff]  ;;  %v1975_v23 = vadd.f32 %v4437_v22, %v1772_v29  ;;  %v1976_v42 = vadd.f32 %v1927_v55, %v1773_v45  ;;  %v1981_v39 = vadd.f32 %v3402_v57, %v1778_v58 }
 0x169   : > { %v4292_v28 = vpop.f32.mrf.mxu0  ;;  %v1977_v35 = vadd.f32 %v4436_v30, %v1774_v37  ;;  %v2174_v31 = vadd.f32 %v2113_v48, %v1972_v0  ;;  %v1780_v8 = vadd.f32 %v4438_v49, %v1578_v14  ;;  %v4440_v46 = vld [vmem:[#allocation15_spill] sm:$0xff]  ;;  %v4444_v37 = vld [vmem:[#allocation13_spill] sm:$0xff] }
 0x16a   : > { %v4298_v32 = vpop.f32.mrf.mxu1  ;;  %v2173_v17 = vadd.f32 %v2110_v43, %v1971_v61  ;;  %v1783_v43 = vadd.f32 %v4439_v63, %v1581_v10  ;;  %v1979_v4 = vadd.f32 %v4440_v46, %v1776_v33  ;;  %v2177_v52 = vadd.f32 %v4444_v37, %v1975_v23  ;;  %v4445_v61 = vld [vmem:[#allocation14_spill] sm:$0xff]  ;;  %v4446_v29 = vld [vmem:[#allocation16_spill] sm:$0xff] }
 0x16b   : > { %v4300_v3 = vpop.f32.mrf.mxu0  ;;  %v2179_v20 = vadd.f32 %v4443_v36, %v1977_v35  ;;  %v2180_v7 = vadd.f32 %v4445_v61, %v1978_v25  ;;  %v2178_v41 = vadd.f32 %v4446_v29, %v1976_v42  ;;  %v2184_v33 = vadd.f32 %v4290_v34, %v1982_v47 }
 0x16c   : > { %v4308_v24 = vpop.f32.mrf.mxu1  ;;  %v1986_v34 = vadd.f32 %v4300_v3, %v1783_v43 }
 0x16d   : > { %v4310_v26 = vpop.f32.mrf.mxu0  ;;  %v4442_v55 = vld [vmem:[#allocation18_spill] sm:$0xff] }
 0x16e   : > { %v4316_v19 = vpop.f32.mrf.mxu1  ;;  %v1980_v57 = vadd.f32 %v4442_v55, %v1777_v2  ;;  %v2181_v2 = vadd.f32 %v4284_v56, %v1979_v4  ;;  %v1984_v63 = vadd.f32 %v4310_v26, %v1781_v27 }
 0x16f   : > { %v3458_v44 = vpop.f32.mrf.mxu0  ;;  %v4448_v6 = vld [vmem:[#allocation19_spill] sm:$0xff] }
 0x170   : > { %v4329_v1 = vpop.f32.mrf.mxu1  ;;  %v2377_v59 = vadd.f32 %v3458_v44, %v2175_v16  ;;  %v4447_v44 = vld [vmem:[#allocation17_spill] sm:$0xff]  ;;  %v1985_v10 = vadd.f32 %v4448_v6, %v1782_v40  ;;  %v2182_v13 = vadd.f32 %v4298_v32, %v1980_v57 }
 0x171   : > { %v2312_v11 = vpop.f32.mrf.mxu0  ;;  %v2183_v58 = vadd.f32 %v4447_v44, %v1981_v39  ;;  %v2188_v55 = vadd.f32 %v4329_v1, %v1986_v34 }
 0x172   : > { %v4334_v12 = vpop.f32.mrf.mxu1  ;;  %v2375_v62 = vadd.f32 %v2312_v11, %v2173_v17  ;;  %v2495_v30 = vmul.f32 %v2377_v59, %v2377_v59  ;;  %v2187_v54 = vadd.f32 %v4308_v24, %v1985_v10 }
 0x173   : > { %v3459_v38 = vpop.f32.mrf.mxu0 }
 0x174   : > { %v2378_v50 = vadd.f32 %v3459_v38, %v2176_v21  ;;  %v3466_v9 = vpop.f32.mrf.mxu1  ;;  %v2493_v51 = vmul.f32 %v2375_v62, %v2375_v62 }
 0x175   : > { %v2315_v48 = vpop.f32.mrf.mxu0  ;;  %v4358_v16 = vadd.f32 %v3466_v9, %v2183_v58 }
 0x176   : > { %v2994_v60 = vpack.c.bf16 %v2378_v50, %v2377_v59  ;;  %v2376_v53 = vadd.f32 %v2315_v48, %v2174_v31  ;;  %v2344_v45 = vpop.f32.mrf.mxu1  ;;  %v2496_v42 = vmul.f32 %v2378_v50, %v2378_v50 }
 0x177   : > { %v3462_v0 = vpop.f32.mrf.mxu0  ;;  %v2383_v22 = vadd.f32 %v2344_v45, %v2181_v2  ;;  %v2503_v2 = vmul.f32 %v4358_v16, %v4358_v16 }
 0x178   : > { %3033 = vst [vmem:[%s4344_s17 + $0x8] sm:$0xff] %v2994_v60   ;;  %v2989_v5 = vpack.c.bf16 %v2376_v53, %v2375_v62  ;;  %v2471_v14 = vadd.f32 %v2376_v53, %v2375_v62  ;;  %v3467_v15 = vpop.f32.mrf.mxu1  ;;  %v2494_v18 = vmul.f32 %v2376_v53, %v2376_v53  ;;  %v2381_v39 = vadd.f32 %v3462_v0, %v2179_v20 }
 0x179   : > { %v2328_v11 = vpop.f32.mrf.mxu0  ;;  %v4360_v17 = vadd.f32 %v3467_v15, %v2184_v33  ;;  %v2186_v53 = vadd.f32 %v4334_v12, %v1984_v63  ;;  %v2501_v58 = vmul.f32 %v2383_v22, %v2383_v22 }
 0x17a   : > { %2990 = vst [vmem:[%s4344_s17] sm:$0xff] %v2989_v5   ;;  %v2472_v21 = vadd.f32 %v2471_v14, %v2377_v59  ;;  %v2509_v35 = vadd.f32 %v2494_v18, %v2493_v51  ;;  %v2347_v56 = vpop.f32.mrf.mxu1  ;;  %v2379_v31 = vadd.f32 %v2328_v11, %v2177_v52  ;;  %v1983_v59 = vadd.f32 %v4292_v28, %v1780_v8 }
 0x17b   : > { %v3463_v40 = vpop.f32.mrf.mxu0  ;;  %v3014_v23 = vpack.c.bf16 %v4360_v17, %v4358_v16  ;;  %v2384_v25 = vadd.f32 %v2347_v56, %v2182_v13  ;;  %v2499_v37 = vmul.f32 %v2381_v39, %v2381_v39  ;;  %v2504_v51 = vmul.f32 %v4360_v17, %v4360_v17 }
 0x17c   : > { %v2473_v32 = vadd.f32 %v2472_v21, %v2378_v50  ;;  %v2510_v38 = vadd.f32 %v2509_v35, %v2495_v30  ;;  %v3470_v47 = vpop.f32.mrf.mxu1  ;;  %v2382_v49 = vadd.f32 %v3463_v40, %v2180_v7  ;;  %v2497_v4 = vmul.f32 %v2379_v31, %v2379_v31 }
 0x17d   : > { %v2331_v3 = vpop.f32.mrf.mxu0  ;;  %3037 = vst [vmem:[%s4344_s17 + $0x28] sm:$0xff] %v3014_v23   ;;  %v3009_v43 = vpack.c.bf16 %v2384_v25, %v2383_v22  ;;  %v2185_v27 = vadd.f32 %v4316_v19, %v1983_v59  ;;  %v2389_v36 = vadd.f32 %v3470_v47, %v2187_v54  ;;  %v2502_v12 = vmul.f32 %v2384_v25, %v2384_v25 }
 0x17e   : > { %v2474_v46 = vadd.f32 %v2473_v32, %v2379_v31  ;;  %v2511_v9 = vadd.f32 %v2510_v38, %v2496_v42  ;;  %v2360_v62 = vpop.f32.mrf.mxu1  ;;  %v3004_v48 = vpack.c.bf16 %v2382_v49, %v2381_v39  ;;  %v2380_v50 = vadd.f32 %v2331_v3, %v2178_v41 }
 0x17f   : > { %3036 = vst [vmem:[%s4344_s17 + $0x20] sm:$0xff] %v3009_v43   ;;  %v2387_v61 = vadd.f32 %v2360_v62, %v2185_v27  ;;  %v2500_v41 = vmul.f32 %v2382_v49, %v2382_v49  ;;  %v2507_v56 = vmul.f32 %v2389_v36, %v2389_v36 }
 0x180   : > { %v2512_v57 = vadd.f32 %v2511_v9, %v2497_v4  ;;  %3035 = vst [vmem:[%s4344_s17 + $0x18] sm:$0xff] %v3004_v48   ;;  %v3471_v60 = vpop.f32.mrf.mxu1  ;;  %v2999_v28 = vpack.c.bf16 %v2380_v50, %v2379_v31  ;;  %v2475_v8 = vadd.f32 %v2474_v46, %v2380_v50  ;;  %v2498_v26 = vmul.f32 %v2380_v50, %v2380_v50 }
 0x181   : > { %v2390_v20 = vadd.f32 %v3471_v60, %v2188_v55  ;;  %v2505_v11 = vmul.f32 %v2387_v61, %v2387_v61 }
 0x182   : > { %3034 = vst [vmem:[%s4344_s17 + $0x10] sm:$0xff] %v2999_v28   ;;  %v2476_v24 = vadd.f32 %v2475_v8, %v2381_v39  ;;  %v2513_v52 = vadd.f32 %v2512_v57, %v2498_v26  ;;  %v2363_v1 = vpop.f32.mrf.mxu1 }
 0x183   : > { %v3024_v7 = vpack.c.bf16 %v2390_v20, %v2389_v36  ;;  %v2388_v29 = vadd.f32 %v2363_v1, %v2186_v53 }
 0x184   : > { %v2477_v45 = vadd.f32 %v2476_v24, %v2382_v49  ;;  %v2514_v0 = vadd.f32 %v2513_v52, %v2499_v37 }
 0x185   : > { %3039 = vst [vmem:[%s4344_s17 + $0x38] sm:$0xff] %v3024_v7   ;;  %v3019_v44 = vpack.c.bf16 %v2388_v29, %v2387_v61  ;;  %v2506_v30 = vmul.f32 %v2388_v29, %v2388_v29 }
 0x186   : > { %v2478_v19 = vadd.f32 %v2477_v45, %v2383_v22  ;;  %v2515_v33 = vadd.f32 %v2514_v0, %v2500_v41  ;;  %v2508_v22 = vmul.f32 %v2390_v20, %v2390_v20 }
 0x187   : > { %3038 = vst [vmem:[%s4344_s17 + $0x30] sm:$0xff] %v3019_v44  }
 0x188   : > { %v2516_v5 = vadd.f32 %v2515_v33, %v2501_v58  ;;  %v2479_v14 = vadd.f32 %v2478_v19, %v2384_v25 }
 0x18a   : > { %v2480_v6 = vadd.f32 %v2479_v14, %v4358_v16  ;;  %v2517_v10 = vadd.f32 %v2516_v5, %v2502_v12 }
 0x18c   : > { %v2481_v15 = vadd.f32 %v2480_v6, %v4360_v17  ;;  %v2518_v18 = vadd.f32 %v2517_v10, %v2503_v2 }
 0x18e   : > { %v2482_v13 = vadd.f32 %v2481_v15, %v2387_v61  ;;  %v2519_v21 = vadd.f32 %v2518_v18, %v2504_v51 }
 0x190   : > { %v2483_v34 = vadd.f32 %v2482_v13, %v2388_v29  ;;  %v2520_v35 = vadd.f32 %v2519_v21, %v2505_v11 }
 0x192   : > { %v2484_v31 = vadd.f32 %v2483_v34, %v2389_v36  ;;  %v2521_v40 = vadd.f32 %v2520_v35, %v2506_v30 }
 0x194   : > { %v2485_v16 = vadd.f32 %v2484_v31, %v2390_v20  ;;  %v2522_v23 = vadd.f32 %v2521_v40, %v2507_v56 }
 0x196   : > { %v2486_v25 = vrot.slane %v2485_v16, 4  ;;  %v2523_v32 = vadd.f32 %v2522_v23, %v2508_v22 }
 0x198   : > { %v2487_v42 = vadd.f32 %v2486_v25, %v2485_v16  ;;  %v2524_v17 = vrot.slane %v2523_v32, 4 }
 0x19a   : > { %v2488_v38 = vrot.slane %v2487_v42, 2  ;;  %v2525_v39 = vadd.f32 %v2524_v17, %v2523_v32 }
 0x19c   : > { %v2489_v47 = vadd.f32 %v2488_v38, %v2487_v42  ;;  %v2526_v49 = vrot.slane %v2525_v39, 2 }
 0x19e   : > { %v2490_v3 = vrot.slane %v2489_v47, 1  ;;  %v2527_v59 = vadd.f32 %v2526_v49, %v2525_v39 }
 0x1a0   : > { %v2491_v63 = vadd.f32 %v2490_v3, %v2489_v47  ;;  %v2528_v43 = vrot.slane %v2527_v59, 1 }
 0x1a2   : > { %2492 = vst [vmem:[%s437_s11] sm:$0x1] %v2491_v63  ;;  %v2529_v46 = vadd.f32 %v2528_v43, %v2527_v59 }
 0x1a4   : > { %2530 = vst [vmem:[%s437_s11 + $0x1] sm:$0x1] %v2529_v46 }
 0x1a5 PF: > { %s17_s25 = sadd.s32 1, %s3645_s25   ;;  %s4449_s21 = smov %s3637_s23 }
 0x1a6   : > { %p14_p13 = scmp.ge.s32.totalorder %s17_s25, 6   ;;  %s4450_s22 = smov %s3641_s24 }
 0x1a7   : > { %s4451_s23 = smov %s4454_s26  ;;  %s4452_s24 = smov %s4458_s27 }
 0x1a8   :  { %16 = sbr.rel (!%p14_p13) target bundleno = 3 (0x3), region = 99 }

</bundles_post_ra>
